<compile_context>
chip_gen: v7x
topology: tpu7x:2x2x1
jax: 0.10.0
libtpu: 0.0.40
codegen_flags: <defaults>
</compile_context>

<pallas_src>
import functools

import jax
import jax.numpy as jnp
from jax.experimental import pallas as pl
from jax.experimental.pallas import tpu as pltpu

CP = 128      # lane-dense padded channel width used for every conv activation
FC_H = 256    # classifier hidden width


# -----------------------------------------------------------------------------
# Fused whole-network kernel (one image per grid step)
# -----------------------------------------------------------------------------
def _fused_cnn_kernel(x1_ref, w1_ref, b1_ref, w2_ref, b2_ref, w3_ref, b3_ref,
                      w4_ref, b4_ref, f1w_ref, f1b_ref, f2w_ref, f2b_ref,
                      f3w_ref, f3b_ref, o_ref,
                      acc_ref, a1_ref, a2_ref, a3_ref, t1_ref, t2_ref, *, H, W):
    H2, W2 = H // 2, W // 2
    H4, W4 = H // 4, W // 4

    # Halos of the padded activation buffers must be zero; interiors are fully
    # overwritten below. Re-zeroed every grid step so the batch axis is megacore-safe.
    a1_ref[...] = jnp.zeros_like(a1_ref)
    a2_ref[...] = jnp.zeros_like(a2_ref)
    a3_ref[...] = jnp.zeros_like(a3_ref)

    # ---------------- conv1: single MXU matmul on the pre-packed patch matrix --------
    h = jnp.dot(x1_ref[0], w1_ref[...], preferred_element_type=jnp.float32)
    h = jnp.maximum(h + b1_ref[...], 0.0)                       # (H*W, CP) f32
    a1_ref[pl.ds(1, H), pl.ds(1, W), :] = h.reshape(H, W, CP)

    # -------- 3x3 conv: 9 shifted tap matmuls accumulated into the VMEM scratch ------
    def conv3x3(src_ref, w_ref, hs, ws):
        n = hs * ws
        for t in range(9):
            ky, kx = divmod(t, 3)
            xs = src_ref[pl.ds(ky, hs), pl.ds(kx, ws), :].reshape(n, CP)
            xs = xs.astype(jnp.bfloat16)
            contrib = jnp.dot(xs, w_ref[t], preferred_element_type=jnp.float32)
            if t == 0:
                acc_ref[pl.ds(0, n), :] = contrib
            else:
                acc_ref[pl.ds(0, n), :] += contrib
        return acc_ref[pl.ds(0, n), :]

    # ---------------- 2x2 stride-2 max-pool via four strided loads -------------------
    def pool2x2(stage_ref, hs, ws):
        h2, w2 = hs // 2, ws // 2
        p00 = stage_ref[pl.ds(0, h2, 2), pl.ds(0, w2, 2), :]
        p01 = stage_ref[pl.ds(0, h2, 2), pl.ds(1, w2, 2), :]
        p10 = stage_ref[pl.ds(1, h2, 2), pl.ds(0, w2, 2), :]
        p11 = stage_ref[pl.ds(1, h2, 2), pl.ds(1, w2, 2), :]
        return jnp.maximum(jnp.maximum(p00, p01), jnp.maximum(p10, p11))

    # conv2 + ReLU + pool -> a2 interior
    z = jnp.maximum(conv3x3(a1_ref, w2_ref, H, W) + b2_ref[...], 0.0)
    t1_ref[...] = z.reshape(H, W, CP)
    a2_ref[pl.ds(1, H2), pl.ds(1, W2), :] = pool2x2(t1_ref, H, W)

    # conv3 + ReLU -> a3 interior
    z = jnp.maximum(conv3x3(a2_ref, w3_ref, H2, W2) + b3_ref[...], 0.0)
    a3_ref[pl.ds(1, H2), pl.ds(1, W2), :] = z.reshape(H2, W2, CP)

    # conv4 + ReLU + pool -> pooled (kept as a value; it is tiny)
    z = jnp.maximum(conv3x3(a3_ref, w4_ref, H2, W2) + b4_ref[...], 0.0)
    t2_ref[...] = z.reshape(H2, W2, CP)
    pooled = pool2x2(t2_ref, H2, W2)                            # (H4, W4, CP) f32

    # ---------------- classifier (fused): fc1+ReLU -> fc2+ReLU -> fc3 ----------------
    # fc1 consumed per spatial position: h1 = b1 + sum_p x_p @ W1_p (avoids a big
    # sublane->lane relayout of the flattened feature vector).
    h1 = f1b_ref[...]                                           # (1, 256) f32
    for hh in range(H4):
        for ww in range(W4):
            p = hh * W4 + ww
            lhs = pooled[hh, ww, :].reshape(1, CP).astype(jnp.bfloat16)
            h1 = h1 + jnp.dot(lhs, f1w_ref[p], preferred_element_type=jnp.float32)
    h1 = jnp.maximum(h1, 0.0)
    h2 = jnp.dot(h1.astype(jnp.bfloat16), f2w_ref[...],
                 preferred_element_type=jnp.float32) + f2b_ref[...]
    h2 = jnp.maximum(h2, 0.0)
    logits = jnp.dot(h2.astype(jnp.bfloat16), f3w_ref[...],
                     preferred_element_type=jnp.float32) + f3b_ref[...]   # (1, CP)
    o_ref[0] = jnp.broadcast_to(logits, (8, CP))


# -----------------------------------------------------------------------------
# pallas_call wrapper
# -----------------------------------------------------------------------------
def _run_fused(packed, x1col, H, W):
    B = x1col.shape[0]
    KC = x1col.shape[-1]                    # 9 * Cin
    P = (H // 4) * (W // 4)

    def rep(shape):                          # weight block: full array, resident
        n = len(shape)
        return pl.BlockSpec(shape, lambda b: (0,) * n)

    out = pl.pallas_call(
        functools.partial(_fused_cnn_kernel, H=H, W=W),
        out_shape=jax.ShapeDtypeStruct((B, 8, CP), jnp.float32),
        grid=(B,),
        in_specs=[
            pl.BlockSpec((1, H * W, KC), lambda b: (b, 0, 0)),   # conv1 patches
            rep((KC, CP)), rep((1, CP)),                          # conv1 w, b
            rep((9, CP, CP)), rep((1, CP)),                       # conv2 w, b
            rep((9, CP, CP)), rep((1, CP)),                       # conv3 w, b
            rep((9, CP, CP)), rep((1, CP)),                       # conv4 w, b
            rep((P, CP, FC_H)), rep((1, FC_H)),                   # fc1 w, b
            rep((FC_H, FC_H)), rep((1, FC_H)),                    # fc2 w, b
            rep((FC_H, CP)), rep((1, CP)),                        # fc3 w, b (N padded)
        ],
        out_specs=pl.BlockSpec((1, 8, CP), lambda b: (b, 0, 0)),
        scratch_shapes=[
            pltpu.VMEM((H * W, CP), jnp.float32),                 # conv tap accumulator
            pltpu.VMEM((H + 2, W + 2, CP), jnp.float32),          # conv1 out (haloed)
            pltpu.VMEM((H // 2 + 2, W // 2 + 2, CP), jnp.float32),# conv2-pool out (haloed)
            pltpu.VMEM((H // 2 + 2, W // 2 + 2, CP), jnp.float32),# conv3 out (haloed)
            pltpu.VMEM((H, W, CP), jnp.float32),                  # pre-pool stage (conv2)
            pltpu.VMEM((H // 2, W // 2, CP), jnp.float32),        # pre-pool stage (conv4)
        ],
        compiler_params=pltpu.CompilerParams(dimension_semantics=("parallel",)),
    )(x1col, packed["c1_w"], packed["c1_b"], packed["c2_w"], packed["c2_b"],
      packed["c3_w"], packed["c3_b"], packed["c4_w"], packed["c4_b"],
      packed["fc1_w"], packed["fc1_b"], packed["fc2_w"], packed["fc2_b"],
      packed["fc3_w"], packed["fc3_b"])
    return out[:, 0, :2]


# -----------------------------------------------------------------------------
# Parameter init (PyTorch layouts, deterministic) + one-time packing for the kernel
# -----------------------------------------------------------------------------
def init_params(key, in_channels, image_height, image_width):
    flattened_size = 128 * (image_height // 4) * (image_width // 4)
    shapes = {
        "conv1_w": (64, in_channels, 3, 3), "conv1_b": (64,),
        "conv2_w": (64, 64, 3, 3),          "conv2_b": (64,),
        "conv3_w": (128, 64, 3, 3),         "conv3_b": (128,),
        "conv4_w": (128, 128, 3, 3),        "conv4_b": (128,),
        "fc1_w": (FC_H, flattened_size),    "fc1_b": (FC_H,),
        "fc2_w": (FC_H, FC_H),              "fc2_b": (FC_H,),
        "fc3_w": (2, FC_H),                 "fc3_b": (2,),
    }
    params = {}
    for name, shape in shapes.items():
        key, sub = jax.random.split(key)
        params[name] = 0.05 * jax.random.normal(sub, shape, dtype=jnp.float32)
    return params


def _pack_conv(w_oihw, b, cin_target, cout_target):
    cout, cin = int(w_oihw.shape[0]), int(w_oihw.shape[1])
    w9 = jnp.transpose(w_oihw, (2, 3, 1, 0)).reshape(9, cin, cout)   # (ky*3+kx, ci, co)
    w9 = jnp.pad(w9, ((0, 0), (0, cin_target - cin), (0, cout_target - cout)))
    bp = jnp.pad(b, (0, cout_target - cout))
    return w9.astype(jnp.bfloat16), bp.reshape(1, cout_target).astype(jnp.float32)


def pack_params(p, image_height, image_width):
    """One-time weight reshaping / padding / casting (init time, not per forward)."""
    H4, W4 = image_height // 4, image_width // 4
    packed = {}

    # conv1: (Cout, Cin, 3, 3) -> (9*Cin, Cout) in (ky, kx, ci) order; Cout padded to 128.
    cin, c1 = int(p["conv1_w"].shape[1]), int(p["conv1_w"].shape[0])
    w1 = jnp.transpose(p["conv1_w"], (2, 3, 1, 0)).reshape(9 * cin, c1)
    packed["c1_w"] = jnp.pad(w1, ((0, 0), (0, CP - c1))).astype(jnp.bfloat16)
    packed["c1_b"] = jnp.pad(p["conv1_b"], (0, CP - c1)).reshape(1, CP).astype(jnp.float32)

    packed["c2_w"], packed["c2_b"] = _pack_conv(p["conv2_w"], p["conv2_b"], CP, CP)
    packed["c3_w"], packed["c3_b"] = _pack_conv(p["conv3_w"], p["conv3_b"], CP, CP)
    packed["c4_w"], packed["c4_b"] = _pack_conv(p["conv4_w"], p["conv4_b"], CP, CP)

    # fc1: permute columns from NCHW-flatten order to per-(h,w)-position 128-channel
    # blocks -> (P, 128, 256); the kernel consumes one position per small matmul.
    K = CP * H4 * W4
    assert p["fc1_w"].shape == (FC_H, K)
    w = p["fc1_w"].reshape(FC_H, CP, H4, W4).transpose(2, 3, 1, 0).reshape(H4 * W4, CP, FC_H)
    packed["fc1_w"] = w.astype(jnp.bfloat16)
    packed["fc1_b"] = p["fc1_b"].reshape(1, FC_H).astype(jnp.float32)
    packed["fc2_w"] = p["fc2_w"].T.astype(jnp.bfloat16)
    packed["fc2_b"] = p["fc2_b"].reshape(1, FC_H).astype(jnp.float32)
    # fc3: pad N from 2 -> 128 for a lane-dense final store; real logits are cols [:2].
    n3 = int(p["fc3_w"].shape[0])
    packed["fc3_w"] = jnp.pad(p["fc3_w"].T, ((0, 0), (0, CP - n3))).astype(jnp.bfloat16)
    packed["fc3_b"] = jnp.pad(p["fc3_b"], (0, CP - n3)).reshape(1, CP).astype(jnp.float32)
    return packed


# -----------------------------------------------------------------------------
# Forward pass (mirrors CustomNeuralNetwork.forward)
# -----------------------------------------------------------------------------
def _conv1_patches(x_nchw):
    """(B, Cin, H, W) -> (B, H*W, 9*Cin) conv1 patch matrix (tiny: Cin=1 here)."""
    B, C, H, W = x_nchw.shape
    x = jnp.transpose(x_nchw, (0, 2, 3, 1))                      # NHWC
    xp = jnp.pad(x, ((0, 0), (1, 1), (1, 1), (0, 0)))            # 1-pixel halo
    cols = [xp[:, ky:ky + H, kx:kx + W, :].reshape(B, H * W, C)
            for ky in range(3) for kx in range(3)]
    return jnp.concatenate(cols, axis=-1).astype(jnp.bfloat16)


def custom_neural_network_forward(packed, x_nchw):
    B, C, H, W = x_nchw.shape
    assert H % 4 == 0 and W % 4 == 0, "H and W must be divisible by 4"
    x1col = _conv1_patches(x_nchw)          # tiny JAX glue feeding conv1's MXU matmul
    return _run_fused(packed, x1col, H, W)


if __name__ == "__main__":
    B, C, H, W = 2, 1, 16, 16
    key = jax.random.PRNGKey(0)
    key, xkey = jax.random.split(key)
    x = jax.random.normal(xkey, (B, C, H, W), dtype=jnp.float32)   # NCHW like PyTorch

    params = init_params(key, in_channels=C, image_height=H, image_width=W)
    packed = pack_params(params, image_height=H, image_width=W)

    fwd = jax.jit(custom_neural_network_forward)
    out = jax.block_until_ready(fwd(packed, x))
    assert out.shape == (B, 2), out.shape
    print("KERNEL_OK")
</pallas_src>

<mosaic_0001>
module attributes {stable_mosaic.version = 11 : i64} {
  func.func @_fused_cnn_kernel(%arg0: i32, %arg1: memref<1x256x9xbf16, #tpu.memory_space<vmem>>, %arg2: memref<9x128xbf16, #tpu.memory_space<vmem>>, %arg3: memref<1x128xf32, #tpu.memory_space<vmem>>, %arg4: memref<9x128x128xbf16, #tpu.memory_space<vmem>>, %arg5: memref<1x128xf32, #tpu.memory_space<vmem>>, %arg6: memref<9x128x128xbf16, #tpu.memory_space<vmem>>, %arg7: memref<1x128xf32, #tpu.memory_space<vmem>>, %arg8: memref<9x128x128xbf16, #tpu.memory_space<vmem>>, %arg9: memref<1x128xf32, #tpu.memory_space<vmem>>, %arg10: memref<16x128x256xbf16, #tpu.memory_space<vmem>>, %arg11: memref<1x256xf32, #tpu.memory_space<vmem>>, %arg12: memref<256x256xbf16, #tpu.memory_space<vmem>>, %arg13: memref<1x256xf32, #tpu.memory_space<vmem>>, %arg14: memref<256x128xbf16, #tpu.memory_space<vmem>>, %arg15: memref<1x128xf32, #tpu.memory_space<vmem>>, %arg16: memref<1x8x128xf32, #tpu.memory_space<vmem>>, %arg17: memref<256x128xf32, #tpu.memory_space<vmem>>, %arg18: memref<18x18x128xf32, #tpu.memory_space<vmem>>, %arg19: memref<10x10x128xf32, #tpu.memory_space<vmem>>, %arg20: memref<10x10x128xf32, #tpu.memory_space<vmem>>, %arg21: memref<16x16x128xf32, #tpu.memory_space<vmem>>, %arg22: memref<8x8x128xf32, #tpu.memory_space<vmem>>) attributes {dimension_semantics = [#tpu.dimension_semantics<parallel>], iteration_bounds = array<i64: 2>, scalar_prefetch = 0 : i64, scratch_operands = 6 : i64, tpu.core_type = #tpu.core_type<tc>, window_params = [{transform_indices = @transform_0, window_bounds = array<i64: 1, 256, 9>}, {pipeline_mode = #tpu.pipeline_mode<synchronous>, transform_indices = @transform_1, window_bounds = array<i64: 9, 128>}, {pipeline_mode = #tpu.pipeline_mode<synchronous>, transform_indices = @transform_2, window_bounds = array<i64: 1, 128>}, {pipeline_mode = #tpu.pipeline_mode<synchronous>, transform_indices = @transform_3, window_bounds = array<i64: 9, 128, 128>}, {pipeline_mode = #tpu.pipeline_mode<synchronous>, transform_indices = @transform_4, window_bounds = array<i64: 1, 128>}, {pipeline_mode = #tpu.pipeline_mode<synchronous>, transform_indices = @transform_5, window_bounds = array<i64: 9, 128, 128>}, {pipeline_mode = #tpu.pipeline_mode<synchronous>, transform_indices = @transform_6, window_bounds = array<i64: 1, 128>}, {pipeline_mode = #tpu.pipeline_mode<synchronous>, transform_indices = @transform_7, window_bounds = array<i64: 9, 128, 128>}, {pipeline_mode = #tpu.pipeline_mode<synchronous>, transform_indices = @transform_8, window_bounds = array<i64: 1, 128>}, {pipeline_mode = #tpu.pipeline_mode<synchronous>, transform_indices = @transform_9, window_bounds = array<i64: 16, 128, 256>}, {pipeline_mode = #tpu.pipeline_mode<synchronous>, transform_indices = @transform_10, window_bounds = array<i64: 1, 256>}, {pipeline_mode = #tpu.pipeline_mode<synchronous>, transform_indices = @transform_11, window_bounds = array<i64: 256, 256>}, {pipeline_mode = #tpu.pipeline_mode<synchronous>, transform_indices = @transform_12, window_bounds = array<i64: 1, 256>}, {pipeline_mode = #tpu.pipeline_mode<synchronous>, transform_indices = @transform_13, window_bounds = array<i64: 256, 128>}, {pipeline_mode = #tpu.pipeline_mode<synchronous>, transform_indices = @transform_14, window_bounds = array<i64: 1, 128>}, {transform_indices = @transform_15, window_bounds = array<i64: 1, 8, 128>}]} {
    %cst = arith.constant 0.000000e+00 : f32
    %0 = vector.broadcast %cst : f32 to vector<18x18x128xf32>
    %c0 = arith.constant 0 : index
    %c0_0 = arith.constant 0 : index
    %c0_1 = arith.constant 0 : index
    %1 = vector.load %arg18[%c0, %c0_0, %c0_1] : memref<18x18x128xf32, #tpu.memory_space<vmem>>, vector<18x18x128xf32>
    tpu.vector_store %arg18[%c0, %c0_0, %c0_1], %0 {strides = array<i32>} : memref<18x18x128xf32, #tpu.memory_space<vmem>>, vector<18x18x128xf32>,
    %cst_2 = arith.constant 0.000000e+00 : f32
    %2 = vector.broadcast %cst_2 : f32 to vector<10x10x128xf32>
    %c0_3 = arith.constant 0 : index
    %c0_4 = arith.constant 0 : index
    %c0_5 = arith.constant 0 : index
    %3 = vector.load %arg19[%c0_3, %c0_4, %c0_5] : memref<10x10x128xf32, #tpu.memory_space<vmem>>, vector<10x10x128xf32>
    tpu.vector_store %arg19[%c0_3, %c0_4, %c0_5], %2 {strides = array<i32>} : memref<10x10x128xf32, #tpu.memory_space<vmem>>, vector<10x10x128xf32>,
    %cst_6 = arith.constant 0.000000e+00 : f32
    %4 = vector.broadcast %cst_6 : f32 to vector<10x10x128xf32>
    %c0_7 = arith.constant 0 : index
    %c0_8 = arith.constant 0 : index
    %c0_9 = arith.constant 0 : index
    %5 = vector.load %arg20[%c0_7, %c0_8, %c0_9] : memref<10x10x128xf32, #tpu.memory_space<vmem>>, vector<10x10x128xf32>
    tpu.vector_store %arg20[%c0_7, %c0_8, %c0_9], %4 {strides = array<i32>} : memref<10x10x128xf32, #tpu.memory_space<vmem>>, vector<10x10x128xf32>,
    %c0_10 = arith.constant 0 : index
    %c0_11 = arith.constant 0 : index
    %c0_12 = arith.constant 0 : index
    %6 = vector.load %arg1[%c0_10, %c0_11, %c0_12] : memref<1x256x9xbf16, #tpu.memory_space<vmem>>, vector<1x256x9xbf16>
    %7 = vector.shape_cast %6 : vector<1x256x9xbf16> to vector<256x9xbf16>
    %c0_13 = arith.constant 0 : index
    %c0_14 = arith.constant 0 : index
    %8 = vector.load %arg2[%c0_13, %c0_14] : memref<9x128xbf16, #tpu.memory_space<vmem>>, vector<9x128xbf16>
    %cst_15 = arith.constant dense<0.000000e+00> : vector<256x128xf32>
    %9 = tpu.matmul %7, %8, %cst_15 {dimension_numbers = #tpu.dot_dimension_numbers<[1], [0], [0], [1], [0, 0, 1, 1], [], []>} : vector<256x9xbf16>, vector<9x128xbf16>, vector<256x128xf32> -> vector<256x128xf32>
    %c0_16 = arith.constant 0 : index
    %c0_17 = arith.constant 0 : index
    %10 = vector.load %arg3[%c0_16, %c0_17] : memref<1x128xf32, #tpu.memory_space<vmem>>, vector<1x128xf32>
    %11 = vector.broadcast %10 : vector<1x128xf32> to vector<256x128xf32>
    %12 = arith.addf %9, %11 : vector<256x128xf32>
    %cst_18 = arith.constant 0.000000e+00 : f32
    %13 = vector.broadcast %cst_18 : f32 to vector<256x128xf32>
    %14 = arith.maximumf %12, %13 : vector<256x128xf32>
    %15 = vector.shape_cast %14 : vector<256x128xf32> to vector<16x16x128xf32>
    %c1 = arith.constant 1 : index
    %c1_19 = arith.constant 1 : index
    %c0_20 = arith.constant 0 : index
    %16 = vector.load %arg18[%c1, %c1_19, %c0_20] : memref<18x18x128xf32, #tpu.memory_space<vmem>>, vector<16x16x128xf32>
    tpu.vector_store %arg18[%c1, %c1_19, %c0_20], %15 {strides = array<i32>} : memref<18x18x128xf32, #tpu.memory_space<vmem>>, vector<16x16x128xf32>,
    %c0_21 = arith.constant 0 : index
    %c0_22 = arith.constant 0 : index
    %c0_23 = arith.constant 0 : index
    %17 = vector.load %arg18[%c0_21, %c0_22, %c0_23] : memref<18x18x128xf32, #tpu.memory_space<vmem>>, vector<16x16x128xf32>
    %18 = vector.shape_cast %17 : vector<16x16x128xf32> to vector<256x128xf32>
    %19 = arith.truncf %18 : vector<256x128xf32> to vector<256x128xbf16>
    %c0_24 = arith.constant 0 : index
    %c0_25 = arith.constant 0 : index
    %c0_26 = arith.constant 0 : index
    %20 = vector.load %arg4[%c0_24, %c0_25, %c0_26] : memref<9x128x128xbf16, #tpu.memory_space<vmem>>, vector<1x128x128xbf16>
    %21 = vector.shape_cast %20 : vector<1x128x128xbf16> to vector<128x128xbf16>
    %cst_27 = arith.constant dense<0.000000e+00> : vector<256x128xf32>
    %22 = tpu.matmul %19, %21, %cst_27 {dimension_numbers = #tpu.dot_dimension_numbers<[1], [0], [0], [1], [0, 0, 1, 1], [], []>} : vector<256x128xbf16>, vector<128x128xbf16>, vector<256x128xf32> -> vector<256x128xf32>
    %c0_28 = arith.constant 0 : index
    %c0_29 = arith.constant 0 : index
    %23 = vector.load %arg17[%c0_28, %c0_29] : memref<256x128xf32, #tpu.memory_space<vmem>>, vector<256x128xf32>
    tpu.vector_store %arg17[%c0_28, %c0_29], %22 {strides = array<i32>} : memref<256x128xf32, #tpu.memory_space<vmem>>, vector<256x128xf32>,
    %c0_30 = arith.constant 0 : index
    %c1_31 = arith.constant 1 : index
    %c0_32 = arith.constant 0 : index
    %24 = vector.load %arg18[%c0_30, %c1_31, %c0_32] : memref<18x18x128xf32, #tpu.memory_space<vmem>>, vector<16x16x128xf32>
    %25 = vector.shape_cast %24 : vector<16x16x128xf32> to vector<256x128xf32>
    %26 = arith.truncf %25 : vector<256x128xf32> to vector<256x128xbf16>
    %c1_33 = arith.constant 1 : index
    %c0_34 = arith.constant 0 : index
    %c0_35 = arith.constant 0 : index
    %27 = vector.load %arg4[%c1_33, %c0_34, %c0_35] : memref<9x128x128xbf16, #tpu.memory_space<vmem>>, vector<1x128x128xbf16>
    %28 = vector.shape_cast %27 : vector<1x128x128xbf16> to vector<128x128xbf16>
    %cst_36 = arith.constant dense<0.000000e+00> : vector<256x128xf32>
    %29 = tpu.matmul %26, %28, %cst_36 {dimension_numbers = #tpu.dot_dimension_numbers<[1], [0], [0], [1], [0, 0, 1, 1], [], []>} : vector<256x128xbf16>, vector<128x128xbf16>, vector<256x128xf32> -> vector<256x128xf32>
    %c0_37 = arith.constant 0 : index
    %c0_38 = arith.constant 0 : index
    %30 = vector.load %arg17[%c0_37, %c0_38] : memref<256x128xf32, #tpu.memory_space<vmem>>, vector<256x128xf32>
    %31 = arith.addf %30, %29 : vector<256x128xf32>
    %c0_39 = arith.constant 0 : index
    %c0_40 = arith.constant 0 : index
    %32 = vector.load %arg17[%c0_39, %c0_40] : memref<256x128xf32, #tpu.memory_space<vmem>>, vector<256x128xf32>
    tpu.vector_store %arg17[%c0_39, %c0_40], %31 {strides = array<i32>} : memref<256x128xf32, #tpu.memory_space<vmem>>, vector<256x128xf32>,
    %c0_41 = arith.constant 0 : index
    %c2 = arith.constant 2 : index
    %c0_42 = arith.constant 0 : index
    %33 = vector.load %arg18[%c0_41, %c2, %c0_42] : memref<18x18x128xf32, #tpu.memory_space<vmem>>, vector<16x16x128xf32>
    %34 = vector.shape_cast %33 : vector<16x16x128xf32> to vector<256x128xf32>
    %35 = arith.truncf %34 : vector<256x128xf32> to vector<256x128xbf16>
    %c2_43 = arith.constant 2 : index
    %c0_44 = arith.constant 0 : index
    %c0_45 = arith.constant 0 : index
    %36 = vector.load %arg4[%c2_43, %c0_44, %c0_45] : memref<9x128x128xbf16, #tpu.memory_space<vmem>>, vector<1x128x128xbf16>
    %37 = vector.shape_cast %36 : vector<1x128x128xbf16> to vector<128x128xbf16>
    %cst_46 = arith.constant dense<0.000000e+00> : vector<256x128xf32>
    %38 = tpu.matmul %35, %37, %cst_46 {dimension_numbers = #tpu.dot_dimension_numbers<[1], [0], [0], [1], [0, 0, 1, 1], [], []>} : vector<256x128xbf16>, vector<128x128xbf16>, vector<256x128xf32> -> vector<256x128xf32>
    %c0_47 = arith.constant 0 : index
    %c0_48 = arith.constant 0 : index
    %39 = vector.load %arg17[%c0_47, %c0_48] : memref<256x128xf32, #tpu.memory_space<vmem>>, vector<256x128xf32>
    %40 = arith.addf %39, %38 : vector<256x128xf32>
    %c0_49 = arith.constant 0 : index
    %c0_50 = arith.constant 0 : index
    %41 = vector.load %arg17[%c0_49, %c0_50] : memref<256x128xf32, #tpu.memory_space<vmem>>, vector<256x128xf32>
    tpu.vector_store %arg17[%c0_49, %c0_50], %40 {strides = array<i32>} : memref<256x128xf32, #tpu.memory_space<vmem>>, vector<256x128xf32>,
    %c1_51 = arith.constant 1 : index
    %c0_52 = arith.constant 0 : index
    %c0_53 = arith.constant 0 : index
    %42 = vector.load %arg18[%c1_51, %c0_52, %c0_53] : memref<18x18x128xf32, #tpu.memory_space<vmem>>, vector<16x16x128xf32>
    %43 = vector.shape_cast %42 : vector<16x16x128xf32> to vector<256x128xf32>
    %44 = arith.truncf %43 : vector<256x128xf32> to vector<256x128xbf16>
    %c3 = arith.constant 3 : index
    %c0_54 = arith.constant 0 : index
    %c0_55 = arith.constant 0 : index
    %45 = vector.load %arg4[%c3, %c0_54, %c0_55] : memref<9x128x128xbf16, #tpu.memory_space<vmem>>, vector<1x128x128xbf16>
    %46 = vector.shape_cast %45 : vector<1x128x128xbf16> to vector<128x128xbf16>
    %cst_56 = arith.constant dense<0.000000e+00> : vector<256x128xf32>
    %47 = tpu.matmul %44, %46, %cst_56 {dimension_numbers = #tpu.dot_dimension_numbers<[1], [0], [0], [1], [0, 0, 1, 1], [], []>} : vector<256x128xbf16>, vector<128x128xbf16>, vector<256x128xf32> -> vector<256x128xf32>
    %c0_57 = arith.constant 0 : index
    %c0_58 = arith.constant 0 : index
    %48 = vector.load %arg17[%c0_57, %c0_58] : memref<256x128xf32, #tpu.memory_space<vmem>>, vector<256x128xf32>
    %49 = arith.addf %48, %47 : vector<256x128xf32>
    %c0_59 = arith.constant 0 : index
    %c0_60 = arith.constant 0 : index
    %50 = vector.load %arg17[%c0_59, %c0_60] : memref<256x128xf32, #tpu.memory_space<vmem>>, vector<256x128xf32>
    tpu.vector_store %arg17[%c0_59, %c0_60], %49 {strides = array<i32>} : memref<256x128xf32, #tpu.memory_space<vmem>>, vector<256x128xf32>,
    %c1_61 = arith.constant 1 : index
    %c1_62 = arith.constant 1 : index
    %c0_63 = arith.constant 0 : index
    %51 = vector.load %arg18[%c1_61, %c1_62, %c0_63] : memref<18x18x128xf32, #tpu.memory_space<vmem>>, vector<16x16x128xf32>
    %52 = vector.shape_cast %51 : vector<16x16x128xf32> to vector<256x128xf32>
    %53 = arith.truncf %52 : vector<256x128xf32> to vector<256x128xbf16>
    %c4 = arith.constant 4 : index
    %c0_64 = arith.constant 0 : index
    %c0_65 = arith.constant 0 : index
    %54 = vector.load %arg4[%c4, %c0_64, %c0_65] : memref<9x128x128xbf16, #tpu.memory_space<vmem>>, vector<1x128x128xbf16>
    %55 = vector.shape_cast %54 : vector<1x128x128xbf16> to vector<128x128xbf16>
    %cst_66 = arith.constant dense<0.000000e+00> : vector<256x128xf32>
    %56 = tpu.matmul %53, %55, %cst_66 {dimension_numbers = #tpu.dot_dimension_numbers<[1], [0], [0], [1], [0, 0, 1, 1], [], []>} : vector<256x128xbf16>, vector<128x128xbf16>, vector<256x128xf32> -> vector<256x128xf32>
    %c0_67 = arith.constant 0 : index
    %c0_68 = arith.constant 0 : index
    %57 = vector.load %arg17[%c0_67, %c0_68] : memref<256x128xf32, #tpu.memory_space<vmem>>, vector<256x128xf32>
    %58 = arith.addf %57, %56 : vector<256x128xf32>
    %c0_69 = arith.constant 0 : index
    %c0_70 = arith.constant 0 : index
    %59 = vector.load %arg17[%c0_69, %c0_70] : memref<256x128xf32, #tpu.memory_space<vmem>>, vector<256x128xf32>
    tpu.vector_store %arg17[%c0_69, %c0_70], %58 {strides = array<i32>} : memref<256x128xf32, #tpu.memory_space<vmem>>, vector<256x128xf32>,
    %c1_71 = arith.constant 1 : index
    %c2_72 = arith.constant 2 : index
    %c0_73 = arith.constant 0 : index
    %60 = vector.load %arg18[%c1_71, %c2_72, %c0_73] : memref<18x18x128xf32, #tpu.memory_space<vmem>>, vector<16x16x128xf32>
    %61 = vector.shape_cast %60 : vector<16x16x128xf32> to vector<256x128xf32>
    %62 = arith.truncf %61 : vector<256x128xf32> to vector<256x128xbf16>
    %c5 = arith.constant 5 : index
    %c0_74 = arith.constant 0 : index
    %c0_75 = arith.constant 0 : index
    %63 = vector.load %arg4[%c5, %c0_74, %c0_75] : memref<9x128x128xbf16, #tpu.memory_space<vmem>>, vector<1x128x128xbf16>
    %64 = vector.shape_cast %63 : vector<1x128x128xbf16> to vector<128x128xbf16>
    %cst_76 = arith.constant dense<0.000000e+00> : vector<256x128xf32>
    %65 = tpu.matmul %62, %64, %cst_76 {dimension_numbers = #tpu.dot_dimension_numbers<[1], [0], [0], [1], [0, 0, 1, 1], [], []>} : vector<256x128xbf16>, vector<128x128xbf16>, vector<256x128xf32> -> vector<256x128xf32>
    %c0_77 = arith.constant 0 : index
    %c0_78 = arith.constant 0 : index
    %66 = vector.load %arg17[%c0_77, %c0_78] : memref<256x128xf32, #tpu.memory_space<vmem>>, vector<256x128xf32>
    %67 = arith.addf %66, %65 : vector<256x128xf32>
    %c0_79 = arith.constant 0 : index
    %c0_80 = arith.constant 0 : index
    %68 = vector.load %arg17[%c0_79, %c0_80] : memref<256x128xf32, #tpu.memory_space<vmem>>, vector<256x128xf32>
    tpu.vector_store %arg17[%c0_79, %c0_80], %67 {strides = array<i32>} : memref<256x128xf32, #tpu.memory_space<vmem>>, vector<256x128xf32>,
    %c2_81 = arith.constant 2 : index
    %c0_82 = arith.constant 0 : index
    %c0_83 = arith.constant 0 : index
    %69 = vector.load %arg18[%c2_81, %c0_82, %c0_83] : memref<18x18x128xf32, #tpu.memory_space<vmem>>, vector<16x16x128xf32>
    %70 = vector.shape_cast %69 : vector<16x16x128xf32> to vector<256x128xf32>
    %71 = arith.truncf %70 : vector<256x128xf32> to vector<256x128xbf16>
    %c6 = arith.constant 6 : index
    %c0_84 = arith.constant 0 : index
    %c0_85 = arith.constant 0 : index
    %72 = vector.load %arg4[%c6, %c0_84, %c0_85] : memref<9x128x128xbf16, #tpu.memory_space<vmem>>, vector<1x128x128xbf16>
    %73 = vector.shape_cast %72 : vector<1x128x128xbf16> to vector<128x128xbf16>
    %cst_86 = arith.constant dense<0.000000e+00> : vector<256x128xf32>
    %74 = tpu.matmul %71, %73, %cst_86 {dimension_numbers = #tpu.dot_dimension_numbers<[1], [0], [0], [1], [0, 0, 1, 1], [], []>} : vector<256x128xbf16>, vector<128x128xbf16>, vector<256x128xf32> -> vector<256x128xf32>
    %c0_87 = arith.constant 0 : index
    %c0_88 = arith.constant 0 : index
    %75 = vector.load %arg17[%c0_87, %c0_88] : memref<256x128xf32, #tpu.memory_space<vmem>>, vector<256x128xf32>
    %76 = arith.addf %75, %74 : vector<256x128xf32>
    %c0_89 = arith.constant 0 : index
    %c0_90 = arith.constant 0 : index
    %77 = vector.load %arg17[%c0_89, %c0_90] : memref<256x128xf32, #tpu.memory_space<vmem>>, vector<256x128xf32>
    tpu.vector_store %arg17[%c0_89, %c0_90], %76 {strides = array<i32>} : memref<256x128xf32, #tpu.memory_space<vmem>>, vector<256x128xf32>,
    %c2_91 = arith.constant 2 : index
    %c1_92 = arith.constant 1 : index
    %c0_93 = arith.constant 0 : index
    %78 = vector.load %arg18[%c2_91, %c1_92, %c0_93] : memref<18x18x128xf32, #tpu.memory_space<vmem>>, vector<16x16x128xf32>
    %79 = vector.shape_cast %78 : vector<16x16x128xf32> to vector<256x128xf32>
    %80 = arith.truncf %79 : vector<256x128xf32> to vector<256x128xbf16>
    %c7 = arith.constant 7 : index
    %c0_94 = arith.constant 0 : index
    %c0_95 = arith.constant 0 : index
    %81 = vector.load %arg4[%c7, %c0_94, %c0_95] : memref<9x128x128xbf16, #tpu.memory_space<vmem>>, vector<1x128x128xbf16>
    %82 = vector.shape_cast %81 : vector<1x128x128xbf16> to vector<128x128xbf16>
    %cst_96 = arith.constant dense<0.000000e+00> : vector<256x128xf32>
    %83 = tpu.matmul %80, %82, %cst_96 {dimension_numbers = #tpu.dot_dimension_numbers<[1], [0], [0], [1], [0, 0, 1, 1], [], []>} : vector<256x128xbf16>, vector<128x128xbf16>, vector<256x128xf32> -> vector<256x128xf32>
    %c0_97 = arith.constant 0 : index
    %c0_98 = arith.constant 0 : index
    %84 = vector.load %arg17[%c0_97, %c0_98] : memref<256x128xf32, #tpu.memory_space<vmem>>, vector<256x128xf32>
    %85 = arith.addf %84, %83 : vector<256x128xf32>
    %c0_99 = arith.constant 0 : index
    %c0_100 = arith.constant 0 : index
    %86 = vector.load %arg17[%c0_99, %c0_100] : memref<256x128xf32, #tpu.memory_space<vmem>>, vector<256x128xf32>
    tpu.vector_store %arg17[%c0_99, %c0_100], %85 {strides = array<i32>} : memref<256x128xf32, #tpu.memory_space<vmem>>, vector<256x128xf32>,
    %c2_101 = arith.constant 2 : index
    %c2_102 = arith.constant 2 : index
    %c0_103 = arith.constant 0 : index
    %87 = vector.load %arg18[%c2_101, %c2_102, %c0_103] : memref<18x18x128xf32, #tpu.memory_space<vmem>>, vector<16x16x128xf32>
    %88 = vector.shape_cast %87 : vector<16x16x128xf32> to vector<256x128xf32>
    %89 = arith.truncf %88 : vector<256x128xf32> to vector<256x128xbf16>
    %c8 = arith.constant 8 : index
    %c0_104 = arith.constant 0 : index
    %c0_105 = arith.constant 0 : index
    %90 = vector.load %arg4[%c8, %c0_104, %c0_105] : memref<9x128x128xbf16, #tpu.memory_space<vmem>>, vector<1x128x128xbf16>
    %91 = vector.shape_cast %90 : vector<1x128x128xbf16> to vector<128x128xbf16>
    %cst_106 = arith.constant dense<0.000000e+00> : vector<256x128xf32>
    %92 = tpu.matmul %89, %91, %cst_106 {dimension_numbers = #tpu.dot_dimension_numbers<[1], [0], [0], [1], [0, 0, 1, 1], [], []>} : vector<256x128xbf16>, vector<128x128xbf16>, vector<256x128xf32> -> vector<256x128xf32>
    %c0_107 = arith.constant 0 : index
    %c0_108 = arith.constant 0 : index
    %93 = vector.load %arg17[%c0_107, %c0_108] : memref<256x128xf32, #tpu.memory_space<vmem>>, vector<256x128xf32>
    %94 = arith.addf %93, %92 : vector<256x128xf32>
    %c0_109 = arith.constant 0 : index
    %c0_110 = arith.constant 0 : index
    %95 = vector.load %arg17[%c0_109, %c0_110] : memref<256x128xf32, #tpu.memory_space<vmem>>, vector<256x128xf32>
    tpu.vector_store %arg17[%c0_109, %c0_110], %94 {strides = array<i32>} : memref<256x128xf32, #tpu.memory_space<vmem>>, vector<256x128xf32>,
    %c0_111 = arith.constant 0 : index
    %c0_112 = arith.constant 0 : index
    %96 = vector.load %arg17[%c0_111, %c0_112] : memref<256x128xf32, #tpu.memory_space<vmem>>, vector<256x128xf32>
    %c0_113 = arith.constant 0 : index
    %c0_114 = arith.constant 0 : index
    %97 = vector.load %arg5[%c0_113, %c0_114] : memref<1x128xf32, #tpu.memory_space<vmem>>, vector<1x128xf32>
    %98 = vector.broadcast %97 : vector<1x128xf32> to vector<256x128xf32>
    %99 = arith.addf %96, %98 : vector<256x128xf32>
    %cst_115 = arith.constant 0.000000e+00 : f32
    %100 = vector.broadcast %cst_115 : f32 to vector<256x128xf32>
    %101 = arith.maximumf %99, %100 : vector<256x128xf32>
    %102 = vector.shape_cast %101 : vector<256x128xf32> to vector<16x16x128xf32>
    %c0_116 = arith.constant 0 : index
    %c0_117 = arith.constant 0 : index
    %c0_118 = arith.constant 0 : index
    %103 = vector.load %arg21[%c0_116, %c0_117, %c0_118] : memref<16x16x128xf32, #tpu.memory_space<vmem>>, vector<16x16x128xf32>
    tpu.vector_store %arg21[%c0_116, %c0_117, %c0_118], %102 {strides = array<i32>} : memref<16x16x128xf32, #tpu.memory_space<vmem>>, vector<16x16x128xf32>,
    %c0_119 = arith.constant 0 : index
    %c0_120 = arith.constant 0 : index
    %c0_121 = arith.constant 0 : index
    %104 = tpu.strided_load %arg21[%c0_119, %c0_120, %c0_121] {strides = array<i32: 2, 2, 1>} : memref<16x16x128xf32, #tpu.memory_space<vmem>>, vector<8x8x128xf32>
    %c0_122 = arith.constant 0 : index
    %c1_123 = arith.constant 1 : index
    %c0_124 = arith.constant 0 : index
    %105 = tpu.strided_load %arg21[%c0_122, %c1_123, %c0_124] {strides = array<i32: 2, 2, 1>} : memref<16x16x128xf32, #tpu.memory_space<vmem>>, vector<8x8x128xf32>
    %c1_125 = arith.constant 1 : index
    %c0_126 = arith.constant 0 : index
    %c0_127 = arith.constant 0 : index
    %106 = tpu.strided_load %arg21[%c1_125, %c0_126, %c0_127] {strides = array<i32: 2, 2, 1>} : memref<16x16x128xf32, #tpu.memory_space<vmem>>, vector<8x8x128xf32>
    %c1_128 = arith.constant 1 : index
    %c1_129 = arith.constant 1 : index
    %c0_130 = arith.constant 0 : index
    %107 = tpu.strided_load %arg21[%c1_128, %c1_129, %c0_130] {strides = array<i32: 2, 2, 1>} : memref<16x16x128xf32, #tpu.memory_space<vmem>>, vector<8x8x128xf32>
    %108 = arith.maximumf %104, %105 : vector<8x8x128xf32>
    %109 = arith.maximumf %106, %107 : vector<8x8x128xf32>
    %110 = arith.maximumf %108, %109 : vector<8x8x128xf32>
    %c1_131 = arith.constant 1 : index
    %c1_132 = arith.constant 1 : index
    %c0_133 = arith.constant 0 : index
    %111 = vector.load %arg19[%c1_131, %c1_132, %c0_133] : memref<10x10x128xf32, #tpu.memory_space<vmem>>, vector<8x8x128xf32>
    tpu.vector_store %arg19[%c1_131, %c1_132, %c0_133], %110 {strides = array<i32>} : memref<10x10x128xf32, #tpu.memory_space<vmem>>, vector<8x8x128xf32>,
    %c0_134 = arith.constant 0 : index
    %c0_135 = arith.constant 0 : index
    %c0_136 = arith.constant 0 : index
    %112 = vector.load %arg19[%c0_134, %c0_135, %c0_136] : memref<10x10x128xf32, #tpu.memory_space<vmem>>, vector<8x8x128xf32>
    %113 = vector.shape_cast %112 : vector<8x8x128xf32> to vector<64x128xf32>
    %114 = arith.truncf %113 : vector<64x128xf32> to vector<64x128xbf16>
    %c0_137 = arith.constant 0 : index
    %c0_138 = arith.constant 0 : index
    %c0_139 = arith.constant 0 : index
    %115 = vector.load %arg6[%c0_137, %c0_138, %c0_139] : memref<9x128x128xbf16, #tpu.memory_space<vmem>>, vector<1x128x128xbf16>
    %116 = vector.shape_cast %115 : vector<1x128x128xbf16> to vector<128x128xbf16>
    %cst_140 = arith.constant dense<0.000000e+00> : vector<64x128xf32>
    %117 = tpu.matmul %114, %116, %cst_140 {dimension_numbers = #tpu.dot_dimension_numbers<[1], [0], [0], [1], [0, 0, 1, 1], [], []>} : vector<64x128xbf16>, vector<128x128xbf16>, vector<64x128xf32> -> vector<64x128xf32>
    %c0_141 = arith.constant 0 : index
    %c0_142 = arith.constant 0 : index
    %118 = vector.load %arg17[%c0_141, %c0_142] : memref<256x128xf32, #tpu.memory_space<vmem>>, vector<64x128xf32>
    tpu.vector_store %arg17[%c0_141, %c0_142], %117 {strides = array<i32>} : memref<256x128xf32, #tpu.memory_space<vmem>>, vector<64x128xf32>,
    %c0_143 = arith.constant 0 : index
    %c1_144 = arith.constant 1 : index
    %c0_145 = arith.constant 0 : index
    %119 = vector.load %arg19[%c0_143, %c1_144, %c0_145] : memref<10x10x128xf32, #tpu.memory_space<vmem>>, vector<8x8x128xf32>
    %120 = vector.shape_cast %119 : vector<8x8x128xf32> to vector<64x128xf32>
    %121 = arith.truncf %120 : vector<64x128xf32> to vector<64x128xbf16>
    %c1_146 = arith.constant 1 : index
    %c0_147 = arith.constant 0 : index
    %c0_148 = arith.constant 0 : index
    %122 = vector.load %arg6[%c1_146, %c0_147, %c0_148] : memref<9x128x128xbf16, #tpu.memory_space<vmem>>, vector<1x128x128xbf16>
    %123 = vector.shape_cast %122 : vector<1x128x128xbf16> to vector<128x128xbf16>
    %cst_149 = arith.constant dense<0.000000e+00> : vector<64x128xf32>
    %124 = tpu.matmul %121, %123, %cst_149 {dimension_numbers = #tpu.dot_dimension_numbers<[1], [0], [0], [1], [0, 0, 1, 1], [], []>} : vector<64x128xbf16>, vector<128x128xbf16>, vector<64x128xf32> -> vector<64x128xf32>
    %c0_150 = arith.constant 0 : index
    %c0_151 = arith.constant 0 : index
    %125 = vector.load %arg17[%c0_150, %c0_151] : memref<256x128xf32, #tpu.memory_space<vmem>>, vector<64x128xf32>
    %126 = arith.addf %125, %124 : vector<64x128xf32>
    %c0_152 = arith.constant 0 : index
    %c0_153 = arith.constant 0 : index
    %127 = vector.load %arg17[%c0_152, %c0_153] : memref<256x128xf32, #tpu.memory_space<vmem>>, vector<64x128xf32>
    tpu.vector_store %arg17[%c0_152, %c0_153], %126 {strides = array<i32>} : memref<256x128xf32, #tpu.memory_space<vmem>>, vector<64x128xf32>,
    %c0_154 = arith.constant 0 : index
    %c2_155 = arith.constant 2 : index
    %c0_156 = arith.constant 0 : index
    %128 = vector.load %arg19[%c0_154, %c2_155, %c0_156] : memref<10x10x128xf32, #tpu.memory_space<vmem>>, vector<8x8x128xf32>
    %129 = vector.shape_cast %128 : vector<8x8x128xf32> to vector<64x128xf32>
    %130 = arith.truncf %129 : vector<64x128xf32> to vector<64x128xbf16>
    %c2_157 = arith.constant 2 : index
    %c0_158 = arith.constant 0 : index
    %c0_159 = arith.constant 0 : index
    %131 = vector.load %arg6[%c2_157, %c0_158, %c0_159] : memref<9x128x128xbf16, #tpu.memory_space<vmem>>, vector<1x128x128xbf16>
    %132 = vector.shape_cast %131 : vector<1x128x128xbf16> to vector<128x128xbf16>
    %cst_160 = arith.constant dense<0.000000e+00> : vector<64x128xf32>
    %133 = tpu.matmul %130, %132, %cst_160 {dimension_numbers = #tpu.dot_dimension_numbers<[1], [0], [0], [1], [0, 0, 1, 1], [], []>} : vector<64x128xbf16>, vector<128x128xbf16>, vector<64x128xf32> -> vector<64x128xf32>
    %c0_161 = arith.constant 0 : index
    %c0_162 = arith.constant 0 : index
    %134 = vector.load %arg17[%c0_161, %c0_162] : memref<256x128xf32, #tpu.memory_space<vmem>>, vector<64x128xf32>
    %135 = arith.addf %134, %133 : vector<64x128xf32>
    %c0_163 = arith.constant 0 : index
    %c0_164 = arith.constant 0 : index
    %136 = vector.load %arg17[%c0_163, %c0_164] : memref<256x128xf32, #tpu.memory_space<vmem>>, vector<64x128xf32>
    tpu.vector_store %arg17[%c0_163, %c0_164], %135 {strides = array<i32>} : memref<256x128xf32, #tpu.memory_space<vmem>>, vector<64x128xf32>,
    %c1_165 = arith.constant 1 : index
    %c0_166 = arith.constant 0 : index
    %c0_167 = arith.constant 0 : index
    %137 = vector.load %arg19[%c1_165, %c0_166, %c0_167] : memref<10x10x128xf32, #tpu.memory_space<vmem>>, vector<8x8x128xf32>
    %138 = vector.shape_cast %137 : vector<8x8x128xf32> to vector<64x128xf32>
    %139 = arith.truncf %138 : vector<64x128xf32> to vector<64x128xbf16>
    %c3_168 = arith.constant 3 : index
    %c0_169 = arith.constant 0 : index
    %c0_170 = arith.constant 0 : index
    %140 = vector.load %arg6[%c3_168, %c0_169, %c0_170] : memref<9x128x128xbf16, #tpu.memory_space<vmem>>, vector<1x128x128xbf16>
    %141 = vector.shape_cast %140 : vector<1x128x128xbf16> to vector<128x128xbf16>
    %cst_171 = arith.constant dense<0.000000e+00> : vector<64x128xf32>
    %142 = tpu.matmul %139, %141, %cst_171 {dimension_numbers = #tpu.dot_dimension_numbers<[1], [0], [0], [1], [0, 0, 1, 1], [], []>} : vector<64x128xbf16>, vector<128x128xbf16>, vector<64x128xf32> -> vector<64x128xf32>
    %c0_172 = arith.constant 0 : index
    %c0_173 = arith.constant 0 : index
    %143 = vector.load %arg17[%c0_172, %c0_173] : memref<256x128xf32, #tpu.memory_space<vmem>>, vector<64x128xf32>
    %144 = arith.addf %143, %142 : vector<64x128xf32>
    %c0_174 = arith.constant 0 : index
    %c0_175 = arith.constant 0 : index
    %145 = vector.load %arg17[%c0_174, %c0_175] : memref<256x128xf32, #tpu.memory_space<vmem>>, vector<64x128xf32>
    tpu.vector_store %arg17[%c0_174, %c0_175], %144 {strides = array<i32>} : memref<256x128xf32, #tpu.memory_space<vmem>>, vector<64x128xf32>,
    %c1_176 = arith.constant 1 : index
    %c1_177 = arith.constant 1 : index
    %c0_178 = arith.constant 0 : index
    %146 = vector.load %arg19[%c1_176, %c1_177, %c0_178] : memref<10x10x128xf32, #tpu.memory_space<vmem>>, vector<8x8x128xf32>
    %147 = vector.shape_cast %146 : vector<8x8x128xf32> to vector<64x128xf32>
    %148 = arith.truncf %147 : vector<64x128xf32> to vector<64x128xbf16>
    %c4_179 = arith.constant 4 : index
    %c0_180 = arith.constant 0 : index
    %c0_181 = arith.constant 0 : index
    %149 = vector.load %arg6[%c4_179, %c0_180, %c0_181] : memref<9x128x128xbf16, #tpu.memory_space<vmem>>, vector<1x128x128xbf16>
    %150 = vector.shape_cast %149 : vector<1x128x128xbf16> to vector<128x128xbf16>
    %cst_182 = arith.constant dense<0.000000e+00> : vector<64x128xf32>
    %151 = tpu.matmul %148, %150, %cst_182 {dimension_numbers = #tpu.dot_dimension_numbers<[1], [0], [0], [1], [0, 0, 1, 1], [], []>} : vector<64x128xbf16>, vector<128x128xbf16>, vector<64x128xf32> -> vector<64x128xf32>
    %c0_183 = arith.constant 0 : index
    %c0_184 = arith.constant 0 : index
    %152 = vector.load %arg17[%c0_183, %c0_184] : memref<256x128xf32, #tpu.memory_space<vmem>>, vector<64x128xf32>
    %153 = arith.addf %152, %151 : vector<64x128xf32>
    %c0_185 = arith.constant 0 : index
    %c0_186 = arith.constant 0 : index
    %154 = vector.load %arg17[%c0_185, %c0_186] : memref<256x128xf32, #tpu.memory_space<vmem>>, vector<64x128xf32>
    tpu.vector_store %arg17[%c0_185, %c0_186], %153 {strides = array<i32>} : memref<256x128xf32, #tpu.memory_space<vmem>>, vector<64x128xf32>,
    %c1_187 = arith.constant 1 : index
    %c2_188 = arith.constant 2 : index
    %c0_189 = arith.constant 0 : index
    %155 = vector.load %arg19[%c1_187, %c2_188, %c0_189] : memref<10x10x128xf32, #tpu.memory_space<vmem>>, vector<8x8x128xf32>
    %156 = vector.shape_cast %155 : vector<8x8x128xf32> to vector<64x128xf32>
    %157 = arith.truncf %156 : vector<64x128xf32> to vector<64x128xbf16>
    %c5_190 = arith.constant 5 : index
    %c0_191 = arith.constant 0 : index
    %c0_192 = arith.constant 0 : index
    %158 = vector.load %arg6[%c5_190, %c0_191, %c0_192] : memref<9x128x128xbf16, #tpu.memory_space<vmem>>, vector<1x128x128xbf16>
    %159 = vector.shape_cast %158 : vector<1x128x128xbf16> to vector<128x128xbf16>
    %cst_193 = arith.constant dense<0.000000e+00> : vector<64x128xf32>
    %160 = tpu.matmul %157, %159, %cst_193 {dimension_numbers = #tpu.dot_dimension_numbers<[1], [0], [0], [1], [0, 0, 1, 1], [], []>} : vector<64x128xbf16>, vector<128x128xbf16>, vector<64x128xf32> -> vector<64x128xf32>
    %c0_194 = arith.constant 0 : index
    %c0_195 = arith.constant 0 : index
    %161 = vector.load %arg17[%c0_194, %c0_195] : memref<256x128xf32, #tpu.memory_space<vmem>>, vector<64x128xf32>
    %162 = arith.addf %161, %160 : vector<64x128xf32>
    %c0_196 = arith.constant 0 : index
    %c0_197 = arith.constant 0 : index
    %163 = vector.load %arg17[%c0_196, %c0_197] : memref<256x128xf32, #tpu.memory_space<vmem>>, vector<64x128xf32>
    tpu.vector_store %arg17[%c0_196, %c0_197], %162 {strides = array<i32>} : memref<256x128xf32, #tpu.memory_space<vmem>>, vector<64x128xf32>,
    %c2_198 = arith.constant 2 : index
    %c0_199 = arith.constant 0 : index
    %c0_200 = arith.constant 0 : index
    %164 = vector.load %arg19[%c2_198, %c0_199, %c0_200] : memref<10x10x128xf32, #tpu.memory_space<vmem>>, vector<8x8x128xf32>
    %165 = vector.shape_cast %164 : vector<8x8x128xf32> to vector<64x128xf32>
    %166 = arith.truncf %165 : vector<64x128xf32> to vector<64x128xbf16>
    %c6_201 = arith.constant 6 : index
    %c0_202 = arith.constant 0 : index
    %c0_203 = arith.constant 0 : index
    %167 = vector.load %arg6[%c6_201, %c0_202, %c0_203] : memref<9x128x128xbf16, #tpu.memory_space<vmem>>, vector<1x128x128xbf16>
    %168 = vector.shape_cast %167 : vector<1x128x128xbf16> to vector<128x128xbf16>
    %cst_204 = arith.constant dense<0.000000e+00> : vector<64x128xf32>
    %169 = tpu.matmul %166, %168, %cst_204 {dimension_numbers = #tpu.dot_dimension_numbers<[1], [0], [0], [1], [0, 0, 1, 1], [], []>} : vector<64x128xbf16>, vector<128x128xbf16>, vector<64x128xf32> -> vector<64x128xf32>
    %c0_205 = arith.constant 0 : index
    %c0_206 = arith.constant 0 : index
    %170 = vector.load %arg17[%c0_205, %c0_206] : memref<256x128xf32, #tpu.memory_space<vmem>>, vector<64x128xf32>
    %171 = arith.addf %170, %169 : vector<64x128xf32>
    %c0_207 = arith.constant 0 : index
    %c0_208 = arith.constant 0 : index
    %172 = vector.load %arg17[%c0_207, %c0_208] : memref<256x128xf32, #tpu.memory_space<vmem>>, vector<64x128xf32>
    tpu.vector_store %arg17[%c0_207, %c0_208], %171 {strides = array<i32>} : memref<256x128xf32, #tpu.memory_space<vmem>>, vector<64x128xf32>,
    %c2_209 = arith.constant 2 : index
    %c1_210 = arith.constant 1 : index
    %c0_211 = arith.constant 0 : index
    %173 = vector.load %arg19[%c2_209, %c1_210, %c0_211] : memref<10x10x128xf32, #tpu.memory_space<vmem>>, vector<8x8x128xf32>
    %174 = vector.shape_cast %173 : vector<8x8x128xf32> to vector<64x128xf32>
    %175 = arith.truncf %174 : vector<64x128xf32> to vector<64x128xbf16>
    %c7_212 = arith.constant 7 : index
    %c0_213 = arith.constant 0 : index
    %c0_214 = arith.constant 0 : index
    %176 = vector.load %arg6[%c7_212, %c0_213, %c0_214] : memref<9x128x128xbf16, #tpu.memory_space<vmem>>, vector<1x128x128xbf16>
    %177 = vector.shape_cast %176 : vector<1x128x128xbf16> to vector<128x128xbf16>
    %cst_215 = arith.constant dense<0.000000e+00> : vector<64x128xf32>
    %178 = tpu.matmul %175, %177, %cst_215 {dimension_numbers = #tpu.dot_dimension_numbers<[1], [0], [0], [1], [0, 0, 1, 1], [], []>} : vector<64x128xbf16>, vector<128x128xbf16>, vector<64x128xf32> -> vector<64x128xf32>
    %c0_216 = arith.constant 0 : index
    %c0_217 = arith.constant 0 : index
    %179 = vector.load %arg17[%c0_216, %c0_217] : memref<256x128xf32, #tpu.memory_space<vmem>>, vector<64x128xf32>
    %180 = arith.addf %179, %178 : vector<64x128xf32>
    %c0_218 = arith.constant 0 : index
    %c0_219 = arith.constant 0 : index
    %181 = vector.load %arg17[%c0_218, %c0_219] : memref<256x128xf32, #tpu.memory_space<vmem>>, vector<64x128xf32>
    tpu.vector_store %arg17[%c0_218, %c0_219], %180 {strides = array<i32>} : memref<256x128xf32, #tpu.memory_space<vmem>>, vector<64x128xf32>,
    %c2_220 = arith.constant 2 : index
    %c2_221 = arith.constant 2 : index
    %c0_222 = arith.constant 0 : index
    %182 = vector.load %arg19[%c2_220, %c2_221, %c0_222] : memref<10x10x128xf32, #tpu.memory_space<vmem>>, vector<8x8x128xf32>
    %183 = vector.shape_cast %182 : vector<8x8x128xf32> to vector<64x128xf32>
    %184 = arith.truncf %183 : vector<64x128xf32> to vector<64x128xbf16>
    %c8_223 = arith.constant 8 : index
    %c0_224 = arith.constant 0 : index
    %c0_225 = arith.constant 0 : index
    %185 = vector.load %arg6[%c8_223, %c0_224, %c0_225] : memref<9x128x128xbf16, #tpu.memory_space<vmem>>, vector<1x128x128xbf16>
    %186 = vector.shape_cast %185 : vector<1x128x128xbf16> to vector<128x128xbf16>
    %cst_226 = arith.constant dense<0.000000e+00> : vector<64x128xf32>
    %187 = tpu.matmul %184, %186, %cst_226 {dimension_numbers = #tpu.dot_dimension_numbers<[1], [0], [0], [1], [0, 0, 1, 1], [], []>} : vector<64x128xbf16>, vector<128x128xbf16>, vector<64x128xf32> -> vector<64x128xf32>
    %c0_227 = arith.constant 0 : index
    %c0_228 = arith.constant 0 : index
    %188 = vector.load %arg17[%c0_227, %c0_228] : memref<256x128xf32, #tpu.memory_space<vmem>>, vector<64x128xf32>
    %189 = arith.addf %188, %187 : vector<64x128xf32>
    %c0_229 = arith.constant 0 : index
    %c0_230 = arith.constant 0 : index
    %190 = vector.load %arg17[%c0_229, %c0_230] : memref<256x128xf32, #tpu.memory_space<vmem>>, vector<64x128xf32>
    tpu.vector_store %arg17[%c0_229, %c0_230], %189 {strides = array<i32>} : memref<256x128xf32, #tpu.memory_space<vmem>>, vector<64x128xf32>,
    %c0_231 = arith.constant 0 : index
    %c0_232 = arith.constant 0 : index
    %191 = vector.load %arg17[%c0_231, %c0_232] : memref<256x128xf32, #tpu.memory_space<vmem>>, vector<64x128xf32>
    %c0_233 = arith.constant 0 : index
    %c0_234 = arith.constant 0 : index
    %192 = vector.load %arg7[%c0_233, %c0_234] : memref<1x128xf32, #tpu.memory_space<vmem>>, vector<1x128xf32>
    %193 = vector.broadcast %192 : vector<1x128xf32> to vector<64x128xf32>
    %194 = arith.addf %191, %193 : vector<64x128xf32>
    %cst_235 = arith.constant 0.000000e+00 : f32
    %195 = vector.broadcast %cst_235 : f32 to vector<64x128xf32>
    %196 = arith.maximumf %194, %195 : vector<64x128xf32>
    %197 = vector.shape_cast %196 : vector<64x128xf32> to vector<8x8x128xf32>
    %c1_236 = arith.constant 1 : index
    %c1_237 = arith.constant 1 : index
    %c0_238 = arith.constant 0 : index
    %198 = vector.load %arg20[%c1_236, %c1_237, %c0_238] : memref<10x10x128xf32, #tpu.memory_space<vmem>>, vector<8x8x128xf32>
    tpu.vector_store %arg20[%c1_236, %c1_237, %c0_238], %197 {strides = array<i32>} : memref<10x10x128xf32, #tpu.memory_space<vmem>>, vector<8x8x128xf32>,
    %c0_239 = arith.constant 0 : index
    %c0_240 = arith.constant 0 : index
    %c0_241 = arith.constant 0 : index
    %199 = vector.load %arg20[%c0_239, %c0_240, %c0_241] : memref<10x10x128xf32, #tpu.memory_space<vmem>>, vector<8x8x128xf32>
    %200 = vector.shape_cast %199 : vector<8x8x128xf32> to vector<64x128xf32>
    %201 = arith.truncf %200 : vector<64x128xf32> to vector<64x128xbf16>
    %c0_242 = arith.constant 0 : index
    %c0_243 = arith.constant 0 : index
    %c0_244 = arith.constant 0 : index
    %202 = vector.load %arg8[%c0_242, %c0_243, %c0_244] : memref<9x128x128xbf16, #tpu.memory_space<vmem>>, vector<1x128x128xbf16>
    %203 = vector.shape_cast %202 : vector<1x128x128xbf16> to vector<128x128xbf16>
    %cst_245 = arith.constant dense<0.000000e+00> : vector<64x128xf32>
    %204 = tpu.matmul %201, %203, %cst_245 {dimension_numbers = #tpu.dot_dimension_numbers<[1], [0], [0], [1], [0, 0, 1, 1], [], []>} : vector<64x128xbf16>, vector<128x128xbf16>, vector<64x128xf32> -> vector<64x128xf32>
    %c0_246 = arith.constant 0 : index
    %c0_247 = arith.constant 0 : index
    %205 = vector.load %arg17[%c0_246, %c0_247] : memref<256x128xf32, #tpu.memory_space<vmem>>, vector<64x128xf32>
    tpu.vector_store %arg17[%c0_246, %c0_247], %204 {strides = array<i32>} : memref<256x128xf32, #tpu.memory_space<vmem>>, vector<64x128xf32>,
    %c0_248 = arith.constant 0 : index
    %c1_249 = arith.constant 1 : index
    %c0_250 = arith.constant 0 : index
    %206 = vector.load %arg20[%c0_248, %c1_249, %c0_250] : memref<10x10x128xf32, #tpu.memory_space<vmem>>, vector<8x8x128xf32>
    %207 = vector.shape_cast %206 : vector<8x8x128xf32> to vector<64x128xf32>
    %208 = arith.truncf %207 : vector<64x128xf32> to vector<64x128xbf16>
    %c1_251 = arith.constant 1 : index
    %c0_252 = arith.constant 0 : index
    %c0_253 = arith.constant 0 : index
    %209 = vector.load %arg8[%c1_251, %c0_252, %c0_253] : memref<9x128x128xbf16, #tpu.memory_space<vmem>>, vector<1x128x128xbf16>
    %210 = vector.shape_cast %209 : vector<1x128x128xbf16> to vector<128x128xbf16>
    %cst_254 = arith.constant dense<0.000000e+00> : vector<64x128xf32>
    %211 = tpu.matmul %208, %210, %cst_254 {dimension_numbers = #tpu.dot_dimension_numbers<[1], [0], [0], [1], [0, 0, 1, 1], [], []>} : vector<64x128xbf16>, vector<128x128xbf16>, vector<64x128xf32> -> vector<64x128xf32>
    %c0_255 = arith.constant 0 : index
    %c0_256 = arith.constant 0 : index
    %212 = vector.load %arg17[%c0_255, %c0_256] : memref<256x128xf32, #tpu.memory_space<vmem>>, vector<64x128xf32>
    %213 = arith.addf %212, %211 : vector<64x128xf32>
    %c0_257 = arith.constant 0 : index
    %c0_258 = arith.constant 0 : index
    %214 = vector.load %arg17[%c0_257, %c0_258] : memref<256x128xf32, #tpu.memory_space<vmem>>, vector<64x128xf32>
    tpu.vector_store %arg17[%c0_257, %c0_258], %213 {strides = array<i32>} : memref<256x128xf32, #tpu.memory_space<vmem>>, vector<64x128xf32>,
    %c0_259 = arith.constant 0 : index
    %c2_260 = arith.constant 2 : index
    %c0_261 = arith.constant 0 : index
    %215 = vector.load %arg20[%c0_259, %c2_260, %c0_261] : memref<10x10x128xf32, #tpu.memory_space<vmem>>, vector<8x8x128xf32>
    %216 = vector.shape_cast %215 : vector<8x8x128xf32> to vector<64x128xf32>
    %217 = arith.truncf %216 : vector<64x128xf32> to vector<64x128xbf16>
    %c2_262 = arith.constant 2 : index
    %c0_263 = arith.constant 0 : index
    %c0_264 = arith.constant 0 : index
    %218 = vector.load %arg8[%c2_262, %c0_263, %c0_264] : memref<9x128x128xbf16, #tpu.memory_space<vmem>>, vector<1x128x128xbf16>
    %219 = vector.shape_cast %218 : vector<1x128x128xbf16> to vector<128x128xbf16>
    %cst_265 = arith.constant dense<0.000000e+00> : vector<64x128xf32>
    %220 = tpu.matmul %217, %219, %cst_265 {dimension_numbers = #tpu.dot_dimension_numbers<[1], [0], [0], [1], [0, 0, 1, 1], [], []>} : vector<64x128xbf16>, vector<128x128xbf16>, vector<64x128xf32> -> vector<64x128xf32>
    %c0_266 = arith.constant 0 : index
    %c0_267 = arith.constant 0 : index
    %221 = vector.load %arg17[%c0_266, %c0_267] : memref<256x128xf32, #tpu.memory_space<vmem>>, vector<64x128xf32>
    %222 = arith.addf %221, %220 : vector<64x128xf32>
    %c0_268 = arith.constant 0 : index
    %c0_269 = arith.constant 0 : index
    %223 = vector.load %arg17[%c0_268, %c0_269] : memref<256x128xf32, #tpu.memory_space<vmem>>, vector<64x128xf32>
    tpu.vector_store %arg17[%c0_268, %c0_269], %222 {strides = array<i32>} : memref<256x128xf32, #tpu.memory_space<vmem>>, vector<64x128xf32>,
    %c1_270 = arith.constant 1 : index
    %c0_271 = arith.constant 0 : index
    %c0_272 = arith.constant 0 : index
    %224 = vector.load %arg20[%c1_270, %c0_271, %c0_272] : memref<10x10x128xf32, #tpu.memory_space<vmem>>, vector<8x8x128xf32>
    %225 = vector.shape_cast %224 : vector<8x8x128xf32> to vector<64x128xf32>
    %226 = arith.truncf %225 : vector<64x128xf32> to vector<64x128xbf16>
    %c3_273 = arith.constant 3 : index
    %c0_274 = arith.constant 0 : index
    %c0_275 = arith.constant 0 : index
    %227 = vector.load %arg8[%c3_273, %c0_274, %c0_275] : memref<9x128x128xbf16, #tpu.memory_space<vmem>>, vector<1x128x128xbf16>
    %228 = vector.shape_cast %227 : vector<1x128x128xbf16> to vector<128x128xbf16>
    %cst_276 = arith.constant dense<0.000000e+00> : vector<64x128xf32>
    %229 = tpu.matmul %226, %228, %cst_276 {dimension_numbers = #tpu.dot_dimension_numbers<[1], [0], [0], [1], [0, 0, 1, 1], [], []>} : vector<64x128xbf16>, vector<128x128xbf16>, vector<64x128xf32> -> vector<64x128xf32>
    %c0_277 = arith.constant 0 : index
    %c0_278 = arith.constant 0 : index
    %230 = vector.load %arg17[%c0_277, %c0_278] : memref<256x128xf32, #tpu.memory_space<vmem>>, vector<64x128xf32>
    %231 = arith.addf %230, %229 : vector<64x128xf32>
    %c0_279 = arith.constant 0 : index
    %c0_280 = arith.constant 0 : index
    %232 = vector.load %arg17[%c0_279, %c0_280] : memref<256x128xf32, #tpu.memory_space<vmem>>, vector<64x128xf32>
    tpu.vector_store %arg17[%c0_279, %c0_280], %231 {strides = array<i32>} : memref<256x128xf32, #tpu.memory_space<vmem>>, vector<64x128xf32>,
    %c1_281 = arith.constant 1 : index
    %c1_282 = arith.constant 1 : index
    %c0_283 = arith.constant 0 : index
    %233 = vector.load %arg20[%c1_281, %c1_282, %c0_283] : memref<10x10x128xf32, #tpu.memory_space<vmem>>, vector<8x8x128xf32>
    %234 = vector.shape_cast %233 : vector<8x8x128xf32> to vector<64x128xf32>
    %235 = arith.truncf %234 : vector<64x128xf32> to vector<64x128xbf16>
    %c4_284 = arith.constant 4 : index
    %c0_285 = arith.constant 0 : index
    %c0_286 = arith.constant 0 : index
    %236 = vector.load %arg8[%c4_284, %c0_285, %c0_286] : memref<9x128x128xbf16, #tpu.memory_space<vmem>>, vector<1x128x128xbf16>
    %237 = vector.shape_cast %236 : vector<1x128x128xbf16> to vector<128x128xbf16>
    %cst_287 = arith.constant dense<0.000000e+00> : vector<64x128xf32>
    %238 = tpu.matmul %235, %237, %cst_287 {dimension_numbers = #tpu.dot_dimension_numbers<[1], [0], [0], [1], [0, 0, 1, 1], [], []>} : vector<64x128xbf16>, vector<128x128xbf16>, vector<64x128xf32> -> vector<64x128xf32>
    %c0_288 = arith.constant 0 : index
    %c0_289 = arith.constant 0 : index
    %239 = vector.load %arg17[%c0_288, %c0_289] : memref<256x128xf32, #tpu.memory_space<vmem>>, vector<64x128xf32>
    %240 = arith.addf %239, %238 : vector<64x128xf32>
    %c0_290 = arith.constant 0 : index
    %c0_291 = arith.constant 0 : index
    %241 = vector.load %arg17[%c0_290, %c0_291] : memref<256x128xf32, #tpu.memory_space<vmem>>, vector<64x128xf32>
    tpu.vector_store %arg17[%c0_290, %c0_291], %240 {strides = array<i32>} : memref<256x128xf32, #tpu.memory_space<vmem>>, vector<64x128xf32>,
    %c1_292 = arith.constant 1 : index
    %c2_293 = arith.constant 2 : index
    %c0_294 = arith.constant 0 : index
    %242 = vector.load %arg20[%c1_292, %c2_293, %c0_294] : memref<10x10x128xf32, #tpu.memory_space<vmem>>, vector<8x8x128xf32>
    %243 = vector.shape_cast %242 : vector<8x8x128xf32> to vector<64x128xf32>
    %244 = arith.truncf %243 : vector<64x128xf32> to vector<64x128xbf16>
    %c5_295 = arith.constant 5 : index
    %c0_296 = arith.constant 0 : index
    %c0_297 = arith.constant 0 : index
    %245 = vector.load %arg8[%c5_295, %c0_296, %c0_297] : memref<9x128x128xbf16, #tpu.memory_space<vmem>>, vector<1x128x128xbf16>
    %246 = vector.shape_cast %245 : vector<1x128x128xbf16> to vector<128x128xbf16>
    %cst_298 = arith.constant dense<0.000000e+00> : vector<64x128xf32>
    %247 = tpu.matmul %244, %246, %cst_298 {dimension_numbers = #tpu.dot_dimension_numbers<[1], [0], [0], [1], [0, 0, 1, 1], [], []>} : vector<64x128xbf16>, vector<128x128xbf16>, vector<64x128xf32> -> vector<64x128xf32>
    %c0_299 = arith.constant 0 : index
    %c0_300 = arith.constant 0 : index
    %248 = vector.load %arg17[%c0_299, %c0_300] : memref<256x128xf32, #tpu.memory_space<vmem>>, vector<64x128xf32>
    %249 = arith.addf %248, %247 : vector<64x128xf32>
    %c0_301 = arith.constant 0 : index
    %c0_302 = arith.constant 0 : index
    %250 = vector.load %arg17[%c0_301, %c0_302] : memref<256x128xf32, #tpu.memory_space<vmem>>, vector<64x128xf32>
    tpu.vector_store %arg17[%c0_301, %c0_302], %249 {strides = array<i32>} : memref<256x128xf32, #tpu.memory_space<vmem>>, vector<64x128xf32>,
    %c2_303 = arith.constant 2 : index
    %c0_304 = arith.constant 0 : index
    %c0_305 = arith.constant 0 : index
    %251 = vector.load %arg20[%c2_303, %c0_304, %c0_305] : memref<10x10x128xf32, #tpu.memory_space<vmem>>, vector<8x8x128xf32>
    %252 = vector.shape_cast %251 : vector<8x8x128xf32> to vector<64x128xf32>
    %253 = arith.truncf %252 : vector<64x128xf32> to vector<64x128xbf16>
    %c6_306 = arith.constant 6 : index
    %c0_307 = arith.constant 0 : index
    %c0_308 = arith.constant 0 : index
    %254 = vector.load %arg8[%c6_306, %c0_307, %c0_308] : memref<9x128x128xbf16, #tpu.memory_space<vmem>>, vector<1x128x128xbf16>
    %255 = vector.shape_cast %254 : vector<1x128x128xbf16> to vector<128x128xbf16>
    %cst_309 = arith.constant dense<0.000000e+00> : vector<64x128xf32>
    %256 = tpu.matmul %253, %255, %cst_309 {dimension_numbers = #tpu.dot_dimension_numbers<[1], [0], [0], [1], [0, 0, 1, 1], [], []>} : vector<64x128xbf16>, vector<128x128xbf16>, vector<64x128xf32> -> vector<64x128xf32>
    %c0_310 = arith.constant 0 : index
    %c0_311 = arith.constant 0 : index
    %257 = vector.load %arg17[%c0_310, %c0_311] : memref<256x128xf32, #tpu.memory_space<vmem>>, vector<64x128xf32>
    %258 = arith.addf %257, %256 : vector<64x128xf32>
    %c0_312 = arith.constant 0 : index
    %c0_313 = arith.constant 0 : index
    %259 = vector.load %arg17[%c0_312, %c0_313] : memref<256x128xf32, #tpu.memory_space<vmem>>, vector<64x128xf32>
    tpu.vector_store %arg17[%c0_312, %c0_313], %258 {strides = array<i32>} : memref<256x128xf32, #tpu.memory_space<vmem>>, vector<64x128xf32>,
    %c2_314 = arith.constant 2 : index
    %c1_315 = arith.constant 1 : index
    %c0_316 = arith.constant 0 : index
    %260 = vector.load %arg20[%c2_314, %c1_315, %c0_316] : memref<10x10x128xf32, #tpu.memory_space<vmem>>, vector<8x8x128xf32>
    %261 = vector.shape_cast %260 : vector<8x8x128xf32> to vector<64x128xf32>
    %262 = arith.truncf %261 : vector<64x128xf32> to vector<64x128xbf16>
    %c7_317 = arith.constant 7 : index
    %c0_318 = arith.constant 0 : index
    %c0_319 = arith.constant 0 : index
    %263 = vector.load %arg8[%c7_317, %c0_318, %c0_319] : memref<9x128x128xbf16, #tpu.memory_space<vmem>>, vector<1x128x128xbf16>
    %264 = vector.shape_cast %263 : vector<1x128x128xbf16> to vector<128x128xbf16>
    %cst_320 = arith.constant dense<0.000000e+00> : vector<64x128xf32>
    %265 = tpu.matmul %262, %264, %cst_320 {dimension_numbers = #tpu.dot_dimension_numbers<[1], [0], [0], [1], [0, 0, 1, 1], [], []>} : vector<64x128xbf16>, vector<128x128xbf16>, vector<64x128xf32> -> vector<64x128xf32>
    %c0_321 = arith.constant 0 : index
    %c0_322 = arith.constant 0 : index
    %266 = vector.load %arg17[%c0_321, %c0_322] : memref<256x128xf32, #tpu.memory_space<vmem>>, vector<64x128xf32>
    %267 = arith.addf %266, %265 : vector<64x128xf32>
    %c0_323 = arith.constant 0 : index
    %c0_324 = arith.constant 0 : index
    %268 = vector.load %arg17[%c0_323, %c0_324] : memref<256x128xf32, #tpu.memory_space<vmem>>, vector<64x128xf32>
    tpu.vector_store %arg17[%c0_323, %c0_324], %267 {strides = array<i32>} : memref<256x128xf32, #tpu.memory_space<vmem>>, vector<64x128xf32>,
    %c2_325 = arith.constant 2 : index
    %c2_326 = arith.constant 2 : index
    %c0_327 = arith.constant 0 : index
    %269 = vector.load %arg20[%c2_325, %c2_326, %c0_327] : memref<10x10x128xf32, #tpu.memory_space<vmem>>, vector<8x8x128xf32>
    %270 = vector.shape_cast %269 : vector<8x8x128xf32> to vector<64x128xf32>
    %271 = arith.truncf %270 : vector<64x128xf32> to vector<64x128xbf16>
    %c8_328 = arith.constant 8 : index
    %c0_329 = arith.constant 0 : index
    %c0_330 = arith.constant 0 : index
    %272 = vector.load %arg8[%c8_328, %c0_329, %c0_330] : memref<9x128x128xbf16, #tpu.memory_space<vmem>>, vector<1x128x128xbf16>
    %273 = vector.shape_cast %272 : vector<1x128x128xbf16> to vector<128x128xbf16>
    %cst_331 = arith.constant dense<0.000000e+00> : vector<64x128xf32>
    %274 = tpu.matmul %271, %273, %cst_331 {dimension_numbers = #tpu.dot_dimension_numbers<[1], [0], [0], [1], [0, 0, 1, 1], [], []>} : vector<64x128xbf16>, vector<128x128xbf16>, vector<64x128xf32> -> vector<64x128xf32>
    %c0_332 = arith.constant 0 : index
    %c0_333 = arith.constant 0 : index
    %275 = vector.load %arg17[%c0_332, %c0_333] : memref<256x128xf32, #tpu.memory_space<vmem>>, vector<64x128xf32>
    %276 = arith.addf %275, %274 : vector<64x128xf32>
    %c0_334 = arith.constant 0 : index
    %c0_335 = arith.constant 0 : index
    %277 = vector.load %arg17[%c0_334, %c0_335] : memref<256x128xf32, #tpu.memory_space<vmem>>, vector<64x128xf32>
    tpu.vector_store %arg17[%c0_334, %c0_335], %276 {strides = array<i32>} : memref<256x128xf32, #tpu.memory_space<vmem>>, vector<64x128xf32>,
    %c0_336 = arith.constant 0 : index
    %c0_337 = arith.constant 0 : index
    %278 = vector.load %arg17[%c0_336, %c0_337] : memref<256x128xf32, #tpu.memory_space<vmem>>, vector<64x128xf32>
    %c0_338 = arith.constant 0 : index
    %c0_339 = arith.constant 0 : index
    %279 = vector.load %arg9[%c0_338, %c0_339] : memref<1x128xf32, #tpu.memory_space<vmem>>, vector<1x128xf32>
    %280 = vector.broadcast %279 : vector<1x128xf32> to vector<64x128xf32>
    %281 = arith.addf %278, %280 : vector<64x128xf32>
    %cst_340 = arith.constant 0.000000e+00 : f32
    %282 = vector.broadcast %cst_340 : f32 to vector<64x128xf32>
    %283 = arith.maximumf %281, %282 : vector<64x128xf32>
    %284 = vector.shape_cast %283 : vector<64x128xf32> to vector<8x8x128xf32>
    %c0_341 = arith.constant 0 : index
    %c0_342 = arith.constant 0 : index
    %c0_343 = arith.constant 0 : index
    %285 = vector.load %arg22[%c0_341, %c0_342, %c0_343] : memref<8x8x128xf32, #tpu.memory_space<vmem>>, vector<8x8x128xf32>
    tpu.vector_store %arg22[%c0_341, %c0_342, %c0_343], %284 {strides = array<i32>} : memref<8x8x128xf32, #tpu.memory_space<vmem>>, vector<8x8x128xf32>,
    %c0_344 = arith.constant 0 : index
    %c0_345 = arith.constant 0 : index
    %c0_346 = arith.constant 0 : index
    %286 = tpu.strided_load %arg22[%c0_344, %c0_345, %c0_346] {strides = array<i32: 2, 2, 1>} : memref<8x8x128xf32, #tpu.memory_space<vmem>>, vector<4x4x128xf32>
    %c0_347 = arith.constant 0 : index
    %c1_348 = arith.constant 1 : index
    %c0_349 = arith.constant 0 : index
    %287 = tpu.strided_load %arg22[%c0_347, %c1_348, %c0_349] {strides = array<i32: 2, 2, 1>} : memref<8x8x128xf32, #tpu.memory_space<vmem>>, vector<4x4x128xf32>
    %c1_350 = arith.constant 1 : index
    %c0_351 = arith.constant 0 : index
    %c0_352 = arith.constant 0 : index
    %288 = tpu.strided_load %arg22[%c1_350, %c0_351, %c0_352] {strides = array<i32: 2, 2, 1>} : memref<8x8x128xf32, #tpu.memory_space<vmem>>, vector<4x4x128xf32>
    %c1_353 = arith.constant 1 : index
    %c1_354 = arith.constant 1 : index
    %c0_355 = arith.constant 0 : index
    %289 = tpu.strided_load %arg22[%c1_353, %c1_354, %c0_355] {strides = array<i32: 2, 2, 1>} : memref<8x8x128xf32, #tpu.memory_space<vmem>>, vector<4x4x128xf32>
    %290 = arith.maximumf %286, %287 : vector<4x4x128xf32>
    %291 = arith.maximumf %288, %289 : vector<4x4x128xf32>
    %292 = arith.maximumf %290, %291 : vector<4x4x128xf32>
    %c0_356 = arith.constant 0 : index
    %c0_357 = arith.constant 0 : index
    %293 = vector.load %arg11[%c0_356, %c0_357] : memref<1x256xf32, #tpu.memory_space<vmem>>, vector<1x256xf32>
    %294 = vector.extract_strided_slice %292 {offsets = [0, 0, 0], sizes = [1, 1, 128], strides = [1, 1, 1]} : vector<4x4x128xf32> to vector<1x1x128xf32>
    %295 = vector.shape_cast %294 : vector<1x1x128xf32> to vector<128xf32>
    %296 = vector.shape_cast %295 : vector<128xf32> to vector<1x128xf32>
    %297 = arith.truncf %296 : vector<1x128xf32> to vector<1x128xbf16>
    %c0_358 = arith.constant 0 : index
    %c0_359 = arith.constant 0 : index
    %c0_360 = arith.constant 0 : index
    %298 = vector.load %arg10[%c0_358, %c0_359, %c0_360] : memref<16x128x256xbf16, #tpu.memory_space<vmem>>, vector<1x128x256xbf16>
    %299 = vector.shape_cast %298 : vector<1x128x256xbf16> to vector<128x256xbf16>
    %cst_361 = arith.constant dense<0.000000e+00> : vector<1x256xf32>
    %300 = tpu.matmul %297, %299, %cst_361 {dimension_numbers = #tpu.dot_dimension_numbers<[1], [0], [0], [1], [0, 0, 1, 1], [], []>} : vector<1x128xbf16>, vector<128x256xbf16>, vector<1x256xf32> -> vector<1x256xf32>
    %301 = arith.addf %293, %300 : vector<1x256xf32>
    %302 = vector.extract_strided_slice %292 {offsets = [0, 1, 0], sizes = [1, 1, 128], strides = [1, 1, 1]} : vector<4x4x128xf32> to vector<1x1x128xf32>
    %303 = vector.shape_cast %302 : vector<1x1x128xf32> to vector<128xf32>
    %304 = vector.shape_cast %303 : vector<128xf32> to vector<1x128xf32>
    %305 = arith.truncf %304 : vector<1x128xf32> to vector<1x128xbf16>
    %c1_362 = arith.constant 1 : index
    %c0_363 = arith.constant 0 : index
    %c0_364 = arith.constant 0 : index
    %306 = vector.load %arg10[%c1_362, %c0_363, %c0_364] : memref<16x128x256xbf16, #tpu.memory_space<vmem>>, vector<1x128x256xbf16>
    %307 = vector.shape_cast %306 : vector<1x128x256xbf16> to vector<128x256xbf16>
    %cst_365 = arith.constant dense<0.000000e+00> : vector<1x256xf32>
    %308 = tpu.matmul %305, %307, %cst_365 {dimension_numbers = #tpu.dot_dimension_numbers<[1], [0], [0], [1], [0, 0, 1, 1], [], []>} : vector<1x128xbf16>, vector<128x256xbf16>, vector<1x256xf32> -> vector<1x256xf32>
    %309 = arith.addf %301, %308 : vector<1x256xf32>
    %310 = vector.extract_strided_slice %292 {offsets = [0, 2, 0], sizes = [1, 1, 128], strides = [1, 1, 1]} : vector<4x4x128xf32> to vector<1x1x128xf32>
    %311 = vector.shape_cast %310 : vector<1x1x128xf32> to vector<128xf32>
    %312 = vector.shape_cast %311 : vector<128xf32> to vector<1x128xf32>
    %313 = arith.truncf %312 : vector<1x128xf32> to vector<1x128xbf16>
    %c2_366 = arith.constant 2 : index
    %c0_367 = arith.constant 0 : index
    %c0_368 = arith.constant 0 : index
    %314 = vector.load %arg10[%c2_366, %c0_367, %c0_368] : memref<16x128x256xbf16, #tpu.memory_space<vmem>>, vector<1x128x256xbf16>
    %315 = vector.shape_cast %314 : vector<1x128x256xbf16> to vector<128x256xbf16>
    %cst_369 = arith.constant dense<0.000000e+00> : vector<1x256xf32>
    %316 = tpu.matmul %313, %315, %cst_369 {dimension_numbers = #tpu.dot_dimension_numbers<[1], [0], [0], [1], [0, 0, 1, 1], [], []>} : vector<1x128xbf16>, vector<128x256xbf16>, vector<1x256xf32> -> vector<1x256xf32>
    %317 = arith.addf %309, %316 : vector<1x256xf32>
    %318 = vector.extract_strided_slice %292 {offsets = [0, 3, 0], sizes = [1, 1, 128], strides = [1, 1, 1]} : vector<4x4x128xf32> to vector<1x1x128xf32>
    %319 = vector.shape_cast %318 : vector<1x1x128xf32> to vector<128xf32>
    %320 = vector.shape_cast %319 : vector<128xf32> to vector<1x128xf32>
    %321 = arith.truncf %320 : vector<1x128xf32> to vector<1x128xbf16>
    %c3_370 = arith.constant 3 : index
    %c0_371 = arith.constant 0 : index
    %c0_372 = arith.constant 0 : index
    %322 = vector.load %arg10[%c3_370, %c0_371, %c0_372] : memref<16x128x256xbf16, #tpu.memory_space<vmem>>, vector<1x128x256xbf16>
    %323 = vector.shape_cast %322 : vector<1x128x256xbf16> to vector<128x256xbf16>
    %cst_373 = arith.constant dense<0.000000e+00> : vector<1x256xf32>
    %324 = tpu.matmul %321, %323, %cst_373 {dimension_numbers = #tpu.dot_dimension_numbers<[1], [0], [0], [1], [0, 0, 1, 1], [], []>} : vector<1x128xbf16>, vector<128x256xbf16>, vector<1x256xf32> -> vector<1x256xf32>
    %325 = arith.addf %317, %324 : vector<1x256xf32>
    %326 = vector.extract_strided_slice %292 {offsets = [1, 0, 0], sizes = [1, 1, 128], strides = [1, 1, 1]} : vector<4x4x128xf32> to vector<1x1x128xf32>
    %327 = vector.shape_cast %326 : vector<1x1x128xf32> to vector<128xf32>
    %328 = vector.shape_cast %327 : vector<128xf32> to vector<1x128xf32>
    %329 = arith.truncf %328 : vector<1x128xf32> to vector<1x128xbf16>
    %c4_374 = arith.constant 4 : index
    %c0_375 = arith.constant 0 : index
    %c0_376 = arith.constant 0 : index
    %330 = vector.load %arg10[%c4_374, %c0_375, %c0_376] : memref<16x128x256xbf16, #tpu.memory_space<vmem>>, vector<1x128x256xbf16>
    %331 = vector.shape_cast %330 : vector<1x128x256xbf16> to vector<128x256xbf16>
    %cst_377 = arith.constant dense<0.000000e+00> : vector<1x256xf32>
    %332 = tpu.matmul %329, %331, %cst_377 {dimension_numbers = #tpu.dot_dimension_numbers<[1], [0], [0], [1], [0, 0, 1, 1], [], []>} : vector<1x128xbf16>, vector<128x256xbf16>, vector<1x256xf32> -> vector<1x256xf32>
    %333 = arith.addf %325, %332 : vector<1x256xf32>
    %334 = vector.extract_strided_slice %292 {offsets = [1, 1, 0], sizes = [1, 1, 128], strides = [1, 1, 1]} : vector<4x4x128xf32> to vector<1x1x128xf32>
    %335 = vector.shape_cast %334 : vector<1x1x128xf32> to vector<128xf32>
    %336 = vector.shape_cast %335 : vector<128xf32> to vector<1x128xf32>
    %337 = arith.truncf %336 : vector<1x128xf32> to vector<1x128xbf16>
    %c5_378 = arith.constant 5 : index
    %c0_379 = arith.constant 0 : index
    %c0_380 = arith.constant 0 : index
    %338 = vector.load %arg10[%c5_378, %c0_379, %c0_380] : memref<16x128x256xbf16, #tpu.memory_space<vmem>>, vector<1x128x256xbf16>
    %339 = vector.shape_cast %338 : vector<1x128x256xbf16> to vector<128x256xbf16>
    %cst_381 = arith.constant dense<0.000000e+00> : vector<1x256xf32>
    %340 = tpu.matmul %337, %339, %cst_381 {dimension_numbers = #tpu.dot_dimension_numbers<[1], [0], [0], [1], [0, 0, 1, 1], [], []>} : vector<1x128xbf16>, vector<128x256xbf16>, vector<1x256xf32> -> vector<1x256xf32>
    %341 = arith.addf %333, %340 : vector<1x256xf32>
    %342 = vector.extract_strided_slice %292 {offsets = [1, 2, 0], sizes = [1, 1, 128], strides = [1, 1, 1]} : vector<4x4x128xf32> to vector<1x1x128xf32>
    %343 = vector.shape_cast %342 : vector<1x1x128xf32> to vector<128xf32>
    %344 = vector.shape_cast %343 : vector<128xf32> to vector<1x128xf32>
    %345 = arith.truncf %344 : vector<1x128xf32> to vector<1x128xbf16>
    %c6_382 = arith.constant 6 : index
    %c0_383 = arith.constant 0 : index
    %c0_384 = arith.constant 0 : index
    %346 = vector.load %arg10[%c6_382, %c0_383, %c0_384] : memref<16x128x256xbf16, #tpu.memory_space<vmem>>, vector<1x128x256xbf16>
    %347 = vector.shape_cast %346 : vector<1x128x256xbf16> to vector<128x256xbf16>
    %cst_385 = arith.constant dense<0.000000e+00> : vector<1x256xf32>
    %348 = tpu.matmul %345, %347, %cst_385 {dimension_numbers = #tpu.dot_dimension_numbers<[1], [0], [0], [1], [0, 0, 1, 1], [], []>} : vector<1x128xbf16>, vector<128x256xbf16>, vector<1x256xf32> -> vector<1x256xf32>
    %349 = arith.addf %341, %348 : vector<1x256xf32>
    %350 = vector.extract_strided_slice %292 {offsets = [1, 3, 0], sizes = [1, 1, 128], strides = [1, 1, 1]} : vector<4x4x128xf32> to vector<1x1x128xf32>
    %351 = vector.shape_cast %350 : vector<1x1x128xf32> to vector<128xf32>
    %352 = vector.shape_cast %351 : vector<128xf32> to vector<1x128xf32>
    %353 = arith.truncf %352 : vector<1x128xf32> to vector<1x128xbf16>
    %c7_386 = arith.constant 7 : index
    %c0_387 = arith.constant 0 : index
    %c0_388 = arith.constant 0 : index
    %354 = vector.load %arg10[%c7_386, %c0_387, %c0_388] : memref<16x128x256xbf16, #tpu.memory_space<vmem>>, vector<1x128x256xbf16>
    %355 = vector.shape_cast %354 : vector<1x128x256xbf16> to vector<128x256xbf16>
    %cst_389 = arith.constant dense<0.000000e+00> : vector<1x256xf32>
    %356 = tpu.matmul %353, %355, %cst_389 {dimension_numbers = #tpu.dot_dimension_numbers<[1], [0], [0], [1], [0, 0, 1, 1], [], []>} : vector<1x128xbf16>, vector<128x256xbf16>, vector<1x256xf32> -> vector<1x256xf32>
    %357 = arith.addf %349, %356 : vector<1x256xf32>
    %358 = vector.extract_strided_slice %292 {offsets = [2, 0, 0], sizes = [1, 1, 128], strides = [1, 1, 1]} : vector<4x4x128xf32> to vector<1x1x128xf32>
    %359 = vector.shape_cast %358 : vector<1x1x128xf32> to vector<128xf32>
    %360 = vector.shape_cast %359 : vector<128xf32> to vector<1x128xf32>
    %361 = arith.truncf %360 : vector<1x128xf32> to vector<1x128xbf16>
    %c8_390 = arith.constant 8 : index
    %c0_391 = arith.constant 0 : index
    %c0_392 = arith.constant 0 : index
    %362 = vector.load %arg10[%c8_390, %c0_391, %c0_392] : memref<16x128x256xbf16, #tpu.memory_space<vmem>>, vector<1x128x256xbf16>
    %363 = vector.shape_cast %362 : vector<1x128x256xbf16> to vector<128x256xbf16>
    %cst_393 = arith.constant dense<0.000000e+00> : vector<1x256xf32>
    %364 = tpu.matmul %361, %363, %cst_393 {dimension_numbers = #tpu.dot_dimension_numbers<[1], [0], [0], [1], [0, 0, 1, 1], [], []>} : vector<1x128xbf16>, vector<128x256xbf16>, vector<1x256xf32> -> vector<1x256xf32>
    %365 = arith.addf %357, %364 : vector<1x256xf32>
    %366 = vector.extract_strided_slice %292 {offsets = [2, 1, 0], sizes = [1, 1, 128], strides = [1, 1, 1]} : vector<4x4x128xf32> to vector<1x1x128xf32>
    %367 = vector.shape_cast %366 : vector<1x1x128xf32> to vector<128xf32>
    %368 = vector.shape_cast %367 : vector<128xf32> to vector<1x128xf32>
    %369 = arith.truncf %368 : vector<1x128xf32> to vector<1x128xbf16>
    %c9 = arith.constant 9 : index
    %c0_394 = arith.constant 0 : index
    %c0_395 = arith.constant 0 : index
    %370 = vector.load %arg10[%c9, %c0_394, %c0_395] : memref<16x128x256xbf16, #tpu.memory_space<vmem>>, vector<1x128x256xbf16>
    %371 = vector.shape_cast %370 : vector<1x128x256xbf16> to vector<128x256xbf16>
    %cst_396 = arith.constant dense<0.000000e+00> : vector<1x256xf32>
    %372 = tpu.matmul %369, %371, %cst_396 {dimension_numbers = #tpu.dot_dimension_numbers<[1], [0], [0], [1], [0, 0, 1, 1], [], []>} : vector<1x128xbf16>, vector<128x256xbf16>, vector<1x256xf32> -> vector<1x256xf32>
    %373 = arith.addf %365, %372 : vector<1x256xf32>
    %374 = vector.extract_strided_slice %292 {offsets = [2, 2, 0], sizes = [1, 1, 128], strides = [1, 1, 1]} : vector<4x4x128xf32> to vector<1x1x128xf32>
    %375 = vector.shape_cast %374 : vector<1x1x128xf32> to vector<128xf32>
    %376 = vector.shape_cast %375 : vector<128xf32> to vector<1x128xf32>
    %377 = arith.truncf %376 : vector<1x128xf32> to vector<1x128xbf16>
    %c10 = arith.constant 10 : index
    %c0_397 = arith.constant 0 : index
    %c0_398 = arith.constant 0 : index
    %378 = vector.load %arg10[%c10, %c0_397, %c0_398] : memref<16x128x256xbf16, #tpu.memory_space<vmem>>, vector<1x128x256xbf16>
    %379 = vector.shape_cast %378 : vector<1x128x256xbf16> to vector<128x256xbf16>
    %cst_399 = arith.constant dense<0.000000e+00> : vector<1x256xf32>
    %380 = tpu.matmul %377, %379, %cst_399 {dimension_numbers = #tpu.dot_dimension_numbers<[1], [0], [0], [1], [0, 0, 1, 1], [], []>} : vector<1x128xbf16>, vector<128x256xbf16>, vector<1x256xf32> -> vector<1x256xf32>
    %381 = arith.addf %373, %380 : vector<1x256xf32>
    %382 = vector.extract_strided_slice %292 {offsets = [2, 3, 0], sizes = [1, 1, 128], strides = [1, 1, 1]} : vector<4x4x128xf32> to vector<1x1x128xf32>
    %383 = vector.shape_cast %382 : vector<1x1x128xf32> to vector<128xf32>
    %384 = vector.shape_cast %383 : vector<128xf32> to vector<1x128xf32>
    %385 = arith.truncf %384 : vector<1x128xf32> to vector<1x128xbf16>
    %c11 = arith.constant 11 : index
    %c0_400 = arith.constant 0 : index
    %c0_401 = arith.constant 0 : index
    %386 = vector.load %arg10[%c11, %c0_400, %c0_401] : memref<16x128x256xbf16, #tpu.memory_space<vmem>>, vector<1x128x256xbf16>
    %387 = vector.shape_cast %386 : vector<1x128x256xbf16> to vector<128x256xbf16>
    %cst_402 = arith.constant dense<0.000000e+00> : vector<1x256xf32>
    %388 = tpu.matmul %385, %387, %cst_402 {dimension_numbers = #tpu.dot_dimension_numbers<[1], [0], [0], [1], [0, 0, 1, 1], [], []>} : vector<1x128xbf16>, vector<128x256xbf16>, vector<1x256xf32> -> vector<1x256xf32>
    %389 = arith.addf %381, %388 : vector<1x256xf32>
    %390 = vector.extract_strided_slice %292 {offsets = [3, 0, 0], sizes = [1, 1, 128], strides = [1, 1, 1]} : vector<4x4x128xf32> to vector<1x1x128xf32>
    %391 = vector.shape_cast %390 : vector<1x1x128xf32> to vector<128xf32>
    %392 = vector.shape_cast %391 : vector<128xf32> to vector<1x128xf32>
    %393 = arith.truncf %392 : vector<1x128xf32> to vector<1x128xbf16>
    %c12 = arith.constant 12 : index
    %c0_403 = arith.constant 0 : index
    %c0_404 = arith.constant 0 : index
    %394 = vector.load %arg10[%c12, %c0_403, %c0_404] : memref<16x128x256xbf16, #tpu.memory_space<vmem>>, vector<1x128x256xbf16>
    %395 = vector.shape_cast %394 : vector<1x128x256xbf16> to vector<128x256xbf16>
    %cst_405 = arith.constant dense<0.000000e+00> : vector<1x256xf32>
    %396 = tpu.matmul %393, %395, %cst_405 {dimension_numbers = #tpu.dot_dimension_numbers<[1], [0], [0], [1], [0, 0, 1, 1], [], []>} : vector<1x128xbf16>, vector<128x256xbf16>, vector<1x256xf32> -> vector<1x256xf32>
    %397 = arith.addf %389, %396 : vector<1x256xf32>
    %398 = vector.extract_strided_slice %292 {offsets = [3, 1, 0], sizes = [1, 1, 128], strides = [1, 1, 1]} : vector<4x4x128xf32> to vector<1x1x128xf32>
    %399 = vector.shape_cast %398 : vector<1x1x128xf32> to vector<128xf32>
    %400 = vector.shape_cast %399 : vector<128xf32> to vector<1x128xf32>
    %401 = arith.truncf %400 : vector<1x128xf32> to vector<1x128xbf16>
    %c13 = arith.constant 13 : index
    %c0_406 = arith.constant 0 : index
    %c0_407 = arith.constant 0 : index
    %402 = vector.load %arg10[%c13, %c0_406, %c0_407] : memref<16x128x256xbf16, #tpu.memory_space<vmem>>, vector<1x128x256xbf16>
    %403 = vector.shape_cast %402 : vector<1x128x256xbf16> to vector<128x256xbf16>
    %cst_408 = arith.constant dense<0.000000e+00> : vector<1x256xf32>
    %404 = tpu.matmul %401, %403, %cst_408 {dimension_numbers = #tpu.dot_dimension_numbers<[1], [0], [0], [1], [0, 0, 1, 1], [], []>} : vector<1x128xbf16>, vector<128x256xbf16>, vector<1x256xf32> -> vector<1x256xf32>
    %405 = arith.addf %397, %404 : vector<1x256xf32>
    %406 = vector.extract_strided_slice %292 {offsets = [3, 2, 0], sizes = [1, 1, 128], strides = [1, 1, 1]} : vector<4x4x128xf32> to vector<1x1x128xf32>
    %407 = vector.shape_cast %406 : vector<1x1x128xf32> to vector<128xf32>
    %408 = vector.shape_cast %407 : vector<128xf32> to vector<1x128xf32>
    %409 = arith.truncf %408 : vector<1x128xf32> to vector<1x128xbf16>
    %c14 = arith.constant 14 : index
    %c0_409 = arith.constant 0 : index
    %c0_410 = arith.constant 0 : index
    %410 = vector.load %arg10[%c14, %c0_409, %c0_410] : memref<16x128x256xbf16, #tpu.memory_space<vmem>>, vector<1x128x256xbf16>
    %411 = vector.shape_cast %410 : vector<1x128x256xbf16> to vector<128x256xbf16>
    %cst_411 = arith.constant dense<0.000000e+00> : vector<1x256xf32>
    %412 = tpu.matmul %409, %411, %cst_411 {dimension_numbers = #tpu.dot_dimension_numbers<[1], [0], [0], [1], [0, 0, 1, 1], [], []>} : vector<1x128xbf16>, vector<128x256xbf16>, vector<1x256xf32> -> vector<1x256xf32>
    %413 = arith.addf %405, %412 : vector<1x256xf32>
    %414 = vector.extract_strided_slice %292 {offsets = [3, 3, 0], sizes = [1, 1, 128], strides = [1, 1, 1]} : vector<4x4x128xf32> to vector<1x1x128xf32>
    %415 = vector.shape_cast %414 : vector<1x1x128xf32> to vector<128xf32>
    %416 = vector.shape_cast %415 : vector<128xf32> to vector<1x128xf32>
    %417 = arith.truncf %416 : vector<1x128xf32> to vector<1x128xbf16>
    %c15 = arith.constant 15 : index
    %c0_412 = arith.constant 0 : index
    %c0_413 = arith.constant 0 : index
    %418 = vector.load %arg10[%c15, %c0_412, %c0_413] : memref<16x128x256xbf16, #tpu.memory_space<vmem>>, vector<1x128x256xbf16>
    %419 = vector.shape_cast %418 : vector<1x128x256xbf16> to vector<128x256xbf16>
    %cst_414 = arith.constant dense<0.000000e+00> : vector<1x256xf32>
    %420 = tpu.matmul %417, %419, %cst_414 {dimension_numbers = #tpu.dot_dimension_numbers<[1], [0], [0], [1], [0, 0, 1, 1], [], []>} : vector<1x128xbf16>, vector<128x256xbf16>, vector<1x256xf32> -> vector<1x256xf32>
    %421 = arith.addf %413, %420 : vector<1x256xf32>
    %cst_415 = arith.constant 0.000000e+00 : f32
    %422 = vector.broadcast %cst_415 : f32 to vector<1x256xf32>
    %423 = arith.maximumf %421, %422 : vector<1x256xf32>
    %424 = arith.truncf %423 : vector<1x256xf32> to vector<1x256xbf16>
    %c0_416 = arith.constant 0 : index
    %c0_417 = arith.constant 0 : index
    %425 = vector.load %arg12[%c0_416, %c0_417] : memref<256x256xbf16, #tpu.memory_space<vmem>>, vector<256x256xbf16>
    %cst_418 = arith.constant dense<0.000000e+00> : vector<1x256xf32>
    %426 = tpu.matmul %424, %425, %cst_418 {dimension_numbers = #tpu.dot_dimension_numbers<[1], [0], [0], [1], [0, 0, 1, 1], [], []>} : vector<1x256xbf16>, vector<256x256xbf16>, vector<1x256xf32> -> vector<1x256xf32>
    %c0_419 = arith.constant 0 : index
    %c0_420 = arith.constant 0 : index
    %427 = vector.load %arg13[%c0_419, %c0_420] : memref<1x256xf32, #tpu.memory_space<vmem>>, vector<1x256xf32>
    %428 = arith.addf %426, %427 : vector<1x256xf32>
    %cst_421 = arith.constant 0.000000e+00 : f32
    %429 = vector.broadcast %cst_421 : f32 to vector<1x256xf32>
    %430 = arith.maximumf %428, %429 : vector<1x256xf32>
    %431 = arith.truncf %430 : vector<1x256xf32> to vector<1x256xbf16>
    %c0_422 = arith.constant 0 : index
    %c0_423 = arith.constant 0 : index
    %432 = vector.load %arg14[%c0_422, %c0_423] : memref<256x128xbf16, #tpu.memory_space<vmem>>, vector<256x128xbf16>
    %cst_424 = arith.constant dense<0.000000e+00> : vector<1x128xf32>
    %433 = tpu.matmul %431, %432, %cst_424 {dimension_numbers = #tpu.dot_dimension_numbers<[1], [0], [0], [1], [0, 0, 1, 1], [], []>} : vector<1x256xbf16>, vector<256x128xbf16>, vector<1x128xf32> -> vector<1x128xf32>
    %c0_425 = arith.constant 0 : index
    %c0_426 = arith.constant 0 : index
    %434 = vector.load %arg15[%c0_425, %c0_426] : memref<1x128xf32, #tpu.memory_space<vmem>>, vector<1x128xf32>
    %435 = arith.addf %433, %434 : vector<1x128xf32>
    %436 = vector.shape_cast %435 : vector<1x128xf32> to vector<1x128xf32>
    %437 = vector.broadcast %436 : vector<1x128xf32> to vector<8x128xf32>
    %c0_427 = arith.constant 0 : index
    %c0_428 = arith.constant 0 : index
    %c0_429 = arith.constant 0 : index
    %438 = vector.load %arg16[%c0_427, %c0_428, %c0_429] : memref<1x8x128xf32, #tpu.memory_space<vmem>>, vector<1x8x128xf32>
    %439 = vector.shape_cast %438 : vector<1x8x128xf32> to vector<8x128xf32>
    %440 = vector.shape_cast %437 : vector<8x128xf32> to vector<1x8x128xf32>
    tpu.vector_store %arg16[%c0_427, %c0_428, %c0_429], %440 {strides = array<i32>} : memref<1x8x128xf32, #tpu.memory_space<vmem>>, vector<1x8x128xf32>,
    return
  }
  func.func @transform_0(%arg0: i32) -> (i32, i32, i32) {
    %c0_i32 = arith.constant 0 : i32
    %c0_i32_0 = arith.constant 0 : i32
    %c0_i32_1 = arith.constant 0 : i32
    return %arg0, %c0_i32, %c0_i32_0 : i32, i32, i32
  }
  func.func @transform_1(%arg0: i32) -> (i32, i32) {
    %c0_i32 = arith.constant 0 : i32
    %c0_i32_0 = arith.constant 0 : i32
    %c0_i32_1 = arith.constant 0 : i32
    return %c0_i32, %c0_i32_0 : i32, i32
  }
  func.func @transform_2(%arg0: i32) -> (i32, i32) {
    %c0_i32 = arith.constant 0 : i32
    %c0_i32_0 = arith.constant 0 : i32
    %c0_i32_1 = arith.constant 0 : i32
    return %c0_i32, %c0_i32_0 : i32, i32
  }
  func.func @transform_3(%arg0: i32) -> (i32, i32, i32) {
    %c0_i32 = arith.constant 0 : i32
    %c0_i32_0 = arith.constant 0 : i32
    %c0_i32_1 = arith.constant 0 : i32
    %c0_i32_2 = arith.constant 0 : i32
    return %c0_i32, %c0_i32_0, %c0_i32_1 : i32, i32, i32
  }
  func.func @transform_4(%arg0: i32) -> (i32, i32) {
    %c0_i32 = arith.constant 0 : i32
    %c0_i32_0 = arith.constant 0 : i32
    %c0_i32_1 = arith.constant 0 : i32
    return %c0_i32, %c0_i32_0 : i32, i32
  }
  func.func @transform_5(%arg0: i32) -> (i32, i32, i32) {
    %c0_i32 = arith.constant 0 : i32
    %c0_i32_0 = arith.constant 0 : i32
    %c0_i32_1 = arith.constant 0 : i32
    %c0_i32_2 = arith.constant 0 : i32
    return %c0_i32, %c0_i32_0, %c0_i32_1 : i32, i32, i32
  }
  func.func @transform_6(%arg0: i32) -> (i32, i32) {
    %c0_i32 = arith.constant 0 : i32
    %c0_i32_0 = arith.constant 0 : i32
    %c0_i32_1 = arith.constant 0 : i32
    return %c0_i32, %c0_i32_0 : i32, i32
  }
  func.func @transform_7(%arg0: i32) -> (i32, i32, i32) {
    %c0_i32 = arith.constant 0 : i32
    %c0_i32_0 = arith.constant 0 : i32
    %c0_i32_1 = arith.constant 0 : i32
    %c0_i32_2 = arith.constant 0 : i32
    return %c0_i32, %c0_i32_0, %c0_i32_1 : i32, i32, i32
  }
  func.func @transform_8(%arg0: i32) -> (i32, i32) {
    %c0_i32 = arith.constant 0 : i32
    %c0_i32_0 = arith.constant 0 : i32
    %c0_i32_1 = arith.constant 0 : i32
    return %c0_i32, %c0_i32_0 : i32, i32
  }
  func.func @transform_9(%arg0: i32) -> (i32, i32, i32) {
    %c0_i32 = arith.constant 0 : i32
    %c0_i32_0 = arith.constant 0 : i32
    %c0_i32_1 = arith.constant 0 : i32
    %c0_i32_2 = arith.constant 0 : i32
    return %c0_i32, %c0_i32_0, %c0_i32_1 : i32, i32, i32
  }
  func.func @transform_10(%arg0: i32) -> (i32, i32) {
    %c0_i32 = arith.constant 0 : i32
    %c0_i32_0 = arith.constant 0 : i32
    %c0_i32_1 = arith.constant 0 : i32
    return %c0_i32, %c0_i32_0 : i32, i32
  }
  func.func @transform_11(%arg0: i32) -> (i32, i32) {
    %c0_i32 = arith.constant 0 : i32
    %c0_i32_0 = arith.constant 0 : i32
    %c0_i32_1 = arith.constant 0 : i32
    return %c0_i32, %c0_i32_0 : i32, i32
  }
  func.func @transform_12(%arg0: i32) -> (i32, i32) {
    %c0_i32 = arith.constant 0 : i32
    %c0_i32_0 = arith.constant 0 : i32
    %c0_i32_1 = arith.constant 0 : i32
    return %c0_i32, %c0_i32_0 : i32, i32
  }
  func.func @transform_13(%arg0: i32) -> (i32, i32) {
    %c0_i32 = arith.constant 0 : i32
    %c0_i32_0 = arith.constant 0 : i32
    %c0_i32_1 = arith.constant 0 : i32
    return %c0_i32, %c0_i32_0 : i32, i32
  }
  func.func @transform_14(%arg0: i32) -> (i32, i32) {
    %c0_i32 = arith.constant 0 : i32
    %c0_i32_0 = arith.constant 0 : i32
    %c0_i32_1 = arith.constant 0 : i32
    return %c0_i32, %c0_i32_0 : i32, i32
  }
  func.func @transform_15(%arg0: i32) -> (i32, i32, i32) {
    %c0_i32 = arith.constant 0 : i32
    %c0_i32_0 = arith.constant 0 : i32
    %c0_i32_1 = arith.constant 0 : i32
    return %arg0, %c0_i32, %c0_i32_0 : i32, i32, i32
  }
}

</mosaic_0001>

<bundles_post_ra>
// kernel: custom_neural_network_forward.1
= control target key start
LH: loop header
LB: loop body
LE: loop exit
PB: predicated region body
PF: predicated region fallthrough
CT: control target
= control target key end

     0   :  { %s15510_s0 = inlined_call_operand.vmem [shape: bf16[2,256,9], index: 0, kind: input, shape index: {}]   ;;  %s15511_s1 = inlined_call_operand.vmem [shape: bf16[9,128], index: 1, kind: input, shape index: {}]   ;;  %s15512_s2 = inlined_call_operand.vmem [shape: f32[1,128], index: 2, kind: input, shape index: {}]   ;;  %s15513_s3 = inlined_call_operand.vmem [shape: bf16[9,128,128], index: 3, kind: input, shape index: {}]   ;;  %s15514_s4 = inlined_call_operand.vmem [shape: f32[1,128], index: 4, kind: input, shape index: {}]   ;;  %s15515_s5 = inlined_call_operand.hbm [shape: bf16[9,128,128], index: 5, kind: input, shape index: {}]   ;;  %s15516_s6 = inlined_call_operand.vmem [shape: f32[1,128], index: 6, kind: input, shape index: {}]   ;;  %s15517_s7 = inlined_call_operand.hbm [shape: bf16[9,128,128], index: 7, kind: input, shape index: {}]   ;;  %s15518_s8 = inlined_call_operand.vmem [shape: f32[1,128], index: 8, kind: input, shape index: {}]   ;;  %s15519_s9 = inlined_call_operand.hbm [shape: bf16[16,128,256], index: 9, kind: input, shape index: {}]   ;;  %s15520_s10 = inlined_call_operand.vmem [shape: f32[1,256], index: 10, kind: input, shape index: {}]   ;;  %s15521_s11 = inlined_call_operand.vmem [shape: bf16[256,256], index: 11, kind: input, shape index: {}]   ;;  %s15522_s12 = inlined_call_operand.vmem [shape: f32[1,256], index: 12, kind: input, shape index: {}]   ;;  %s15523_s13 = inlined_call_operand.hbm [shape: bf16[256,128], index: 13, kind: input, shape index: {}]   ;;  %s15524_s14 = inlined_call_operand.vmem [shape: f32[1,128], index: 14, kind: input, shape index: {}]   ;;  %s15525_s15 = inlined_call_operand.vmem [shape: f32[2,8,128], index: 15, kind: output, shape index: {}]  }
   0x1   :  { %15531 = sst [smem:[#allocation19_spill]] %s15522_s12 }
   0x2   :  { %15532 = sst [smem:[#allocation20_spill]] %s15524_s14 }
   0x3   :  { %15533 = sst [smem:[#allocation21_spill]] %s15525_s15 }
   0x4   :  { %20 = vsyncpa [#allocation9], 0 }
   0x5   :  { %21 = vsyncpa [#allocation11], 0 }
   0x6   :  { %22 = vsyncpa [#allocation14], 0  ;;  %s14157_s18 = smov 0  }
   0x7 LB: > { %15534 = sst [smem:[#allocation18_spill]] %s14062_s18  ;;  %s14163_s19 = sadd.s32 4294967295, %s14062_s18   ;;  %s14062_s18 = sphi %s14157_s18, %s28_s18  }
   0x8   : > { %p10737_p0 = scmp.ge.s32.totalorder %s14062_s18, 1  ;;  %p379_p1 = scmp.lt.s32.totalorder %s14062_s18, 3 }
   0x9   : > { %p15529_p2 = scmp.eq.s32.totalorder %s14163_s19, 0  ;;  %s14064_s21 = smov [#allocation10]  }
   0xa   : > { %p14168_p3 = pnand %p10737_p0, %p379_p1  ;;  %s419_s22 = sshll.u32 %s14064_s21, 4  ;;  %s14172_s22 = int_to_ptr.vmem [resolvable:$true] %s419_s22 }
   0xb   : > { %s14065_s23 = smov [#allocation8]   ;;  %s14066_s26 = smov [#allocation12]  }
   0xc   : > { %s15535_s20 = scalar_select %p14168_p3, 1, 0 }
   0xd   : > { %p13208_p4 = pneg %p14168_p3  ;;  %s403_s24 = sshll.u32 %s14065_s23, 4  ;;  %s14176_s24 = int_to_ptr.vmem [resolvable:$true] %s403_s24 }
   0xe   : > { %s435_s27 = sshll.u32 %s14066_s26, 4  ;;  %s13932_s30 = scalar_lea.hbm %s15517_s7, 9216  ;;  %s14184_s27 = int_to_ptr.vmem [resolvable:$true] %s435_s27 }
   0xf   : > { %p14180_p5 = pnand %p15529_p2, %p13208_p4  ;;  %p13933_p6 = scmp.ne.s32.totalorder %s15517_s7, %s13932_s30 }
  0x10   : > { %p13939_p10 = scmp.lt.u32.totalorder %s13932_s30, %s15517_s7 }
  0x11   : > { %p14194_p7 = pneg %p14180_p5 }
  0x13   : > { %p13935_p8 = pnand %p14194_p7, %p13933_p6 }
  0x15   : > { %p13936_p9 = pneg %p13935_p8 }
  0x17   : > { %p13941_p11 = pnand %p13939_p10, %p13936_p9 }
  0x19   : > { %13944 = shalt.err (!%p13941_p11)
}
  0x1a   : > { %s13945_s28 = scalar_lea.vmem %s14172_s22, 9216  ;;  %p13953_p1 = scmp.lt.s32.totalorder %s14172_s22, %s14172_s22 }
  0x1b   : > { %p13946_p12 = scmp.ne.s32.totalorder %s14172_s22, %s13945_s28  ;;  %p13954_p4 = scmp.lt.s32.totalorder %s13945_s28, %s13945_s28 }
  0x1d   : > { %p13948_p13 = pnand %p13946_p12, %p14194_p7  ;;  %p13955_p6 = por %p13954_p4, %p13953_p1 }
  0x1f   : > { %p13949_p0 = pneg %p13948_p13 }
  0x21   : > { %p13956_p8 = pnand %p13955_p6, %p13949_p0 }
  0x23   : > { %13959 = shalt.err (!%p13956_p8)
}
  0x24   : > { %s15527_s29 = smov 64   ;;  %s15528_s30 = smov 4  }
  0x25   : > { %13214 = dma.hbm_to_vmem [thread:$0]  (!%p14180_p5), %s15517_s7, 9216, %s14172_s22, [#allocation11], %s15527_s29, %s15527_s29, %s15528_s30  }
  0x26   : > { %s13960_s28 = scalar_lea.hbm %s15515_s5, 9216 }
  0x27   : > { %p13961_p9 = scmp.ne.s32.totalorder %s15515_s5, %s13960_s28  ;;  %p13967_p12 = scmp.lt.u32.totalorder %s13960_s28, %s15515_s5 }
  0x29   : > { %p13963_p10 = pnand %p13961_p9, %p14194_p7 }
  0x2b   : > { %p13964_p11 = pneg %p13963_p10 }
  0x2d   : > { %p13969_p13 = pnand %p13967_p12, %p13964_p11 }
  0x2f   : > { %13972 = shalt.err (!%p13969_p13)
}
  0x30   : > { %s13973_s22 = scalar_lea.vmem %s14176_s24, 9216  ;;  %p13981_p6 = scmp.lt.s32.totalorder %s14176_s24, %s14176_s24 }
  0x31   : > { %p13974_p0 = scmp.ne.s32.totalorder %s14176_s24, %s13973_s22  ;;  %p13982_p8 = scmp.lt.s32.totalorder %s13973_s22, %s13973_s22 }
  0x33   : > { %p13976_p1 = pnand %p13974_p0, %p14194_p7  ;;  %p13983_p9 = por %p13982_p8, %p13981_p6 }
  0x35   : > { %p13977_p4 = pneg %p13976_p1 }
  0x37   : > { %p13984_p10 = pnand %p13983_p9, %p13977_p4 }
  0x39   : > { %13987 = shalt.err (!%p13984_p10)
}
  0x3a   : > { %13211 = dma.hbm_to_vmem [thread:$0]  (!%p14180_p5), %s15515_s5, 9216, %s14176_s24, [#allocation9], %s15527_s29, %s15527_s29, %s15528_s30  }
  0x3b   : > { %s13988_s16 = scalar_lea.hbm %s15519_s9, 32768 }
  0x3c   : > { %p13989_p11 = scmp.ne.s32.totalorder %s15519_s9, %s13988_s16  ;;  %p13995_p0 = scmp.lt.u32.totalorder %s13988_s16, %s15519_s9 }
  0x3e   : > { %p13991_p12 = pnand %p13989_p11, %p14194_p7 }
  0x40   : > { %p13992_p13 = pneg %p13991_p12 }
  0x42   : > { %p13997_p1 = pnand %p13995_p0, %p13992_p13 }
  0x44   : > { %14000 = shalt.err (!%p13997_p1)
}
  0x45   : > { %s14001_s24 = scalar_lea.vmem %s14184_s27, 32768  ;;  %p14009_p9 = scmp.lt.s32.totalorder %s14184_s27, %s14184_s27 }
  0x46   : > { %p14002_p4 = scmp.ne.s32.totalorder %s14184_s27, %s14001_s24  ;;  %p14010_p10 = scmp.lt.s32.totalorder %s14001_s24, %s14001_s24 }
  0x48   : > { %p14004_p6 = pnand %p14002_p4, %p14194_p7  ;;  %p14011_p11 = por %p14010_p10, %p14009_p9 }
  0x4a   : > { %p14005_p8 = pneg %p14004_p6 }
  0x4c   : > { %p14012_p12 = pnand %p14011_p11, %p14005_p8 }
  0x4e   : > { %14015 = shalt.err (!%p14012_p12)
}
  0x4f   : > { %s14069_s22 = smov 128   ;;  %s14070_s12 = smov 8  }
  0x50   : > { %13217 = dma.hbm_to_vmem [thread:$0]  (!%p14180_p5), %s15519_s9, 32768, %s14184_s27, [#allocation11], %s14069_s22, %s14069_s22, %s14070_s12  }
  0x51   : > { %s14071_s18 = smov [#allocation13]   ;;  %s14016_s26 = scalar_lea.hbm %s15523_s13, 2048 }
  0x52   : > { %s457_s16 = sshll.u32 %s14071_s18, 4  ;;  %p14017_p13 = scmp.ne.s32.totalorder %s15523_s13, %s14016_s26  ;;  %s458_s16 = int_to_ptr.vmem [resolvable:$true] %s457_s16 }
  0x53   : > { %p14023_p4 = scmp.lt.u32.totalorder %s14016_s26, %s15523_s13 }
  0x54   : > { %p14019_p0 = pnand %p14017_p13, %p14194_p7 }
  0x56   : > { %p14020_p1 = pneg %p14019_p0 }
  0x58   : > { %p14025_p6 = pnand %p14023_p4, %p14020_p1 }
  0x5a   : > { %14028 = shalt.err (!%p14025_p6)
}
  0x5b   : > { %s14029_s27 = scalar_lea.vmem %s458_s16, 2048  ;;  %p14037_p11 = scmp.lt.s32.totalorder %s458_s16, %s458_s16 }
  0x5c   : > { %p14030_p8 = scmp.ne.s32.totalorder %s458_s16, %s14029_s27  ;;  %p14038_p12 = scmp.lt.s32.totalorder %s14029_s27, %s14029_s27 }
  0x5e   : > { %p14032_p9 = pnand %p14030_p8, %p14194_p7  ;;  %p14039_p2 = por %p14038_p12, %p14037_p11 }
  0x60   : > { %p14033_p10 = pneg %p14032_p9 }
  0x62   : > { %p14040_p3 = pnand %p14039_p2, %p14033_p10 }
  0x64   : > { %14043 = shalt.err (!%p14040_p3)
}
  0x65   : > { %s15538_s22 = smov 4   ;;  %s15539_s12 = smov 64  }
  0x66   : > { %13220 = dma.hbm_to_vmem [thread:$0]  (!%p14180_p5), %s15523_s13, 2048, %s458_s16, [#allocation14], %s15539_s12, %s15539_s12, %s15538_s22  }
  0x67   : > { %p15540_p13 = scmp.ne.s32.totalorder %s15535_s20, 0 }
  0x68   : > { %p15541_p7 = scmp.eq.s32.totalorder (!%p15540_p13), %s14163_s19, 0 }
  0x69   : > { %484 = sbr.rel (%p15540_p13) target bundleno = 3036 (0xbdc), region = 80 }
  0x70   : > { %14049 = dma.done.wait (%p15541_p7), [#allocation9], 9216   ;;  %p15542_p0 = pmov %p15541_p7 }
  0x72   : > { %14051 = vsyncadd (%p15542_p0), [#allocation9], 4294958080  ;;  %p15543_p2 = pmov %p15542_p0 }
  0x73   : > { %p15544_p3 = pmov %p15542_p0 }
  0x74   : > { %14053 = dma.done.wait (%p15543_p2), [#allocation11], 41984  }
  0x75   : > { %14055 = vsyncadd (%p15544_p3), [#allocation11], 4294925312  ;;  %p15545_p1 = pmov %p15542_p0 }
  0x76   : > { %p15546_p5 = pmov %p15542_p0 }
  0x77   : > { %14057 = dma.done.wait (%p15545_p1), [#allocation14], 2048  }
  0x78   : > { %14059 = vsyncadd (%p15546_p5), [#allocation14], 4294965248  ;;  %vm822_vm0 = vcmask 1043456   ;;  %p543_p4 = scmp.lt.s32.totalorder %s14163_s19, 1  ;;  %v14072_v0 = vmov 0.0   ;;  %vm823_vm1 = vcmask 1044480  }
  0x79   : > { %559 = vst [vmem:[#allocation3 + $0x30] sm:$0xff] %v14072_v0  ;;  %560 = vst [vmem:[#allocation3 + $0x38] sm:$0xff] %v14072_v0  ;;  %v14073_v1 = vmov 65535   ;;  %vm773_vm2 = vcmask 72704   ;;  %v13249_v4 = vld [vmem:[%s15511_s1] sm:$0x1f]  }
  0x7a   : > { %s15552_s19 = smov (!%p543_p4, %s14163_s19), 1  ;;  %553 = vst [vmem:[#allocation3] sm:$0xff] %v14072_v0  ;;  %554 = vst [vmem:[#allocation3 + $0x8] sm:$0xff] %v14072_v0  ;;  %v824_v2 = vsel %vm822_vm0, 4294967295, %v14073_v1  ;;  %v13266_v11 = vld [vmem:[%s15513_s3] sm:$0xff]   ;;  %v13267_v13 = vld [vmem:[%s15513_s3 + $0x8] sm:$0xff]  }
  0x7b   : > { %555 = vst [vmem:[#allocation3 + $0x10] sm:$0x3] %v14072_v0  ;;  %556 = vst [vmem:[#allocation3 + $0x18] sm:$0xff] %v14072_v0  ;;  %s11438_s20 = sshll.u32 %s15552_s19, 7  ;;  %v825_v3 = vsel %vm823_vm1, %v824_v2, 0  ;;  %11944 = vmatprep.subr.bf16.mxu1 %v13266_v11  ;;  %v13268_v15 = vld [vmem:[%s15513_s3 + $0x10] sm:$0xff]  }
  0x7c   : > { %557 = vst [vmem:[#allocation3 + $0x20] sm:$0xff] %v14072_v0  ;;  %558 = vst [vmem:[#allocation3 + $0x28] sm:$0x3] %v14072_v0  ;;  %s14405_s14 = scalar_lea.vmem %s15510_s0, %s11438_s20  ;;  %v827_v6 = vand.u32 %v13249_v4, %v825_v3  ;;  %11945 = vmatpush3.bf16.msra.mxu1 %v13266_v11  ;;  %v13269_v16 = vld [vmem:[%s15513_s3 + $0x18] sm:$0xff]   ;;  %v13270_v26 = vld [vmem:[%s15513_s3 + $0x20] sm:$0xff]   ;;  %v14074_v30 = vmov 0.0|0.0  }
  0x7d   : > { %561 = vst [vmem:[#allocation3 + $0x40] sm:$0x3] %v14072_v0  ;;  %562 = vst [vmem:[#allocation3 + $0x48] sm:$0xff] %v14072_v0  ;;  %v13250_v5 = vld [vmem:[%s14405_s14] sm:$0xff]   ;;  %v13251_v7 = vld [vmem:[%s14405_s14 + $0x8] sm:$0xff]   ;;  %11946 = vmatprep.subr.bf16.mxu1 %v13267_v13  ;;  %11960 = vmatprep.mubr.bf16.mxu1 %v14074_v30  ;;  %s15547_s18 = sld [smem:[#allocation19_spill]] }
  0x7e   : > { %563 = vst [vmem:[#allocation3 + $0x50] sm:$0xff] %v14072_v0  ;;  %564 = vst [vmem:[#allocation3 + $0x58] sm:$0x3] %v14072_v0  ;;  %11912 = vmatprep.mubr.msk.bf16.mxu0 %vm773_vm2, %v13250_v5  ;;  %11910 = vmatprep.subr.bf16.mxu0 %v827_v6  ;;  %v13252_v8 = vld [vmem:[%s14405_s14 + $0x10] sm:$0xff]   ;;  %v13253_v9 = vld [vmem:[%s14405_s14 + $0x18] sm:$0xff]   ;;  %s15548_s23 = sld [smem:[#allocation20_spill]] }
  0x7f   : > { %565 = vst [vmem:[#allocation3 + $0x60] sm:$0xff] %v14072_v0  ;;  %566 = vst [vmem:[#allocation3 + $0x68] sm:$0xff] %v14072_v0  ;;  %11911 = vmatpush3.bf16.msra.mxu0 %v827_v6  ;;  %v13254_v10 = vld [vmem:[%s14405_s14 + $0x20] sm:$0xff]   ;;  %v13255_v12 = vld [vmem:[%s14405_s14 + $0x28] sm:$0xff]   ;;  %s10750_s26 = sshll.u32 %s15552_s19, 3  ;;  %s15549_s27 = sld [smem:[#allocation21_spill]] }
  0x80   : > { %567 = vst [vmem:[#allocation3 + $0x70] sm:$0x3] %v14072_v0  ;;  %568 = vst [vmem:[#allocation3 + $0x78] sm:$0xff] %v14072_v0  ;;  %v13256_v14 = vld [vmem:[%s14405_s14 + $0x30] sm:$0xff]   ;;  %11947 = vmatpush3.bf16.msra.mxu1 %v13267_v13  ;;  %v13257_v17 = vld [vmem:[%s14405_s14 + $0x38] sm:$0xff]  }
  0x81   : > { %569 = vst [vmem:[#allocation3 + $0x80] sm:$0xff] %v14072_v0  ;;  %570 = vst [vmem:[#allocation3 + $0x88] sm:$0x3] %v14072_v0  ;;  %11948 = vmatprep.subr.bf16.mxu1 %v13268_v15  ;;  %v13258_v18 = vld [vmem:[%s14405_s14 + $0x40] sm:$0xff]   ;;  %v13259_v19 = vld [vmem:[%s14405_s14 + $0x48] sm:$0xff]  }
  0x82   : > { %571 = vst [vmem:[#allocation3 + $0x90] sm:$0xff] %v14072_v0  ;;  %572 = vst [vmem:[#allocation3 + $0x98] sm:$0xff] %v14072_v0  ;;  %11913 = vmatmul.mubr.msk.bf16.vlgmr.msra.gmra.mrb[0].mxu0 %vm773_vm2, %v13251_v7  ;;  %v13260_v20 = vld [vmem:[%s14405_s14 + $0x50] sm:$0xff]   ;;  %v13261_v21 = vld [vmem:[%s14405_s14 + $0x58] sm:$0xff]  }
  0x83   : > { %573 = vst [vmem:[#allocation3 + $0xa0] sm:$0x3] %v14072_v0  ;;  %574 = vst [vmem:[#allocation3 + $0xa8] sm:$0xff] %v14072_v0  ;;  %11916 = vmatprep.mubr.msk.bf16.mxu0 %vm773_vm2, %v13252_v8  ;;  %v13262_v22 = vld [vmem:[%s14405_s14 + $0x60] sm:$0xff]   ;;  %v13263_v23 = vld [vmem:[%s14405_s14 + $0x68] sm:$0xff]  }
  0x84   : > { %575 = vst [vmem:[#allocation3 + $0xb0] sm:$0xff] %v14072_v0  ;;  %576 = vst [vmem:[#allocation3 + $0xb8] sm:$0x3] %v14072_v0  ;;  %11949 = vmatpush3.bf16.msra.mxu1 %v13268_v15  ;;  %v13264_v24 = vld [vmem:[%s14405_s14 + $0x70] sm:$0xff]   ;;  %v13265_v25 = vld [vmem:[%s14405_s14 + $0x78] sm:$0xff]  }
  0x85   : > { %577 = vst [vmem:[#allocation3 + $0xc0] sm:$0xff] %v14072_v0  ;;  %578 = vst [vmem:[#allocation3 + $0xc8] sm:$0xff] %v14072_v0  ;;  %11950 = vmatprep.subr.bf16.mxu1 %v13269_v16  ;;  %v13271_v27 = vld [vmem:[%s15513_s3 + $0x28] sm:$0xff]   ;;  %v13272_v28 = vld [vmem:[%s15513_s3 + $0x30] sm:$0xff]   ;;  %s551_s22 = scalar_lea.vmem %s15549_s27, %s10750_s26 }
  0x86   : > { %579 = vst [vmem:[#allocation3 + $0xd0] sm:$0x3] %v14072_v0  ;;  %580 = vst [vmem:[#allocation3 + $0xd8] sm:$0xff] %v14072_v0  ;;  %v13273_v29 = vld [vmem:[%s15513_s3 + $0x38] sm:$0xff]   ;;  %v13274_v31 = vld [vmem:[%s15513_s3 + $0x40] sm:$0xff]  }
  0x87   : > { %581 = vst [vmem:[#allocation3 + $0xe0] sm:$0xff] %v14072_v0  ;;  %582 = vst [vmem:[#allocation3 + $0xe8] sm:$0x3] %v14072_v0  ;;  %v14472_v32 = vld [vmem:[%s15512_s2] ss:$0 sm:$0xff]  ;;  %v13275_v2 = vld [vmem:[%s15513_s3 + $0x48] sm:$0xff]  }
  0x88   : > { %583 = vst [vmem:[#allocation3 + $0xf0] sm:$0xff] %v14072_v0  ;;  %584 = vst [vmem:[#allocation3 + $0xf8] sm:$0xff] %v14072_v0  ;;  %11951 = vmatpush3.bf16.msra.mxu1 %v13269_v16 }
  0x89   : > { %585 = vst [vmem:[#allocation3 + $0x100] sm:$0x3] %v14072_v0  ;;  %586 = vst [vmem:[#allocation3 + $0x108] sm:$0xff] %v14072_v0  ;;  %11952 = vmatprep.subr.bf16.mxu1 %v13270_v26 }
  0x8a   : > { %587 = vst [vmem:[#allocation3 + $0x110] sm:$0xff] %v14072_v0  ;;  %588 = vst [vmem:[#allocation3 + $0x118] sm:$0x3] %v14072_v0  ;;  %11917 = vmatmul.mubr.msk.bf16.gmra.mrb[4].mxu0 %vm773_vm2, %v13253_v9 }
  0x8b   : > { %589 = vst [vmem:[#allocation3 + $0x120] sm:$0xff] %v14072_v0  ;;  %590 = vst [vmem:[#allocation3 + $0x128] sm:$0xff] %v14072_v0  ;;  %11920 = vmatprep.mubr.msk.bf16.mxu0 %vm773_vm2, %v13254_v10 }
  0x8c   : > { %591 = vst [vmem:[#allocation3 + $0x130] sm:$0x3] %v14072_v0  ;;  %592 = vst [vmem:[#allocation3 + $0x138] sm:$0xff] %v14072_v0  ;;  %11953 = vmatpush3.bf16.msra.mxu1 %v13270_v26 }
  0x8d   : > { %593 = vst [vmem:[#allocation3 + $0x140] sm:$0xff] %v14072_v0  ;;  %594 = vst [vmem:[#allocation3 + $0x148] sm:$0x3] %v14072_v0  ;;  %11954 = vmatprep.subr.bf16.mxu1 %v13271_v27 }
  0x8e   : > { %595 = vst [vmem:[#allocation3 + $0x150] sm:$0xff] %v14072_v0  ;;  %596 = vst [vmem:[#allocation3 + $0x158] sm:$0xff] %v14072_v0 }
  0x8f   : > { %597 = vst [vmem:[#allocation3 + $0x160] sm:$0x3] %v14072_v0  ;;  %598 = vst [vmem:[#allocation3 + $0x168] sm:$0xff] %v14072_v0 }
  0x90   : > { %599 = vst [vmem:[#allocation3 + $0x170] sm:$0xff] %v14072_v0  ;;  %600 = vst [vmem:[#allocation3 + $0x178] sm:$0x3] %v14072_v0  ;;  %11955 = vmatpush3.bf16.msra.mxu1 %v13271_v27 }
  0x91   : > { %601 = vst [vmem:[#allocation3 + $0x180] sm:$0xff] %v14072_v0  ;;  %602 = vst [vmem:[#allocation3 + $0x188] sm:$0xff] %v14072_v0  ;;  %11956 = vmatprep.subr.bf16.mxu1 %v13272_v28 }
  0x92   : > { %603 = vst [vmem:[#allocation3 + $0x190] sm:$0x3] %v14072_v0  ;;  %604 = vst [vmem:[#allocation3 + $0x198] sm:$0xff] %v14072_v0  ;;  %11921 = vmatmul.mubr.msk.bf16.gmra.mrb[8].mxu0 %vm773_vm2, %v13255_v12 }
  0x93   : > { %605 = vst [vmem:[#allocation3 + $0x1a0] sm:$0xff] %v14072_v0  ;;  %606 = vst [vmem:[#allocation3 + $0x1a8] sm:$0x3] %v14072_v0  ;;  %11924 = vmatprep.mubr.msk.bf16.mxu0 %vm773_vm2, %v13256_v14  ;;  %v13276_v14 = vld [vmem:[%s15513_s3 + $0x50] sm:$0xff]  }
  0x94   : > { %607 = vst [vmem:[#allocation4] sm:$0xff] %v14072_v0  ;;  %608 = vst [vmem:[#allocation4 + $0x8] sm:$0x3] %v14072_v0  ;;  %11957 = vmatpush3.bf16.msra.mxu1 %v13272_v28 }
  0x95   : > { %609 = vst [vmem:[#allocation4 + $0x10] sm:$0xff] %v14072_v0  ;;  %610 = vst [vmem:[#allocation4 + $0x18] sm:$0x3] %v14072_v0  ;;  %11958 = vmatprep.subr.bf16.mxu1 %v13273_v29 }
  0x96   : > { %611 = vst [vmem:[#allocation4 + $0x20] sm:$0xff] %v14072_v0  ;;  %612 = vst [vmem:[#allocation4 + $0x28] sm:$0x3] %v14072_v0 }
  0x97   : > { %613 = vst [vmem:[#allocation4 + $0x30] sm:$0xff] %v14072_v0  ;;  %614 = vst [vmem:[#allocation4 + $0x38] sm:$0x3] %v14072_v0 }
  0x98   : > { %615 = vst [vmem:[#allocation4 + $0x40] sm:$0xff] %v14072_v0  ;;  %616 = vst [vmem:[#allocation4 + $0x48] sm:$0x3] %v14072_v0  ;;  %11959 = vmatpush3.bf16.msra.mxu1 %v13273_v29 }
  0x99   : > { %617 = vst [vmem:[#allocation4 + $0x50] sm:$0xff] %v14072_v0  ;;  %618 = vst [vmem:[#allocation4 + $0x58] sm:$0x3] %v14072_v0  ;;  %11992 = vmatprep.subr.bf16.mxu1 %v13274_v31 }
  0x9a   : > { %619 = vst [vmem:[#allocation4 + $0x60] sm:$0xff] %v14072_v0  ;;  %620 = vst [vmem:[#allocation4 + $0x68] sm:$0x3] %v14072_v0  ;;  %11925 = vmatmul.mubr.msk.bf16.gmra.mrb[12].mxu0 %vm773_vm2, %v13257_v17 }
  0x9b   : > { %621 = vst [vmem:[#allocation4 + $0x70] sm:$0xff] %v14072_v0  ;;  %622 = vst [vmem:[#allocation4 + $0x78] sm:$0x3] %v14072_v0  ;;  %11928 = vmatprep.mubr.msk.bf16.mxu0 %vm773_vm2, %v13258_v18 }
  0x9c   : > { %623 = vst [vmem:[#allocation4 + $0x80] sm:$0xff] %v14072_v0  ;;  %624 = vst [vmem:[#allocation4 + $0x88] sm:$0x3] %v14072_v0 }
  0x9d   : > { %625 = vst [vmem:[#allocation4 + $0x90] sm:$0xff] %v14072_v0  ;;  %626 = vst [vmem:[#allocation4 + $0x98] sm:$0x3] %v14072_v0 }
  0x9e   : > { %627 = vst [vmem:[#allocation5] sm:$0xff] %v14072_v0  ;;  %628 = vst [vmem:[#allocation5 + $0x8] sm:$0x3] %v14072_v0 }
  0x9f   : > { %629 = vst [vmem:[#allocation5 + $0x10] sm:$0xff] %v14072_v0  ;;  %630 = vst [vmem:[#allocation5 + $0x18] sm:$0x3] %v14072_v0 }
  0xa0   : > { %631 = vst [vmem:[#allocation5 + $0x20] sm:$0xff] %v14072_v0  ;;  %632 = vst [vmem:[#allocation5 + $0x28] sm:$0x3] %v14072_v0 }
  0xa1   : > { %633 = vst [vmem:[#allocation5 + $0x30] sm:$0xff] %v14072_v0  ;;  %634 = vst [vmem:[#allocation5 + $0x38] sm:$0x3] %v14072_v0 }
  0xa2   : > { %635 = vst [vmem:[#allocation5 + $0x40] sm:$0xff] %v14072_v0  ;;  %636 = vst [vmem:[#allocation5 + $0x48] sm:$0x3] %v14072_v0  ;;  %11929 = vmatmul.mubr.msk.bf16.gmra.mrb[16].mxu0 %vm773_vm2, %v13259_v19 }
  0xa3   : > { %637 = vst [vmem:[#allocation5 + $0x50] sm:$0xff] %v14072_v0  ;;  %638 = vst [vmem:[#allocation5 + $0x58] sm:$0x3] %v14072_v0  ;;  %11932 = vmatprep.mubr.msk.bf16.mxu0 %vm773_vm2, %v13260_v20 }
  0xa4   : > { %639 = vst [vmem:[#allocation5 + $0x60] sm:$0xff] %v14072_v0  ;;  %640 = vst [vmem:[#allocation5 + $0x68] sm:$0x3] %v14072_v0 }
  0xa5   : > { %641 = vst [vmem:[#allocation5 + $0x70] sm:$0xff] %v14072_v0  ;;  %642 = vst [vmem:[#allocation5 + $0x78] sm:$0x3] %v14072_v0 }
  0xa6   : > { %643 = vst [vmem:[#allocation5 + $0x80] sm:$0xff] %v14072_v0  ;;  %644 = vst [vmem:[#allocation5 + $0x88] sm:$0x3] %v14072_v0 }
  0xa7   : > { %645 = vst [vmem:[#allocation5 + $0x90] sm:$0xff] %v14072_v0  ;;  %646 = vst [vmem:[#allocation5 + $0x98] sm:$0x3] %v14072_v0 }
  0xaa   : > { %11933 = vmatmul.mubr.msk.bf16.gmra.mrb[20].mxu0 %vm773_vm2, %v13261_v21 }
  0xab   : > { %11936 = vmatprep.mubr.msk.bf16.mxu0 %vm773_vm2, %v13262_v22 }
  0xb2   : > { %11937 = vmatmul.mubr.msk.bf16.gmra.mrb[24].mxu0 %vm773_vm2, %v13263_v23 }
  0xb3   : > { %11940 = vmatprep.mubr.msk.bf16.mxu0 %vm773_vm2, %v13264_v24  ;;  %v13277_v24 = vld [vmem:[%s15513_s3 + $0x58] sm:$0xff]  }
  0xba   : > { %11941 = vmatmul.mubr.msk.bf16.gmra.mrb[28].mxu0 %vm773_vm2, %v13265_v25 }
 0x155   : > { %v11914_v33 = vpop.f32.mrb[0].mxu0 }
 0x156   : > { %v872_v34 = vadd.f32 %v11914_v33, %v14472_v32  ;;  %v863_v35 = vpop.f32.mrb[1].mxu0 }
 0x157   : > { %v864_v36 = vadd.f32 %v14472_v32, %v863_v35  ;;  %v11915_v37 = vpop.f32.mrb[2].mxu0 }
 0x158   : > { %v992_v38 = vmax.f32 %v872_v34, 0.0  ;;  %v875_v39 = vadd.f32 %v11915_v37, %v14472_v32  ;;  %v866_v40 = vpop.f32.mrb[3].mxu0  ;;  %v13278_v37 = vld [vmem:[%s15513_s3 + $0x60] sm:$0xff]  }
 0x159   : > { %v990_v41 = vmax.f32 %v864_v36, 0.0  ;;  %v867_v42 = vadd.f32 %v14472_v32, %v866_v40 }
 0x15a   : > { %1025 = vst [vmem:[#allocation3 + $0x31] sm:$0xff] %v992_v38  ;;  %v993_v43 = vmax.f32 %v875_v39, 0.0 }
 0x15b   : > { %1023 = vst [vmem:[#allocation3 + $0x19] sm:$0xff] %v990_v41  ;;  %v991_v44 = vmax.f32 %v867_v42, 0.0 }
 0x15c   : > { %1026 = vst [vmem:[#allocation3 + $0x39] sm:$0xff] %v993_v43  ;;  %v14478_v45 = vpack.c.bf16 %v993_v43, %v992_v38 }
 0x15d   : > { %1024 = vst [vmem:[#allocation3 + $0x21] sm:$0xff] %v991_v44  ;;  %v11918_v46 = vpop.f32.mrb[4].mxu0  ;;  %v14480_v47 = vpack.c.bf16 %v991_v44, %v990_v41 }
 0x15e   : > { %v888_v48 = vadd.f32 %v11918_v46, %v14472_v32  ;;  %v879_v49 = vpop.f32.mrb[5].mxu0 }
 0x15f   : > { %v880_v50 = vadd.f32 %v14472_v32, %v879_v49  ;;  %v11919_v51 = vpop.f32.mrb[6].mxu0  ;;  %v13279_v49 = vld [vmem:[%s15513_s3 + $0x68] sm:$0xff]  }
 0x160   : > { %v996_v52 = vmax.f32 %v888_v48, 0.0  ;;  %v891_v53 = vadd.f32 %v11919_v51, %v14472_v32  ;;  %v882_v54 = vpop.f32.mrb[7].mxu0 }
 0x161   : > { %v994_v55 = vmax.f32 %v880_v50, 0.0  ;;  %v883_v56 = vadd.f32 %v14472_v32, %v882_v54  ;;  %v1059_v1 = vld [vmem:[#allocation3 + $0x30] sm:$0xff] }
 0x162   : > { %1029 = vst [vmem:[#allocation3 + $0x61] sm:$0xff] %v996_v52  ;;  %v997_v57 = vmax.f32 %v891_v53, 0.0  ;;  %v1057_v60 = vld [vmem:[#allocation3 + $0x18] sm:$0xff] }
 0x163   : > { %1027 = vst [vmem:[#allocation3 + $0x49] sm:$0xff] %v994_v55  ;;  %v995_v58 = vmax.f32 %v883_v56, 0.0  ;;  %v1060_v59 = vld [vmem:[#allocation3 + $0x38] sm:$0xff] }
 0x164   : > { %1030 = vst [vmem:[#allocation3 + $0x69] sm:$0xff] %v997_v57  ;;  %v1058_v61 = vld [vmem:[#allocation3 + $0x20] sm:$0xff]  ;;  %v14486_v62 = vpack.c.bf16 %v997_v57, %v996_v52  ;;  %v14496_v6 = vpack.c.bf16 %v1060_v59, %v1059_v1 }
 0x165   : > { %1028 = vst [vmem:[#allocation3 + $0x51] sm:$0xff] %v995_v58  ;;  %v11922_v63 = vpop.f32.mrb[8].mxu0  ;;  %v14488_v0 = vpack.c.bf16 %v1058_v61, %v1057_v60  ;;  %v14493_v3 = vpack.c.bf16 %v995_v58, %v994_v55  ;;  %v13280_v61 = vld [vmem:[%s15513_s3 + $0x70] sm:$0xff]  }
 0x166   : > { %v904_v4 = vadd.f32 %v11922_v63, %v14472_v32  ;;  %v895_v5 = vpop.f32.mrb[9].mxu0 }
 0x167   : > { %v896_v7 = vadd.f32 %v14472_v32, %v895_v5  ;;  %v11923_v8 = vpop.f32.mrb[10].mxu0  ;;  %11961 = vmatmul.mubr.bf16.vlgmr.msra.gmra.mrb[0].mxu1 %v14488_v0 }
 0x168   : > { %v1000_v9 = vmax.f32 %v904_v4, 0.0  ;;  %v907_v10 = vadd.f32 %v11923_v8, %v14472_v32  ;;  %11993 = vmatpush3.bf16.msra.mxu1 %v13274_v31  ;;  %v898_v11 = vpop.f32.mrb[11].mxu0  ;;  %11964 = vmatprep.mubr.bf16.mxu1 %v14496_v6 }
 0x169   : > { %v998_v12 = vmax.f32 %v896_v7, 0.0  ;;  %v899_v13 = vadd.f32 %v14472_v32, %v898_v11  ;;  %11994 = vmatprep.subr.bf16.mxu1 %v13275_v2  ;;  %v1063_v23 = vld [vmem:[#allocation3 + $0x60] sm:$0xff]  ;;  %v13281_v11 = vld [vmem:[%s15513_s3 + $0x78] sm:$0xff]  }
 0x16a   : > { %1033 = vst [vmem:[#allocation3 + $0x91] sm:$0xff] %v1000_v9  ;;  %v1001_v15 = vmax.f32 %v907_v10, 0.0  ;;  %v1061_v18 = vld [vmem:[#allocation3 + $0x48] sm:$0xff] }
 0x16b   : > { %1031 = vst [vmem:[#allocation3 + $0x79] sm:$0xff] %v998_v12  ;;  %v14506_v16 = vmax.f32 %v899_v13, 0.0  ;;  %v1064_v17 = vld [vmem:[#allocation3 + $0x68] sm:$0xff] }
 0x16c   : > { %1034 = vst [vmem:[#allocation3 + $0x99] sm:$0xff] %v1001_v15  ;;  %v1062_v19 = vld [vmem:[#allocation3 + $0x50] sm:$0xff]  ;;  %11995 = vmatpush3.bf16.msra.mxu1 %v13275_v2  ;;  %v14508_v20 = vpack.c.bf16 %v1001_v15, %v1000_v9  ;;  %v14520_v28 = vpack.c.bf16 %v1064_v17, %v1063_v23 }
 0x16d   : > { %1032 = vst [vmem:[#allocation3 + $0x81] sm:$0xff] %v14506_v16  ;;  %v11926_v21 = vpop.f32.mrb[12].mxu0  ;;  %v14511_v22 = vpack.c.bf16 %v1062_v19, %v1061_v18  ;;  %11996 = vmatprep.subr.bf16.mxu1 %v13276_v14  ;;  %v14517_v25 = vpack.c.bf16 %v14506_v16, %v998_v12 }
 0x16e   : > { %v920_v26 = vadd.f32 %v11926_v21, %v14472_v32  ;;  %v911_v27 = vpop.f32.mrb[13].mxu0 }
 0x16f   : > { %v912_v29 = vadd.f32 %v14472_v32, %v911_v27  ;;  %v11927_v30 = vpop.f32.mrb[14].mxu0  ;;  %11965 = vmatmul.mubr.bf16.gmra.mrb[4].mxu1 %v14511_v22  ;;  %v14574_v27 = vld [vmem:[%s15513_s3 + $0x80] sm:$0xff]  }
 0x170   : > { %v1004_v31 = vmax.f32 %v920_v26, 0.0  ;;  %v923_v33 = vadd.f32 %v11927_v30, %v14472_v32  ;;  %v914_v34 = vpop.f32.mrb[15].mxu0  ;;  %11968 = vmatprep.mubr.bf16.mxu1 %v14520_v28  ;;  %11997 = vmatpush3.bf16.msra.mxu1 %v13276_v14 }
 0x171   : > { %v1002_v35 = vmax.f32 %v912_v29, 0.0  ;;  %v915_v36 = vadd.f32 %v14472_v32, %v914_v34  ;;  %11998 = vmatprep.subr.bf16.mxu1 %v13277_v24  ;;  %v1067_v48 = vld [vmem:[#allocation3 + $0x90] sm:$0xff] }
 0x172   : > { %1037 = vst [vmem:[#allocation3 + $0xc1] sm:$0xff] %v1004_v31  ;;  %v14530_v38 = vmax.f32 %v923_v33, 0.0  ;;  %v1065_v41 = vld [vmem:[#allocation3 + $0x78] sm:$0xff] }
 0x173   : > { %1035 = vst [vmem:[#allocation3 + $0xa9] sm:$0xff] %v1002_v35  ;;  %v1003_v39 = vmax.f32 %v915_v36, 0.0  ;;  %v1068_v40 = vld [vmem:[#allocation3 + $0x98] sm:$0xff] }
 0x174   : > { %1038 = vst [vmem:[#allocation3 + $0xc9] sm:$0xff] %v14530_v38  ;;  %v1066_v42 = vld [vmem:[#allocation3 + $0x80] sm:$0xff]  ;;  %11999 = vmatpush3.bf16.msra.mxu1 %v13277_v24  ;;  %v14534_v43 = vpack.c.bf16 %v14530_v38, %v1004_v31  ;;  %v14544_v53 = vpack.c.bf16 %v1068_v40, %v1067_v48 }
 0x175   : > { %1036 = vst [vmem:[#allocation3 + $0xb1] sm:$0xff] %v1003_v39  ;;  %v11930_v44 = vpop.f32.mrb[16].mxu0  ;;  %v14536_v46 = vpack.c.bf16 %v1066_v42, %v1065_v41  ;;  %12000 = vmatprep.subr.bf16.mxu1 %v13278_v37  ;;  %v14541_v50 = vpack.c.bf16 %v1003_v39, %v1002_v35 }
 0x176   : > { %v936_v51 = vadd.f32 %v11930_v44, %v14472_v32  ;;  %v927_v52 = vpop.f32.mrb[17].mxu0 }
 0x177   : > { %v928_v54 = vadd.f32 %v14472_v32, %v927_v52  ;;  %v11931_v55 = vpop.f32.mrb[18].mxu0  ;;  %11969 = vmatmul.mubr.bf16.gmra.mrb[8].mxu1 %v14536_v46 }
 0x178   : > { %v1008_v56 = vmax.f32 %v936_v51, 0.0  ;;  %v939_v57 = vadd.f32 %v11931_v55, %v14472_v32  ;;  %v930_v58 = vpop.f32.mrb[19].mxu0  ;;  %11972 = vmatprep.mubr.bf16.mxu1 %v14544_v53  ;;  %12001 = vmatpush3.bf16.msra.mxu1 %v13278_v37 }
 0x179   : > { %v1006_v59 = vmax.f32 %v928_v54, 0.0  ;;  %v931_v60 = vadd.f32 %v14472_v32, %v930_v58  ;;  %12002 = vmatprep.subr.bf16.mxu1 %v13279_v49  ;;  %v1071_v10 = vld [vmem:[#allocation3 + $0xc0] sm:$0xff] }
 0x17a   : > { %1041 = vst [vmem:[#allocation3 + $0xf1] sm:$0xff] %v1008_v56  ;;  %v1009_v63 = vmax.f32 %v939_v57, 0.0  ;;  %v1069_v4 = vld [vmem:[#allocation3 + $0xa8] sm:$0xff] }
 0x17b   : > { %1039 = vst [vmem:[#allocation3 + $0xd9] sm:$0xff] %v1006_v59  ;;  %v1007_v1 = vmax.f32 %v931_v60, 0.0  ;;  %v1072_v2 = vld [vmem:[#allocation3 + $0xc8] sm:$0xff] }
 0x17c   : > { %1042 = vst [vmem:[#allocation3 + $0xf9] sm:$0xff] %v1009_v63  ;;  %v1070_v5 = vld [vmem:[#allocation3 + $0xb0] sm:$0xff]  ;;  %12003 = vmatpush3.bf16.msra.mxu1 %v13279_v49  ;;  %v14554_v7 = vpack.c.bf16 %v1009_v63, %v1008_v56  ;;  %v14564_v15 = vpack.c.bf16 %v1072_v2, %v1071_v10 }
 0x17d   : > { %1040 = vst [vmem:[#allocation3 + $0xe1] sm:$0xff] %v1007_v1  ;;  %v11934_v8 = vpop.f32.mrb[20].mxu0  ;;  %v14556_v9 = vpack.c.bf16 %v1070_v5, %v1069_v4  ;;  %12004 = vmatprep.subr.bf16.mxu1 %v13280_v61  ;;  %v14561_v12 = vpack.c.bf16 %v1007_v1, %v1006_v59 }
 0x17e   : > { %v952_v13 = vadd.f32 %v11934_v8, %v14472_v32  ;;  %v943_v14 = vpop.f32.mrb[21].mxu0 }
 0x17f   : > { %v944_v17 = vadd.f32 %v14472_v32, %v943_v14  ;;  %v11935_v18 = vpop.f32.mrb[22].mxu0  ;;  %11973 = vmatmul.mubr.bf16.gmra.mrb[12].mxu1 %v14556_v9 }
 0x180   : > { %v1012_v19 = vmax.f32 %v952_v13, 0.0  ;;  %v955_v21 = vadd.f32 %v11935_v18, %v14472_v32  ;;  %v946_v23 = vpop.f32.mrb[23].mxu0  ;;  %11976 = vmatprep.mubr.bf16.mxu1 %v14564_v15  ;;  %12005 = vmatpush3.bf16.msra.mxu1 %v13280_v61 }
 0x181   : > { %v1010_v24 = vmax.f32 %v944_v17, 0.0  ;;  %v947_v26 = vadd.f32 %v14472_v32, %v946_v23  ;;  %12006 = vmatprep.subr.bf16.mxu1 %v13281_v11  ;;  %v1075_v39 = vld [vmem:[#allocation3 + $0xf0] sm:$0xff] }
 0x182   : > { %1045 = vst [vmem:[#allocation3 + $0x121] sm:$0xff] %v1012_v19  ;;  %v1013_v29 = vmax.f32 %v955_v21, 0.0  ;;  %v1073_v33 = vld [vmem:[#allocation3 + $0xd8] sm:$0xff] }
 0x183   : > { %1043 = vst [vmem:[#allocation3 + $0x109] sm:$0xff] %v1010_v24  ;;  %v1011_v30 = vmax.f32 %v947_v26, 0.0  ;;  %v1076_v31 = vld [vmem:[#allocation3 + $0xf8] sm:$0xff] }
 0x184   : > { %1046 = vst [vmem:[#allocation3 + $0x129] sm:$0xff] %v1013_v29  ;;  %v1074_v34 = vld [vmem:[#allocation3 + $0xe0] sm:$0xff]  ;;  %12007 = vmatpush3.bf16.msra.mxu1 %v13281_v11  ;;  %v14576_v35 = vpack.c.bf16 %v1013_v29, %v1012_v19  ;;  %v14584_v44 = vpack.c.bf16 %v1076_v31, %v1075_v39 }
 0x185   : > { %1044 = vst [vmem:[#allocation3 + $0x111] sm:$0xff] %v1011_v30  ;;  %v11938_v36 = vpop.f32.mrb[24].mxu0  ;;  %v14578_v37 = vpack.c.bf16 %v1074_v34, %v1073_v33  ;;  %12040 = vmatprep.subr.bf16.mxu1 %v14574_v27  ;;  %v14581_v40 = vpack.c.bf16 %v1011_v30, %v1010_v24 }
 0x186   : > { %v968_v41 = vadd.f32 %v11938_v36, %v14472_v32  ;;  %v959_v42 = vpop.f32.mrb[25].mxu0 }
 0x187   : > { %v960_v48 = vadd.f32 %v14472_v32, %v959_v42  ;;  %v11939_v49 = vpop.f32.mrb[26].mxu0  ;;  %11977 = vmatmul.mubr.bf16.gmra.mrb[16].mxu1 %v14578_v37  ;;  %v1361_v42 = vld [vmem:[#allocation3 + $0x9] sm:$0xff] }
 0x188   : > { %v1016_v51 = vmax.f32 %v968_v41, 0.0  ;;  %v971_v52 = vadd.f32 %v11939_v49, %v14472_v32  ;;  %v962_v54 = vpop.f32.mrb[27].mxu0  ;;  %11980 = vmatprep.mubr.bf16.mxu1 %v14584_v44 }
 0x189   : > { %v1014_v55 = vmax.f32 %v960_v48, 0.0  ;;  %v963_v56 = vadd.f32 %v14472_v32, %v962_v54  ;;  %v1079_v4 = vld [vmem:[#allocation3 + $0x120] sm:$0xff]  ;;  %v13283_v54 = vld [vmem:[%s15513_s3 + $0x88] sm:$0xff]  }
 0x18a   : > { %1049 = vst [vmem:[#allocation3 + $0x151] sm:$0xff] %v1016_v51  ;;  %v1017_v57 = vmax.f32 %v971_v52, 0.0  ;;  %v1077_v60 = vld [vmem:[#allocation3 + $0x108] sm:$0xff] }
 0x18b   : > { %1047 = vst [vmem:[#allocation3 + $0x139] sm:$0xff] %v1014_v55  ;;  %v1015_v58 = vmax.f32 %v963_v56, 0.0  ;;  %v1080_v59 = vld [vmem:[#allocation3 + $0x128] sm:$0xff]  ;;  %v13285_v56 = vld [vmem:[%s15513_s3 + $0x98] sm:$0xff]  }
 0x18c   : > { %1050 = vst [vmem:[#allocation3 + $0x159] sm:$0xff] %v1017_v57  ;;  %v1078_v61 = vld [vmem:[#allocation3 + $0x110] sm:$0xff]  ;;  %v14591_v63 = vpack.c.bf16 %v1017_v57, %v1016_v51  ;;  %v14598_v11 = vpack.c.bf16 %v1080_v59, %v1079_v4  ;;  %v1732_v57 = vld [vmem:[#allocation3 + $0x1a] sm:$0xff] }
 0x18d   : > { %1048 = vst [vmem:[#allocation3 + $0x141] sm:$0xff] %v1015_v58  ;;  %v11942_v1 = vpop.f32.mrb[28].mxu0  ;;  %v14593_v2 = vpack.c.bf16 %v1078_v61, %v1077_v60  ;;  %v14595_v5 = vpack.c.bf16 %v1015_v58, %v1014_v55  ;;  %v13284_v55 = vld [vmem:[%s15513_s3 + $0x90] sm:$0xff]   ;;  %v1733_v58 = vld [vmem:[#allocation3 + $0x22] sm:$0xff]  ;;  %v1735_v60 = vld [vmem:[#allocation3 + $0x3a] sm:$0xff] }
 0x18e   : > { %v984_v8 = vadd.f32 %v11942_v1, %v14472_v32  ;;  %v975_v10 = vpop.f32.mrb[29].mxu0  ;;  %v1734_v59 = vld [vmem:[#allocation3 + $0x32] sm:$0xff]  ;;  %v14658_v61 = vpack.c.bf16 %v1733_v58, %v1732_v57  ;;  %v13291_v1 = vld [vmem:[%s15513_s3 + $0xc8] sm:$0xff]  }
 0x18f   : > { %v976_v13 = vadd.f32 %v14472_v32, %v975_v10  ;;  %v11943_v14 = vpop.f32.mrb[30].mxu0  ;;  %11981 = vmatmul.mubr.bf16.gmra.mrb[20].mxu1 %v14593_v2  ;;  %v14663_v4 = vpack.c.bf16 %v1735_v60, %v1734_v59  ;;  %v1736_v10 = vld [vmem:[#allocation3 + $0x4a] sm:$0xff]  ;;  %v1753_v58 = vld [vmem:[#allocation3 + $0x112] sm:$0xff]  ;;  %v1754_v59 = vld [vmem:[#allocation3 + $0x122] sm:$0xff] }
 0x190   : > { %v1020_v17 = vmax.f32 %v984_v8, 0.0  ;;  %v987_v18 = vadd.f32 %v11943_v14, %v14472_v32  ;;  %v978_v19 = vpop.f32.mrb[31].mxu0  ;;  %11984 = vmatprep.mubr.bf16.mxu1 %v14598_v11  ;;  %v13292_v8 = vld [vmem:[%s15513_s3 + $0xd0] sm:$0xff]   ;;  %v1738_v14 = vld [vmem:[#allocation3 + $0x62] sm:$0xff] }
 0x191   : > { %v1018_v21 = vmax.f32 %v976_v13, 0.0  ;;  %v979_v23 = vadd.f32 %v14472_v32, %v978_v19  ;;  %v1083_v36 = vld [vmem:[#allocation3 + $0x150] sm:$0xff]  ;;  %v1360_v32 = vld [vmem:[#allocation3 + $0x1] sm:$0xff]  ;;  %v13293_v19 = vld [vmem:[%s15513_s3 + $0xd8] sm:$0xff]  }
 0x192   : > { %1053 = vst [vmem:[#allocation3 + $0x181] sm:$0xff] %v1020_v17  ;;  %v1021_v24 = vmax.f32 %v987_v18, 0.0  ;;  %v1081_v30 = vld [vmem:[#allocation3 + $0x138] sm:$0xff]  ;;  %v1392_v51 = vpack.c.bf16 %v1361_v42, %v1360_v32  ;;  %v13296_v42 = vld [vmem:[%s15513_s3 + $0xf0] sm:$0xff]  }
 0x193   : > { %1051 = vst [vmem:[#allocation3 + $0x169] sm:$0xff] %v1018_v21  ;;  %v1019_v26 = vmax.f32 %v979_v23, 0.0  ;;  %v1084_v29 = vld [vmem:[#allocation3 + $0x158] sm:$0xff]  ;;  %v13294_v23 = vld [vmem:[%s15513_s3 + $0xe0] sm:$0xff]   ;;  %v1752_v57 = vld [vmem:[#allocation3 + $0x10a] sm:$0xff] }
 0x194   : > { %1054 = vst [vmem:[#allocation3 + $0x189] sm:$0xff] %v1021_v24  ;;  %v1082_v31 = vld [vmem:[#allocation3 + $0x140] sm:$0xff]  ;;  %v14605_v33 = vpack.c.bf16 %v1021_v24, %v1020_v17  ;;  %v14611_v41 = vpack.c.bf16 %v1084_v29, %v1083_v36  ;;  %v1737_v13 = vld [vmem:[#allocation3 + $0x52] sm:$0xff]  ;;  %v1739_v17 = vld [vmem:[#allocation3 + $0x6a] sm:$0xff] }
 0x195   : > { %1052 = vst [vmem:[#allocation3 + $0x171] sm:$0xff] %v1019_v26  ;;  %v14607_v34 = vpack.c.bf16 %v1082_v31, %v1081_v30  ;;  %v14609_v39 = vpack.c.bf16 %v1019_v26, %v1018_v21  ;;  %v14670_v18 = vpack.c.bf16 %v1737_v13, %v1736_v10  ;;  %v14675_v21 = vpack.c.bf16 %v1739_v17, %v1738_v14  ;;  %v1740_v24 = vld [vmem:[#allocation3 + $0x7a] sm:$0xff]  ;;  %v1741_v26 = vld [vmem:[#allocation3 + $0x82] sm:$0xff]  ;;  %v1742_v29 = vld [vmem:[#allocation3 + $0x92] sm:$0xff] }
 0x196   : > { %v1743_v30 = vld [vmem:[#allocation3 + $0x9a] sm:$0xff]  ;;  %v14682_v31 = vpack.c.bf16 %v1741_v26, %v1740_v24  ;;  %v13295_v36 = vld [vmem:[%s15513_s3 + $0xe8] sm:$0xff]   ;;  %v1758_v14 = vld [vmem:[#allocation3 + $0x152] sm:$0xff] }
 0x197   : > { %11985 = vmatmul.mubr.bf16.gmra.mrb[24].mxu1 %v14607_v34  ;;  %v14687_v32 = vpack.c.bf16 %v1743_v30, %v1742_v29  ;;  %v1755_v60 = vld [vmem:[#allocation3 + $0x12a] sm:$0xff]  ;;  %v1756_v10 = vld [vmem:[#allocation3 + $0x13a] sm:$0xff]  ;;  %v1757_v13 = vld [vmem:[#allocation3 + $0x142] sm:$0xff] }
 0x198   : > { %11988 = vmatprep.mubr.bf16.mxu1 %v14611_v41  ;;  %v1759_v17 = vld [vmem:[#allocation3 + $0x15a] sm:$0xff]  ;;  %v13299_v30 = vld [vmem:[%s15513_s3 + $0x108] sm:$0xff]  }
 0x19a   : > { %v1085_v48 = vld [vmem:[#allocation3 + $0x168] sm:$0xff] }
 0x19c   : > { %v1086_v49 = vld [vmem:[#allocation3 + $0x170] sm:$0xff] }
 0x19d   : > { %v14615_v52 = vpack.c.bf16 %v1086_v49, %v1085_v48  ;;  %v1744_v48 = vld [vmem:[#allocation3 + $0xaa] sm:$0xff]  ;;  %v1745_v49 = vld [vmem:[#allocation3 + $0xb2] sm:$0xff] }
 0x19e   : > { %v1760_v24 = vld [vmem:[#allocation3 + $0x16a] sm:$0xff]  ;;  %v1761_v26 = vld [vmem:[#allocation3 + $0x172] sm:$0xff] }
 0x19f   : > { %11989 = vmatmul.mubr.bf16.gmra.mrb[28].mxu1 %v14615_v52  ;;  %v14724_v29 = vpack.c.bf16 %v1761_v26, %v1760_v24  ;;  %v3220_v24 = vld [vmem:[#allocation3 + $0x98] sm:$0xff] }
 0x1a0   : > { %12008 = vmatprep.mubr.bf16.mxu1 %v1392_v51  ;;  %v1746_v51 = vld [vmem:[#allocation3 + $0xc2] sm:$0xff]  ;;  %v3217_v26 = vld [vmem:[#allocation3 + $0x78] sm:$0xff] }
 0x1a7   : > { %12009 = vmatmul.mubr.bf16.vlgmr.msra.gmra.mrb[0].mxu1 %v14480_v47  ;;  %v13287_v47 = vld [vmem:[%s15513_s3 + $0xa8] sm:$0xff]  }
 0x1a8   : > { %12041 = vmatpush3.bf16.msra.mxu1 %v14574_v27  ;;  %12012 = vmatprep.mubr.bf16.mxu1 %v14478_v45  ;;  %v13286_v45 = vld [vmem:[%s15513_s3 + $0xa0] sm:$0xff]  }
 0x1a9   : > { %12042 = vmatprep.subr.bf16.mxu1 %v13283_v54 }
 0x1ac   : > { %12043 = vmatpush3.bf16.msra.mxu1 %v13283_v54  ;;  %v1747_v54 = vld [vmem:[#allocation3 + $0xca] sm:$0xff] }
 0x1ad   : > { %12044 = vmatprep.subr.bf16.mxu1 %v13284_v55 }
 0x1af   : > { %12013 = vmatmul.mubr.bf16.gmra.mrb[4].mxu1 %v14493_v3  ;;  %v13289_v3 = vld [vmem:[%s15513_s3 + $0xb8] sm:$0xff]  }
 0x1b0   : > { %12016 = vmatprep.mubr.bf16.mxu1 %v14486_v62  ;;  %12045 = vmatpush3.bf16.msra.mxu1 %v13284_v55  ;;  %v13288_v62 = vld [vmem:[%s15513_s3 + $0xb0] sm:$0xff]   ;;  %v14694_v55 = vpack.c.bf16 %v1745_v49, %v1744_v48  ;;  %v2470_v48 = vld [vmem:[#allocation3 + $0x19] sm:$0xff] }
 0x1b1   : > { %12046 = vmatprep.subr.bf16.mxu1 %v13285_v56 }
 0x1b4   : > { %12047 = vmatpush3.bf16.msra.mxu1 %v13285_v56  ;;  %v13297_v56 = vld [vmem:[%s15513_s3 + $0xf8] sm:$0xff]  }
 0x1b5   : > { %12048 = vmatprep.subr.bf16.mxu1 %v13286_v45 }
 0x1b7   : > { %12017 = vmatmul.mubr.bf16.gmra.mrb[8].mxu1 %v14517_v25  ;;  %v1730_v25 = vld [vmem:[#allocation3 + $0x2] sm:$0xff] }
 0x1b8   : > { %12020 = vmatprep.mubr.bf16.mxu1 %v14508_v20  ;;  %12049 = vmatpush3.bf16.msra.mxu1 %v13286_v45  ;;  %v13290_v20 = vld [vmem:[%s15513_s3 + $0xc0] sm:$0xff]   ;;  %v14699_v45 = vpack.c.bf16 %v1747_v54, %v1746_v51  ;;  %v2472_v51 = vld [vmem:[#allocation3 + $0x31] sm:$0xff] }
 0x1b9   : > { %12050 = vmatprep.subr.bf16.mxu1 %v13287_v47  ;;  %v13308_v54 = vld [vmem:[%s15513_s3 + $0x150] sm:$0xff]  }
 0x1bc   : > { %12051 = vmatpush3.bf16.msra.mxu1 %v13287_v47  ;;  %v13298_v47 = vld [vmem:[%s15513_s3 + $0x100] sm:$0xff]  }
 0x1bd   : > { %12052 = vmatprep.subr.bf16.mxu1 %v13288_v62 }
 0x1bf   : > { %12021 = vmatmul.mubr.bf16.gmra.mrb[12].mxu1 %v14541_v50 }
 0x1c0   : > { %12024 = vmatprep.mubr.bf16.mxu1 %v14534_v43  ;;  %12053 = vmatpush3.bf16.msra.mxu1 %v13288_v62  ;;  %v1731_v43 = vld [vmem:[#allocation3 + $0xa] sm:$0xff]  ;;  %v1748_v62 = vld [vmem:[#allocation3 + $0xda] sm:$0xff] }
 0x1c1   : > { %12054 = vmatprep.subr.bf16.mxu1 %v13289_v3  ;;  %v1762_v27 = vpack.c.bf16 %v1731_v43, %v1730_v25  ;;  %v1751_v25 = vld [vmem:[#allocation3 + $0xfa] sm:$0xff] }
 0x1c4   : > { %12055 = vmatpush3.bf16.msra.mxu1 %v13289_v3  ;;  %v1749_v3 = vld [vmem:[#allocation3 + $0xe2] sm:$0xff] }
 0x1c5   : > { %12088 = vmatprep.subr.bf16.mxu1 %v13290_v20  ;;  %v14706_v43 = vpack.c.bf16 %v1749_v3, %v1748_v62  ;;  %v2476_v62 = vld [vmem:[#allocation3 + $0x61] sm:$0xff] }
 0x1c7   : > { %12025 = vmatmul.mubr.bf16.gmra.mrb[16].mxu1 %v14561_v12 }
 0x1c8   : > { %12028 = vmatprep.mubr.bf16.mxu1 %v14554_v7 }
 0x1cf   : > { %12029 = vmatmul.mubr.bf16.gmra.mrb[20].mxu1 %v14581_v40 }
 0x1d0   : > { %12032 = vmatprep.mubr.bf16.mxu1 %v14576_v35 }
 0x1d7   : > { %12033 = vmatmul.mubr.bf16.gmra.mrb[24].mxu1 %v14595_v5 }
 0x1d8   : > { %12036 = vmatprep.mubr.bf16.mxu1 %v14591_v63 }
 0x1df   : > { %12037 = vmatmul.mubr.bf16.gmra.mrb[28].mxu1 %v14609_v39 }
 0x1e0   : > { %12056 = vmatprep.mubr.bf16.mxu1 %v1762_v27 }
 0x1e7   : > { %12057 = vmatmul.mubr.bf16.vlgmr.msra.gmra.mrb[0].mxu1 %v14658_v61 }
 0x1e8   : > { %12089 = vmatpush3.bf16.msra.mxu1 %v13290_v20  ;;  %12060 = vmatprep.mubr.bf16.mxu1 %v14663_v4  ;;  %v1750_v20 = vld [vmem:[#allocation3 + $0xf2] sm:$0xff] }
 0x1e9   : > { %12090 = vmatprep.subr.bf16.mxu1 %v13291_v1  ;;  %v14708_v27 = vpack.c.bf16 %v1751_v25, %v1750_v20  ;;  %v13309_v20 = vld [vmem:[%s15513_s3 + $0x158] sm:$0xff]  }
 0x1ec   : > { %12091 = vmatpush3.bf16.msra.mxu1 %v13291_v1  ;;  %v14712_v1 = vpack.c.bf16 %v1753_v58, %v1752_v57  ;;  %v13310_v57 = vld [vmem:[%s15513_s3 + $0x160] sm:$0xff]  }
 0x1ed   : > { %12092 = vmatprep.subr.bf16.mxu1 %v13292_v8  ;;  %v2481_v58 = vld [vmem:[#allocation3 + $0x99] sm:$0xff] }
 0x1ef   : > { %12061 = vmatmul.mubr.bf16.gmra.mrb[4].mxu1 %v14670_v18 }
 0x1f0   : > { %12064 = vmatprep.mubr.bf16.mxu1 %v14675_v21  ;;  %12093 = vmatpush3.bf16.msra.mxu1 %v13292_v8  ;;  %v14714_v8 = vpack.c.bf16 %v1755_v60, %v1754_v59  ;;  %v2480_v59 = vld [vmem:[#allocation3 + $0x91] sm:$0xff] }
 0x1f1   : > { %12094 = vmatprep.subr.bf16.mxu1 %v13293_v19  ;;  %v14794_v60 = vpack.c.bf16 %v2481_v58, %v2480_v59  ;;  %v3231_v58 = vld [vmem:[#allocation3 + $0x120] sm:$0xff] }
 0x1f4   : > { %12095 = vmatpush3.bf16.msra.mxu1 %v13293_v19  ;;  %v14718_v19 = vpack.c.bf16 %v1757_v13, %v1756_v10  ;;  %v13311_v10 = vld [vmem:[%s15513_s3 + $0x168] sm:$0xff]  }
 0x1f5   : > { %12096 = vmatprep.subr.bf16.mxu1 %v13294_v23  ;;  %v14804_v13 = vld [vmem:[#allocation3 + $0xc1] sm:$0xff] }
 0x1f7   : > { %12065 = vmatmul.mubr.bf16.gmra.mrb[8].mxu1 %v14682_v31 }
 0x1f8   : > { %12068 = vmatprep.mubr.bf16.mxu1 %v14687_v32  ;;  %12097 = vmatpush3.bf16.msra.mxu1 %v13294_v23  ;;  %v14720_v23 = vpack.c.bf16 %v1759_v17, %v1758_v14  ;;  %v2509_v14 = vpack.c.bf16 %v14530_v38, %v14804_v13  ;;  %v13313_v17 = vld [vmem:[%s15513_s3 + $0x178] sm:$0xff]   ;;  %v13315_v38 = vld [vmem:[%s15513_s3 + $0x188] sm:$0xff]  }
 0x1f9   : > { %12098 = vmatprep.subr.bf16.mxu1 %v13295_v36 }
 0x1fc   : > { %12099 = vmatpush3.bf16.msra.mxu1 %v13295_v36  ;;  %v13300_v36 = vld [vmem:[%s15513_s3 + $0x110] sm:$0xff]  }
 0x1fd   : > { %12100 = vmatprep.subr.bf16.mxu1 %v13296_v42 }
 0x1ff   : > { %12069 = vmatmul.mubr.bf16.gmra.mrb[12].mxu1 %v14694_v55 }
 0x200   : > { %12072 = vmatprep.mubr.bf16.mxu1 %v14699_v45  ;;  %12101 = vmatpush3.bf16.msra.mxu1 %v13296_v42 }
 0x201   : > { %12102 = vmatprep.subr.bf16.mxu1 %v13297_v56 }
 0x204   : > { %12103 = vmatpush3.bf16.msra.mxu1 %v13297_v56  ;;  %v2477_v56 = vld [vmem:[#allocation3 + $0x69] sm:$0xff] }
 0x205   : > { %12136 = vmatprep.subr.bf16.mxu1 %v13298_v47  ;;  %v14783_v3 = vpack.c.bf16 %v2477_v56, %v2476_v62  ;;  %v13330_v56 = vld [vmem:[%s15513_s3 + $0x200] sm:$0xff]   ;;  %v3230_v62 = vld [vmem:[#allocation3 + $0x110] sm:$0xff] }
 0x207   : > { %12073 = vmatmul.mubr.bf16.gmra.mrb[16].mxu1 %v14706_v43 }
 0x208   : > { %12076 = vmatprep.mubr.bf16.mxu1 %v14708_v27 }
 0x20f   : > { %12077 = vmatmul.mubr.bf16.gmra.mrb[20].mxu1 %v14712_v1 }
 0x210   : > { %12080 = vmatprep.mubr.bf16.mxu1 %v14714_v8 }
 0x217   : > { %12081 = vmatmul.mubr.bf16.gmra.mrb[24].mxu1 %v14718_v19 }
 0x218   : > { %12084 = vmatprep.mubr.bf16.mxu1 %v14720_v23 }
 0x21f   : > { %12085 = vmatmul.mubr.bf16.gmra.mrb[28].mxu1 %v14724_v29 }
 0x220   : > { %12104 = vmatprep.mubr.bf16.mxu1 %v14488_v0  ;;  %v13301_v0 = vld [vmem:[%s15513_s3 + $0x118] sm:$0xff]  }
 0x227   : > { %12105 = vmatmul.mubr.bf16.vlgmr.msra.gmra.mrb[0].mxu1 %v14496_v6  ;;  %v13302_v6 = vld [vmem:[%s15513_s3 + $0x120] sm:$0xff]  }
 0x228   : > { %12137 = vmatpush3.bf16.msra.mxu1 %v13298_v47  ;;  %12108 = vmatprep.mubr.bf16.mxu1 %v14511_v22  ;;  %v13303_v22 = vld [vmem:[%s15513_s3 + $0x128] sm:$0xff]   ;;  %v14781_v47 = vld [vmem:[#allocation3 + $0x79] sm:$0xff] }
 0x229   : > { %12138 = vmatprep.subr.bf16.mxu1 %v13299_v30  ;;  %v2506_v25 = vpack.c.bf16 %v14506_v16, %v14781_v47  ;;  %v13312_v16 = vld [vmem:[%s15513_s3 + $0x170] sm:$0xff]  }
 0x22c   : > { %12139 = vmatpush3.bf16.msra.mxu1 %v13299_v30  ;;  %v3219_v30 = vld [vmem:[#allocation3 + $0x90] sm:$0xff] }
 0x22d   : > { %12140 = vmatprep.subr.bf16.mxu1 %v13300_v36 }
 0x22f   : > { %12109 = vmatmul.mubr.bf16.gmra.mrb[4].mxu1 %v14520_v28  ;;  %v13304_v28 = vld [vmem:[%s15513_s3 + $0x130] sm:$0xff]  }
 0x230   : > { %12112 = vmatprep.mubr.bf16.mxu1 %v14536_v46  ;;  %12141 = vmatpush3.bf16.msra.mxu1 %v13300_v36  ;;  %v13305_v46 = vld [vmem:[%s15513_s3 + $0x138] sm:$0xff]  }
 0x231   : > { %12142 = vmatprep.subr.bf16.mxu1 %v13301_v0  ;;  %v13325_v36 = vld [vmem:[%s15513_s3 + $0x1d8] sm:$0xff]  }
 0x234   : > { %12143 = vmatpush3.bf16.msra.mxu1 %v13301_v0  ;;  %v3247_v0 = vpack.c.bf16 %v3220_v24, %v3219_v30  ;;  %v3602_v24 = vld [vmem:[#allocation3 + $0x129] sm:$0xff]  ;;  %v3601_v30 = vld [vmem:[#allocation3 + $0x121] sm:$0xff] }
 0x235   : > { %12144 = vmatprep.subr.bf16.mxu1 %v13302_v6 }
 0x237   : > { %12113 = vmatmul.mubr.bf16.gmra.mrb[8].mxu1 %v14544_v53  ;;  %v13306_v53 = vld [vmem:[%s15513_s3 + $0x140] sm:$0xff]  }
 0x238   : > { %12116 = vmatprep.mubr.bf16.mxu1 %v14556_v9  ;;  %12145 = vmatpush3.bf16.msra.mxu1 %v13302_v6  ;;  %v2131_v9 = vld [vmem:[#allocation3 + $0x188] sm:$0xff]  ;;  %v13326_v6 = vld [vmem:[%s15513_s3 + $0x1e0] sm:$0xff]  }
 0x239   : > { %12146 = vmatprep.subr.bf16.mxu1 %v13303_v22 }
 0x23c   : > { %12147 = vmatpush3.bf16.msra.mxu1 %v13303_v22  ;;  %v3222_v22 = vld [vmem:[#allocation3 + $0xb0] sm:$0xff] }
 0x23d   : > { %12148 = vmatprep.subr.bf16.mxu1 %v13304_v28 }
 0x23f   : > { %12117 = vmatmul.mubr.bf16.gmra.mrb[12].mxu1 %v14564_v15  ;;  %v2471_v15 = vld [vmem:[#allocation3 + $0x21] sm:$0xff] }
 0x240   : > { %12120 = vmatprep.mubr.bf16.mxu1 %v14578_v37  ;;  %12149 = vmatpush3.bf16.msra.mxu1 %v13304_v28  ;;  %v2130_v37 = vld [vmem:[#allocation3 + $0x180] sm:$0xff]  ;;  %v2502_v49 = vpack.c.bf16 %v2471_v15, %v2470_v48  ;;  %v3224_v28 = vld [vmem:[#allocation3 + $0xc8] sm:$0xff]  ;;  %v13328_v48 = vld [vmem:[%s15513_s3 + $0x1f0] sm:$0xff]  }
 0x241   : > { %12150 = vmatprep.subr.bf16.mxu1 %v13305_v46  ;;  %v14766_v42 = vpack.c.bf16 %v2131_v9, %v2130_v37  ;;  %v3223_v9 = vld [vmem:[#allocation3 + $0xc0] sm:$0xff]  ;;  %v13327_v15 = vld [vmem:[%s15513_s3 + $0x1e8] sm:$0xff]  }
 0x242   : > { %v3249_v37 = vpack.c.bf16 %v3224_v28, %v3223_v9  ;;  %v3608_v9 = vld [vmem:[#allocation3 + $0x171] sm:$0xff] }
 0x244   : > { %12151 = vmatpush3.bf16.msra.mxu1 %v13305_v46  ;;  %v3221_v46 = vld [vmem:[#allocation3 + $0xa8] sm:$0xff] }
 0x245   : > { %12184 = vmatprep.subr.bf16.mxu1 %v13306_v53 }
 0x247   : > { %12121 = vmatmul.mubr.bf16.gmra.mrb[16].mxu1 %v14584_v44  ;;  %v2473_v44 = vld [vmem:[#allocation3 + $0x39] sm:$0xff] }
 0x248   : > { %12124 = vmatprep.mubr.bf16.mxu1 %v14593_v2  ;;  %v2475_v2 = vld [vmem:[#allocation3 + $0x51] sm:$0xff] }
 0x24f   : > { %12125 = vmatmul.mubr.bf16.gmra.mrb[20].mxu1 %v14598_v11  ;;  %v14769_v11 = vpack.c.bf16 %v2473_v44, %v2472_v51  ;;  %v3228_v44 = vld [vmem:[#allocation3 + $0xf8] sm:$0xff] }
 0x250   : > { %12128 = vmatprep.mubr.bf16.mxu1 %v14607_v34  ;;  %v2474_v34 = vld [vmem:[#allocation3 + $0x49] sm:$0xff] }
 0x257   : > { %12129 = vmatmul.mubr.bf16.gmra.mrb[24].mxu1 %v14611_v41  ;;  %v13307_v41 = vld [vmem:[%s15513_s3 + $0x148] sm:$0xff]  }
 0x258   : > { %12132 = vmatprep.mubr.bf16.mxu1 %v14615_v52  ;;  %v14774_v52 = vpack.c.bf16 %v2475_v2, %v2474_v34  ;;  %v3225_v2 = vld [vmem:[#allocation3 + $0xd8] sm:$0xff]  ;;  %v3227_v34 = vld [vmem:[#allocation3 + $0xf0] sm:$0xff] }
 0x25f   : > { %12133 = vmatmul.mubr.bf16.gmra.mrb[28].mxu1 %v14766_v42 }
 0x260   : > { %12152 = vmatprep.mubr.bf16.mxu1 %v2502_v49  ;;  %v3226_v49 = vld [vmem:[#allocation3 + $0xe0] sm:$0xff] }
 0x261   : > { %v3250_v51 = vpack.c.bf16 %v3226_v49, %v3225_v2  ;;  %v3609_v49 = vld [vmem:[#allocation3 + $0x181] sm:$0xff]  ;;  %v3611_v2 = vld [vmem:[#allocation3 + $0x199] sm:$0xff] }
 0x267   : > { %12153 = vmatmul.mubr.bf16.vlgmr.msra.gmra.mrb[0].mxu1 %v14769_v11 }
 0x268   : > { %12185 = vmatpush3.bf16.msra.mxu1 %v13306_v53  ;;  %12156 = vmatprep.mubr.bf16.mxu1 %v14774_v52  ;;  %v3248_v53 = vpack.c.bf16 %v3222_v22, %v3221_v46  ;;  %v3603_v22 = vld [vmem:[#allocation3 + $0x139] sm:$0xff]  ;;  %v3605_v46 = vld [vmem:[#allocation3 + $0x151] sm:$0xff] }
 0x269   : > { %12186 = vmatprep.subr.bf16.mxu1 %v13307_v41 }
 0x26c   : > { %12187 = vmatpush3.bf16.msra.mxu1 %v13307_v41  ;;  %v13329_v41 = vld [vmem:[%s15513_s3 + $0x1f8] sm:$0xff]  }
 0x26d   : > { %12188 = vmatprep.subr.bf16.mxu1 %v13308_v54 }
 0x26f   : > { %12157 = vmatmul.mubr.bf16.gmra.mrb[4].mxu1 %v14783_v3 }
 0x270   : > { %12160 = vmatprep.mubr.bf16.mxu1 %v2506_v25  ;;  %12189 = vmatpush3.bf16.msra.mxu1 %v13308_v54  ;;  %v3251_v54 = vpack.c.bf16 %v3228_v44, %v3227_v34  ;;  %v3229_v25 = vld [vmem:[#allocation3 + $0x108] sm:$0xff] }
 0x271   : > { %12190 = vmatprep.subr.bf16.mxu1 %v13309_v20 }
 0x274   : > { %12191 = vmatpush3.bf16.msra.mxu1 %v13309_v20  ;;  %v3232_v20 = vld [vmem:[#allocation3 + $0x128] sm:$0xff] }
 0x275   : > { %12192 = vmatprep.subr.bf16.mxu1 %v13310_v57  ;;  %v3253_v59 = vpack.c.bf16 %v3232_v20, %v3231_v58  ;;  %v3954_v20 = vld [vmem:[#allocation3 + $0x52] sm:$0xff] }
 0x277   : > { %12161 = vmatmul.mubr.bf16.gmra.mrb[8].mxu1 %v14794_v60 }
 0x278   : > { %12164 = vmatprep.mubr.bf16.mxu1 %v14541_v50  ;;  %12193 = vmatpush3.bf16.msra.mxu1 %v13310_v57  ;;  %v13314_v50 = vld [vmem:[%s15513_s3 + $0x180] sm:$0xff]   ;;  %v3252_v57 = vpack.c.bf16 %v3230_v62, %v3229_v25  ;;  %v3953_v62 = vld [vmem:[#allocation3 + $0x4a] sm:$0xff] }
 0x279   : > { %12194 = vmatprep.subr.bf16.mxu1 %v13311_v10  ;;  %v3955_v25 = vld [vmem:[#allocation3 + $0x62] sm:$0xff]  ;;  %v3984_v58 = vpack.c.bf16 %v3954_v20, %v3953_v62 }
 0x27c   : > { %12195 = vmatpush3.bf16.msra.mxu1 %v13311_v10  ;;  %v3234_v10 = vld [vmem:[#allocation3 + $0x140] sm:$0xff] }
 0x27d   : > { %12196 = vmatprep.subr.bf16.mxu1 %v13312_v16 }
 0x27f   : > { %12165 = vmatmul.mubr.bf16.gmra.mrb[12].mxu1 %v2509_v14  ;;  %v3233_v14 = vld [vmem:[#allocation3 + $0x138] sm:$0xff] }
 0x280   : > { %12168 = vmatprep.mubr.bf16.mxu1 %v14561_v12  ;;  %12197 = vmatpush3.bf16.msra.mxu1 %v13312_v16  ;;  %v13317_v12 = vld [vmem:[%s15513_s3 + $0x198] sm:$0xff]  }
 0x281   : > { %12198 = vmatprep.subr.bf16.mxu1 %v13313_v17  ;;  %v3236_v16 = vld [vmem:[#allocation3 + $0x158] sm:$0xff] }
 0x284   : > { %12199 = vmatpush3.bf16.msra.mxu1 %v13313_v17  ;;  %v3254_v17 = vpack.c.bf16 %v3234_v10, %v3233_v14  ;;  %v3957_v10 = vld [vmem:[#allocation3 + $0x7a] sm:$0xff]  ;;  %v3959_v14 = vld [vmem:[#allocation3 + $0x92] sm:$0xff] }
 0x285   : > { %12232 = vmatprep.subr.bf16.mxu1 %v13314_v50 }
 0x287   : > { %12169 = vmatmul.mubr.bf16.gmra.mrb[16].mxu1 %v14554_v7  ;;  %v13316_v7 = vld [vmem:[%s15513_s3 + $0x190] sm:$0xff]  }
 0x288   : > { %12172 = vmatprep.mubr.bf16.mxu1 %v14581_v40  ;;  %v13319_v40 = vld [vmem:[%s15513_s3 + $0x1a8] sm:$0xff]  }
 0x28f   : > { %12173 = vmatmul.mubr.bf16.gmra.mrb[20].mxu1 %v14576_v35  ;;  %v13318_v35 = vld [vmem:[%s15513_s3 + $0x1a0] sm:$0xff]  }
 0x290   : > { %12176 = vmatprep.mubr.bf16.mxu1 %v14595_v5  ;;  %v13321_v5 = vld [vmem:[%s15513_s3 + $0x1b8] sm:$0xff]  }
 0x297   : > { %12177 = vmatmul.mubr.bf16.gmra.mrb[24].mxu1 %v14591_v63  ;;  %v13320_v63 = vld [vmem:[%s15513_s3 + $0x1b0] sm:$0xff]  }
 0x298   : > { %12180 = vmatprep.mubr.bf16.mxu1 %v14609_v39  ;;  %v2870_v39 = vld [vmem:[#allocation3 + $0x182] sm:$0xff] }
 0x29f   : > { %12181 = vmatmul.mubr.bf16.gmra.mrb[28].mxu1 %v14605_v33  ;;  %v13322_v33 = vld [vmem:[%s15513_s3 + $0x1c0] sm:$0xff]  }
 0x2a0   : > { %12200 = vmatprep.mubr.bf16.mxu1 %v14658_v61  ;;  %v2871_v61 = vld [vmem:[#allocation3 + $0x18a] sm:$0xff] }
 0x2a7   : > { %12201 = vmatmul.mubr.bf16.vlgmr.msra.gmra.mrb[0].mxu1 %v14663_v4  ;;  %v3212_v4 = vld [vmem:[#allocation3 + $0x38] sm:$0xff] }
 0x2a8   : > { %12233 = vmatpush3.bf16.msra.mxu1 %v13314_v50  ;;  %12204 = vmatprep.mubr.bf16.mxu1 %v14670_v18  ;;  %v14861_v18 = vpack.c.bf16 %v2871_v61, %v2870_v39  ;;  %v3235_v50 = vld [vmem:[#allocation3 + $0x150] sm:$0xff]  ;;  %v13331_v39 = vld [vmem:[%s15513_s3 + $0x208] sm:$0xff]  }
 0x2a9   : > { %12234 = vmatprep.subr.bf16.mxu1 %v13315_v38  ;;  %v3588_v61 = vld [vmem:[#allocation3 + $0x81] sm:$0xff] }
 0x2ac   : > { %12235 = vmatpush3.bf16.msra.mxu1 %v13315_v38  ;;  %v3255_v38 = vpack.c.bf16 %v3236_v16, %v3235_v50  ;;  %v3958_v16 = vld [vmem:[#allocation3 + $0x82] sm:$0xff] }
 0x2ad   : > { %12236 = vmatprep.subr.bf16.mxu1 %v13316_v7  ;;  %v3986_v50 = vpack.c.bf16 %v3958_v16, %v3957_v10 }
 0x2af   : > { %12205 = vmatmul.mubr.bf16.gmra.mrb[4].mxu1 %v14675_v21  ;;  %v3211_v21 = vld [vmem:[#allocation3 + $0x30] sm:$0xff] }
 0x2b0   : > { %12208 = vmatprep.mubr.bf16.mxu1 %v14682_v31  ;;  %12237 = vmatpush3.bf16.msra.mxu1 %v13316_v7  ;;  %v3243_v31 = vpack.c.bf16 %v3212_v4, %v3211_v21  ;;  %v3238_v7 = vld [vmem:[#allocation3 + $0x170] sm:$0xff]  ;;  %v13333_v4 = vld [vmem:[%s15513_s3 + $0x218] sm:$0xff]  }
 0x2b1   : > { %12238 = vmatprep.subr.bf16.mxu1 %v13317_v12  ;;  %v3594_v21 = vld [vmem:[#allocation3 + $0xc9] sm:$0xff] }
 0x2b4   : > { %12239 = vmatpush3.bf16.msra.mxu1 %v13317_v12  ;;  %v3237_v12 = vld [vmem:[#allocation3 + $0x168] sm:$0xff] }
 0x2b5   : > { %12240 = vmatprep.subr.bf16.mxu1 %v13318_v35 }
 0x2b7   : > { %12209 = vmatmul.mubr.bf16.gmra.mrb[8].mxu1 %v14687_v32  ;;  %v3214_v32 = vld [vmem:[#allocation3 + $0x50] sm:$0xff] }
 0x2b8   : > { %12212 = vmatprep.mubr.bf16.mxu1 %v14694_v55  ;;  %12241 = vmatpush3.bf16.msra.mxu1 %v13318_v35  ;;  %v3216_v55 = vld [vmem:[#allocation3 + $0x68] sm:$0xff]  ;;  %v3256_v35 = vpack.c.bf16 %v3238_v7, %v3237_v12  ;;  %v3962_v12 = vld [vmem:[#allocation3 + $0xb2] sm:$0xff] }
 0x2b9   : > { %12242 = vmatprep.subr.bf16.mxu1 %v13319_v40  ;;  %v3961_v7 = vld [vmem:[#allocation3 + $0xaa] sm:$0xff] }
 0x2bc   : > { %12243 = vmatpush3.bf16.msra.mxu1 %v13319_v40  ;;  %v14889_v40 = vld [vmem:[#allocation3] sm:$0xff] }
 0x2bd   : > { %12244 = vmatprep.subr.bf16.mxu1 %v13320_v63 }
 0x2bf   : > { %12213 = vmatmul.mubr.bf16.gmra.mrb[12].mxu1 %v14699_v45  ;;  %v3213_v45 = vld [vmem:[#allocation3 + $0x48] sm:$0xff] }
 0x2c0   : > { %12216 = vmatprep.mubr.bf16.mxu1 %v14706_v43  ;;  %12245 = vmatpush3.bf16.msra.mxu1 %v13320_v63  ;;  %v3244_v43 = vpack.c.bf16 %v3214_v32, %v3213_v45  ;;  %v3258_v63 = vpack.c.bf16 %v14889_v40, %v14889_v40  ;;  %v3596_v45 = vld [vmem:[#allocation3 + $0xe1] sm:$0xff] }
 0x2c1   : > { %12246 = vmatprep.subr.bf16.mxu1 %v13321_v5 }
 0x2c4   : > { %12247 = vmatpush3.bf16.msra.mxu1 %v13321_v5  ;;  %v13338_v5 = vld [vmem:[#allocation8] sm:$0xff]  }
 0x2c5   : > { %12280 = vmatprep.subr.bf16.mxu1 %v13322_v33  ;;  %12376 = vmatprep.subr.bf16.mxu0 %v13338_v5 }
 0x2c6   : > { %12377 = vmatpush3.bf16.msra.mxu0 %v13338_v5  ;;  %v3988_v5 = vpack.c.bf16 %v3962_v12, %v3961_v7 }
 0x2c7   : > { %12217 = vmatmul.mubr.bf16.gmra.mrb[16].mxu1 %v14708_v27  ;;  %v3215_v27 = vld [vmem:[#allocation3 + $0x60] sm:$0xff] }
 0x2c8   : > { %12220 = vmatprep.mubr.bf16.mxu1 %v14712_v1  ;;  %v13323_v1 = vld [vmem:[%s15513_s3 + $0x1c8] sm:$0xff]  }
 0x2cf   : > { %12221 = vmatmul.mubr.bf16.gmra.mrb[20].mxu1 %v14714_v8  ;;  %v3245_v8 = vpack.c.bf16 %v3216_v55, %v3215_v27  ;;  %v3619_v55 = vpack.c.bf16 %v3594_v21, %v14804_v13  ;;  %v3595_v27 = vld [vmem:[#allocation3 + $0xd9] sm:$0xff] }
 0x2d0   : > { %12224 = vmatprep.mubr.bf16.mxu1 %v14718_v19  ;;  %v13324_v19 = vld [vmem:[%s15513_s3 + $0x1d0] sm:$0xff]  }
 0x2d1   : > { %v3970_v21 = vld [vmem:[#allocation3 + $0x112] sm:$0xff] }
 0x2d7   : > { %12225 = vmatmul.mubr.bf16.gmra.mrb[24].mxu1 %v14720_v23  ;;  %v3218_v23 = vld [vmem:[#allocation3 + $0x80] sm:$0xff] }
 0x2d8   : > { %12228 = vmatprep.mubr.bf16.mxu1 %v14724_v29  ;;  %v3246_v29 = vpack.c.bf16 %v3218_v23, %v3217_v26  ;;  %v3600_v23 = vld [vmem:[#allocation3 + $0x111] sm:$0xff]  ;;  %v3599_v26 = vld [vmem:[#allocation3 + $0x109] sm:$0xff] }
 0x2df   : > { %12229 = vmatmul.mubr.bf16.gmra.mrb[28].mxu1 %v14861_v18 }
 0x2e0   : > { %12248 = vmatprep.mubr.bf16.mxu1 %v3243_v31  ;;  %v3591_v31 = vld [vmem:[#allocation3 + $0xa9] sm:$0xff] }
 0x2e7   : > { %12249 = vmatmul.mubr.bf16.vlgmr.msra.gmra.mrb[0].mxu1 %v3244_v43  ;;  %v3598_v43 = vld [vmem:[#allocation3 + $0xf9] sm:$0xff] }
 0x2e8   : > { %12281 = vmatpush3.bf16.msra.mxu1 %v13322_v33  ;;  %12252 = vmatprep.mubr.bf16.mxu1 %v3245_v8  ;;  %v13339_v33 = vld [vmem:[#allocation8 + $0x8] sm:$0xff]  }
 0x2e9   : > { %12282 = vmatprep.subr.bf16.mxu1 %v13323_v1  ;;  %12378 = vmatprep.subr.bf16.mxu0 %v13339_v33  ;;  %v3597_v8 = vld [vmem:[#allocation3 + $0xf1] sm:$0xff] }
 0x2ea   : > { %12379 = vmatpush3.bf16.msra.mxu0 %v13339_v33  ;;  %v3621_v13 = vpack.c.bf16 %v3598_v43, %v3597_v8  ;;  %v3975_v43 = vld [vmem:[#allocation3 + $0x152] sm:$0xff] }
 0x2ec   : > { %12283 = vmatpush3.bf16.msra.mxu1 %v13323_v1  ;;  %v3620_v1 = vpack.c.bf16 %v3596_v45, %v3595_v27  ;;  %v3974_v45 = vld [vmem:[#allocation3 + $0x142] sm:$0xff]  ;;  %v3976_v27 = vld [vmem:[#allocation3 + $0x15a] sm:$0xff] }
 0x2ed   : > { %12284 = vmatprep.subr.bf16.mxu1 %v13324_v19  ;;  %v3995_v8 = vpack.c.bf16 %v3976_v27, %v3975_v43 }
 0x2ef   : > { %12253 = vmatmul.mubr.bf16.gmra.mrb[4].mxu1 %v3246_v29  ;;  %v3622_v29 = vpack.c.bf16 %v3600_v23, %v3599_v26  ;;  %v3982_v26 = vld [vmem:[#allocation3 + $0x1a2] sm:$0xff] }
 0x2f0   : > { %12256 = vmatprep.mubr.bf16.mxu1 %v3247_v0  ;;  %12285 = vmatpush3.bf16.msra.mxu1 %v13324_v19  ;;  %v13337_v19 = vld [vmem:[%s15513_s3 + $0x238] sm:$0xff]   ;;  %v3604_v0 = vld [vmem:[#allocation3 + $0x141] sm:$0xff] }
 0x2f1   : > { %12286 = vmatprep.subr.bf16.mxu1 %v13325_v36  ;;  %v3624_v28 = vpack.c.bf16 %v3604_v0, %v3603_v22  ;;  %v13342_v0 = vld [vmem:[#allocation8 + $0x20] sm:$0xff]   ;;  %v13344_v22 = vld [vmem:[#allocation8 + $0x30] sm:$0xff]  }
 0x2f4   : > { %12287 = vmatpush3.bf16.msra.mxu1 %v13325_v36  ;;  %v3623_v36 = vpack.c.bf16 %v3602_v24, %v3601_v30  ;;  %v3981_v24 = vld [vmem:[#allocation3 + $0x19a] sm:$0xff] }
 0x2f5   : > { %12288 = vmatprep.subr.bf16.mxu1 %v13326_v6  ;;  %v13340_v30 = vld [vmem:[#allocation8 + $0x10] sm:$0xff]  }
 0x2f6   : > { %12380 = vmatprep.subr.bf16.mxu0 %v13340_v30 }
 0x2f7   : > { %12257 = vmatmul.mubr.bf16.gmra.mrb[8].mxu1 %v3248_v53  ;;  %12381 = vmatpush3.bf16.msra.mxu0 %v13340_v30 }
 0x2f8   : > { %12260 = vmatprep.mubr.bf16.mxu1 %v3249_v37  ;;  %12289 = vmatpush3.bf16.msra.mxu1 %v13326_v6  ;;  %v3606_v6 = vld [vmem:[#allocation3 + $0x159] sm:$0xff]  ;;  %v3607_v37 = vld [vmem:[#allocation3 + $0x169] sm:$0xff] }
 0x2f9   : > { %12290 = vmatprep.subr.bf16.mxu1 %v13327_v15  ;;  %v3625_v53 = vpack.c.bf16 %v3606_v6, %v3605_v46  ;;  %v13343_v6 = vld [vmem:[#allocation8 + $0x28] sm:$0xff]   ;;  %v14927_v46 = vld [vmem:[%s15514_s4] ss:$0 sm:$0xff] }
 0x2fc   : > { %12291 = vmatpush3.bf16.msra.mxu1 %v13327_v15  ;;  %v3610_v15 = vld [vmem:[#allocation3 + $0x189] sm:$0xff] }
 0x2fd   : > { %12292 = vmatprep.subr.bf16.mxu1 %v13328_v48  ;;  %v3627_v44 = vpack.c.bf16 %v3610_v15, %v3609_v49 }
 0x2ff   : > { %12261 = vmatmul.mubr.bf16.gmra.mrb[12].mxu1 %v3250_v51  ;;  %v3612_v51 = vld [vmem:[#allocation3 + $0x1a1] sm:$0xff] }
 0x300   : > { %12264 = vmatprep.mubr.bf16.mxu1 %v3251_v54  ;;  %12293 = vmatpush3.bf16.msra.mxu1 %v13328_v48  ;;  %v3626_v48 = vpack.c.bf16 %v3608_v9, %v3607_v37  ;;  %v3628_v34 = vpack.c.bf16 %v3612_v51, %v3611_v2  ;;  %v3952_v54 = vld [vmem:[#allocation3 + $0x3a] sm:$0xff] }
 0x301   : > { %12294 = vmatprep.subr.bf16.mxu1 %v13329_v41 }
 0x304   : > { %12295 = vmatpush3.bf16.msra.mxu1 %v13329_v41  ;;  %v3951_v41 = vld [vmem:[#allocation3 + $0x32] sm:$0xff] }
 0x305   : > { %12328 = vmatprep.subr.bf16.mxu1 %v13330_v56 }
 0x307   : > { %12265 = vmatmul.mubr.bf16.gmra.mrb[16].mxu1 %v3252_v57  ;;  %v3956_v57 = vld [vmem:[#allocation3 + $0x6a] sm:$0xff] }
 0x308   : > { %12268 = vmatprep.mubr.bf16.mxu1 %v3253_v59  ;;  %v3985_v59 = vpack.c.bf16 %v3956_v57, %v3955_v25 }
 0x30f   : > { %12269 = vmatmul.mubr.bf16.gmra.mrb[20].mxu1 %v3254_v17  ;;  %v3960_v17 = vld [vmem:[#allocation3 + $0x9a] sm:$0xff] }
 0x310   : > { %12272 = vmatprep.mubr.bf16.mxu1 %v3255_v38  ;;  %v3987_v38 = vpack.c.bf16 %v3960_v17, %v3959_v14 }
 0x317   : > { %12273 = vmatmul.mubr.bf16.gmra.mrb[24].mxu1 %v3256_v35  ;;  %v3963_v35 = vld [vmem:[#allocation3 + $0xc2] sm:$0xff] }
 0x318   : > { %12276 = vmatprep.mubr.bf16.mxu1 %v14766_v42  ;;  %v13332_v42 = vld [vmem:[%s15513_s3 + $0x210] sm:$0xff]  }
 0x31f   : > { %12277 = vmatmul.mubr.bf16.gmra.mrb[28].mxu1 %v3258_v63  ;;  %v3964_v63 = vld [vmem:[#allocation3 + $0xca] sm:$0xff] }
 0x320   : > { %12296 = vmatprep.mubr.bf16.mxu1 %v14769_v11  ;;  %v3616_v11 = vpack.c.bf16 %v3588_v61, %v14781_v47  ;;  %v13335_v47 = vld [vmem:[%s15513_s3 + $0x228] sm:$0xff]   ;;  %v3989_v33 = vpack.c.bf16 %v3964_v63, %v3963_v35  ;;  %v3967_v61 = vld [vmem:[#allocation3 + $0xf2] sm:$0xff] }
 0x327   : > { %12297 = vmatmul.mubr.bf16.vlgmr.msra.gmra.mrb[0].mxu1 %v14774_v52  ;;  %v13334_v52 = vld [vmem:[%s15513_s3 + $0x220] sm:$0xff]  }
 0x328   : > { %12329 = vmatpush3.bf16.msra.mxu1 %v13330_v56  ;;  %12300 = vmatprep.mubr.bf16.mxu1 %v14783_v3  ;;  %v3592_v3 = vld [vmem:[#allocation3 + $0xb1] sm:$0xff]  ;;  %v3983_v56 = vpack.c.bf16 %v3952_v54, %v3951_v41 }
 0x329   : > { %12330 = vmatprep.subr.bf16.mxu1 %v13331_v39  ;;  %v3618_v32 = vpack.c.bf16 %v3592_v3, %v3591_v31  ;;  %v3969_v3 = vld [vmem:[#allocation3 + $0x10a] sm:$0xff]  ;;  %v3971_v31 = vld [vmem:[#allocation3 + $0x122] sm:$0xff] }
 0x32c   : > { %12331 = vmatpush3.bf16.msra.mxu1 %v13331_v39  ;;  %v3965_v39 = vld [vmem:[#allocation3 + $0xda] sm:$0xff] }
 0x32d   : > { %12332 = vmatprep.subr.bf16.mxu1 %v13332_v42 }
 0x32f   : > { %12301 = vmatmul.mubr.bf16.gmra.mrb[4].mxu1 %v3616_v11  ;;  %v3968_v11 = vld [vmem:[#allocation3 + $0xfa] sm:$0xff] }
 0x330   : > { %12304 = vmatprep.mubr.bf16.mxu1 %v14794_v60  ;;  %12333 = vmatpush3.bf16.msra.mxu1 %v13332_v42  ;;  %v13336_v60 = vld [vmem:[%s15513_s3 + $0x230] sm:$0xff]   ;;  %v3966_v42 = vld [vmem:[#allocation3 + $0xe2] sm:$0xff] }
 0x331   : > { %12334 = vmatprep.subr.bf16.mxu1 %v13333_v4 }
 0x334   : > { %12335 = vmatpush3.bf16.msra.mxu1 %v13333_v4  ;;  %v3990_v4 = vpack.c.bf16 %v3966_v42, %v3965_v39 }
 0x335   : > { %12336 = vmatprep.subr.bf16.mxu1 %v13334_v52 }
 0x337   : > { %12305 = vmatmul.mubr.bf16.gmra.mrb[8].mxu1 %v3618_v32  ;;  %v3972_v32 = vld [vmem:[#allocation3 + $0x12a] sm:$0xff] }
 0x338   : > { %12308 = vmatprep.mubr.bf16.mxu1 %v3619_v55  ;;  %12337 = vmatpush3.bf16.msra.mxu1 %v13334_v52  ;;  %v3991_v52 = vpack.c.bf16 %v3968_v11, %v3967_v61  ;;  %v3993_v55 = vpack.c.bf16 %v3972_v32, %v3971_v31 }
 0x339   : > { %12338 = vmatprep.subr.bf16.mxu1 %v13335_v47 }
 0x33c   : > { %12339 = vmatpush3.bf16.msra.mxu1 %v13335_v47  ;;  %v3992_v47 = vpack.c.bf16 %v3970_v21, %v3969_v3 }
 0x33d   : > { %12340 = vmatprep.subr.bf16.mxu1 %v13336_v60 }
 0x33f   : > { %12309 = vmatmul.mubr.bf16.gmra.mrb[12].mxu1 %v3620_v1 }
 0x340   : > { %12312 = vmatprep.mubr.bf16.mxu1 %v3621_v13  ;;  %12341 = vmatpush3.bf16.msra.mxu1 %v13336_v60  ;;  %v3973_v60 = vld [vmem:[#allocation3 + $0x13a] sm:$0xff]  ;;  %v3978_v13 = vld [vmem:[#allocation3 + $0x172] sm:$0xff] }
 0x341   : > { %12342 = vmatprep.subr.bf16.mxu1 %v13337_v19  ;;  %v3994_v1 = vpack.c.bf16 %v3974_v45, %v3973_v60 }
 0x344   : > { %12343 = vmatpush3.bf16.msra.mxu1 %v13337_v19  ;;  %v3977_v19 = vld [vmem:[#allocation3 + $0x16a] sm:$0xff] }
 0x345   : > { %v3996_v23 = vpack.c.bf16 %v3978_v13, %v3977_v19 }
 0x347   : > { %12313 = vmatmul.mubr.bf16.gmra.mrb[16].mxu1 %v3622_v29  ;;  %v3998_v29 = vpack.c.bf16 %v3982_v26, %v3981_v24 }
 0x348   : > { %12316 = vmatprep.mubr.bf16.mxu1 %v3623_v36  ;;  %v13341_v36 = vld [vmem:[#allocation8 + $0x18] sm:$0xff]  }
 0x349   : > { %12382 = vmatprep.subr.bf16.mxu0 %v13341_v36 }
 0x34a   : > { %12383 = vmatpush3.bf16.msra.mxu0 %v13341_v36 }
 0x34b   : > { %12384 = vmatprep.subr.bf16.mxu0 %v13342_v0 }
 0x34e   : > { %12385 = vmatpush3.bf16.msra.mxu0 %v13342_v0 }
 0x34f   : > { %12317 = vmatmul.mubr.bf16.gmra.mrb[20].mxu1 %v3624_v28  ;;  %12386 = vmatprep.subr.bf16.mxu0 %v13343_v6  ;;  %v14921_v28 = vld [vmem:[#allocation8 + $0x40] sm:$0xff]  }
 0x350   : > { %12320 = vmatprep.mubr.bf16.mxu1 %v3625_v53 }
 0x352   : > { %12387 = vmatpush3.bf16.msra.mxu0 %v13343_v6 }
 0x353   : > { %12388 = vmatprep.subr.bf16.mxu0 %v13344_v22 }
 0x356   : > { %12389 = vmatpush3.bf16.msra.mxu0 %v13344_v22 }
 0x357   : > { %12321 = vmatmul.mubr.bf16.gmra.mrb[24].mxu1 %v3626_v48 }
 0x358   : > { %12324 = vmatprep.mubr.bf16.mxu1 %v3627_v44 }
 0x35f   : > { %12325 = vmatmul.mubr.bf16.gmra.mrb[28].mxu1 %v3628_v34 }
 0x360   : > { %12344 = vmatprep.mubr.bf16.mxu1 %v3983_v56 }
 0x367   : > { %12345 = vmatmul.mubr.bf16.vlgmr.msra.gmra.mrb[0].mxu1 %v3984_v58 }
 0x368   : > { %12348 = vmatprep.mubr.bf16.mxu1 %v3985_v59 }
 0x36f   : > { %12349 = vmatmul.mubr.bf16.gmra.mrb[4].mxu1 %v3986_v50 }
 0x370   : > { %12352 = vmatprep.mubr.bf16.mxu1 %v3987_v38 }
 0x377   : > { %12353 = vmatmul.mubr.bf16.gmra.mrb[8].mxu1 %v3988_v5 }
 0x378   : > { %12356 = vmatprep.mubr.bf16.mxu1 %v3989_v33 }
 0x37f   : > { %12357 = vmatmul.mubr.bf16.gmra.mrb[12].mxu1 %v3990_v4 }
 0x380   : > { %12360 = vmatprep.mubr.bf16.mxu1 %v3991_v52 }
 0x387   : > { %12361 = vmatmul.mubr.bf16.gmra.mrb[16].mxu1 %v3992_v47 }
 0x388   : > { %12364 = vmatprep.mubr.bf16.mxu1 %v3993_v55 }
 0x38f   : > { %12365 = vmatmul.mubr.bf16.gmra.mrb[20].mxu1 %v3994_v1 }
 0x390   : > { %12368 = vmatprep.mubr.bf16.mxu1 %v3995_v8 }
 0x397   : > { %12369 = vmatmul.mubr.bf16.gmra.mrb[24].mxu1 %v3996_v23 }
 0x398   : > { %12372 = vmatprep.mubr.bf16.mxu1 %v14861_v18  ;;  %v13345_v18 = vld [vmem:[#allocation8 + $0x38] sm:$0xff]  }
 0x399   : > { %12390 = vmatprep.subr.bf16.mxu0 %v13345_v18 }
 0x39a   : > { %12391 = vmatpush3.bf16.msra.mxu0 %v13345_v18 }
 0x39b   : > { %12400 = vmatprep.subr.bf16.mxu0 %v14921_v28 }
 0x39f   : > { %12373 = vmatmul.mubr.bf16.gmra.mrb[28].mxu1 %v3998_v29 }
 0x43a   : > { %v12346_v53 = vpop.f32.mrb[0].mxu1 }
 0x43b   : > { %v4362_v9 = vadd.f32 %v12346_v53, %v14927_v46  ;;  %v4098_v15 = vpop.f32.mrb[1].mxu1 }
 0x43c   : > { %v4360_v37 = vadd.f32 %v14927_v46, %v4098_v15  ;;  %v12347_v48 = vpop.f32.mrb[2].mxu1 }
 0x43d   : > { %v4394_v49 = vmax.f32 %v4362_v9, 0.0  ;;  %v4363_v44 = vadd.f32 %v12347_v48, %v14927_v46  ;;  %v4101_v2 = vpop.f32.mrb[3].mxu1 }
 0x43e   : > { %v4392_v51 = vmax.f32 %v4360_v37, 0.0  ;;  %v4361_v34 = vadd.f32 %v14927_v46, %v4101_v2 }
 0x43f   : > { %4426 = vst [vmem:[#allocation6 + $0x10] sm:$0xff] %v4394_v49  ;;  %v4395_v41 = vmax.f32 %v4363_v44, 0.0 }
 0x440   : > { %4424 = vst [vmem:[#allocation6] sm:$0xff] %v4392_v51  ;;  %v4393_v54 = vmax.f32 %v4361_v34, 0.0 }
 0x441   : > { %4427 = vst [vmem:[#allocation6 + $0x18] sm:$0xff] %v4395_v41 }
 0x442   : > { %4425 = vst [vmem:[#allocation6 + $0x8] sm:$0xff] %v4393_v54  ;;  %v12350_v56 = vpop.f32.mrb[4].mxu1 }
 0x443   : > { %v4366_v62 = vadd.f32 %v12350_v56, %v14927_v46  ;;  %v4114_v20 = vpop.f32.mrb[5].mxu1 }
 0x444   : > { %v4364_v25 = vadd.f32 %v14927_v46, %v4114_v20  ;;  %v12351_v57 = vpop.f32.mrb[6].mxu1 }
 0x445   : > { %v4398_v58 = vmax.f32 %v4366_v62, 0.0  ;;  %v4367_v59 = vadd.f32 %v12351_v57, %v14927_v46  ;;  %v4117_v10 = vpop.f32.mrb[7].mxu1 }
 0x446   : > { %v4396_v16 = vmax.f32 %v4364_v25, 0.0  ;;  %v4365_v14 = vadd.f32 %v14927_v46, %v4117_v10 }
 0x447   : > { %4430 = vst [vmem:[#allocation6 + $0x30] sm:$0xff] %v4398_v58  ;;  %v4399_v17 = vmax.f32 %v4367_v59, 0.0 }
 0x448   : > { %v4488_v50 = vld [vmem:[#allocation6 + $0x10] ss:$2 sm:$0xff]  ;;  %v4504_v38 = vld [vmem:[#allocation6 + $0x11] ss:$2 sm:$0xff]  ;;  %4428 = vst [vmem:[#allocation6 + $0x20] sm:$0xff] %v4396_v16  ;;  %v4397_v7 = vmax.f32 %v4365_v14, 0.0 }
 0x449   : > { %v4527_v12 = vmax.f32 %v4488_v50, %v4504_v38  ;;  %v4456_v35 = vld [vmem:[#allocation6] ss:$2 sm:$0xff]  ;;  %v4472_v63 = vld [vmem:[#allocation6 + $0x1] ss:$2 sm:$0xff]  ;;  %4431 = vst [vmem:[#allocation6 + $0x38] sm:$0xff] %v4399_v17 }
 0x44a   : > { %v4519_v5 = vmax.f32 %v4456_v35, %v4472_v63  ;;  %4429 = vst [vmem:[#allocation6 + $0x28] sm:$0xff] %v4397_v7  ;;  %v12354_v33 = vpop.f32.mrb[8].mxu1 }
 0x44b   : > { %v4370_v39 = vadd.f32 %v12354_v33, %v14927_v46  ;;  %v4130_v42 = vpop.f32.mrb[9].mxu1 }
 0x44c   : > { %v14938_v61 = vmax.f32 %v4519_v5, %v4527_v12  ;;  %v4368_v11 = vadd.f32 %v14927_v46, %v4130_v42  ;;  %v12355_v4 = vpop.f32.mrb[10].mxu1 }
 0x44d   : > { %v4402_v52 = vmax.f32 %v4370_v39, 0.0  ;;  %v4371_v3 = vadd.f32 %v12355_v4, %v14927_v46  ;;  %v4133_v21 = vpop.f32.mrb[11].mxu1 }
 0x44e   : > { %4544 = vst [vmem:[#allocation4 + $0x11] sm:$0xff] %v14938_v61  ;;  %v4400_v31 = vmax.f32 %v4368_v11, 0.0  ;;  %v4369_v32 = vadd.f32 %v14927_v46, %v4133_v21 }
 0x44f   : > { %4434 = vst [vmem:[#allocation6 + $0x50] sm:$0xff] %v4402_v52  ;;  %v4403_v47 = vmax.f32 %v4371_v3, 0.0 }
 0x450   : > { %v4490_v55 = vld [vmem:[#allocation6 + $0x30] ss:$2 sm:$0xff]  ;;  %v4506_v60 = vld [vmem:[#allocation6 + $0x31] ss:$2 sm:$0xff]  ;;  %4432 = vst [vmem:[#allocation6 + $0x40] sm:$0xff] %v4400_v31  ;;  %v4401_v45 = vmax.f32 %v4369_v32, 0.0 }
 0x451   : > { %v4528_v43 = vmax.f32 %v4490_v55, %v4506_v60  ;;  %v4458_v27 = vld [vmem:[#allocation6 + $0x20] ss:$2 sm:$0xff]  ;;  %v4474_v1 = vld [vmem:[#allocation6 + $0x21] ss:$2 sm:$0xff]  ;;  %4435 = vst [vmem:[#allocation6 + $0x58] sm:$0xff] %v4403_v47 }
 0x452   : > { %v4520_v8 = vmax.f32 %v4458_v27, %v4474_v1  ;;  %4433 = vst [vmem:[#allocation6 + $0x48] sm:$0xff] %v4401_v45  ;;  %v12358_v19 = vpop.f32.mrb[12].mxu1  ;;  %v13347_v1 = vld [vmem:[#allocation8 + $0x48] sm:$0xff]  }
 0x453   : > { %v4374_v13 = vadd.f32 %v12358_v19, %v14927_v46  ;;  %v4146_v23 = vpop.f32.mrb[13].mxu1 }
 0x454   : > { %v14945_v24 = vmax.f32 %v4520_v8, %v4528_v43  ;;  %v4372_v26 = vadd.f32 %v14927_v46, %v4146_v23  ;;  %v12359_v29 = vpop.f32.mrb[14].mxu1 }
 0x455   : > { %v4406_v30 = vmax.f32 %v4374_v13, 0.0  ;;  %v4375_v36 = vadd.f32 %v12359_v29, %v14927_v46  ;;  %v4149_v0 = vpop.f32.mrb[15].mxu1  ;;  %v14949_v6 = vld [vmem:[#allocation4 + $0x10] sm:$0xff] }
 0x456   : > { %4545 = vst [vmem:[#allocation4 + $0x21] sm:$0xff] %v14945_v24  ;;  %v4404_v22 = vmax.f32 %v4372_v26, 0.0  ;;  %v4373_v18 = vadd.f32 %v14927_v46, %v4149_v0  ;;  %v4560_v53 = vpack.c.bf16 %v14949_v6, %v14889_v40  ;;  %v5207_v15 = vpack.c.bf16 %v14945_v24, %v14938_v61  ;;  %v14968_v17 = vld [vmem:[#allocation4 + $0x12] sm:$0xff] }
 0x457   : > { %4438 = vst [vmem:[#allocation6 + $0x70] sm:$0xff] %v4406_v30  ;;  %v4407_v9 = vmax.f32 %v4375_v36, 0.0 }
 0x458   : > { %v4492_v37 = vld [vmem:[#allocation6 + $0x50] ss:$2 sm:$0xff]  ;;  %v4508_v48 = vld [vmem:[#allocation6 + $0x51] ss:$2 sm:$0xff]  ;;  %4436 = vst [vmem:[#allocation6 + $0x60] sm:$0xff] %v4404_v22  ;;  %v4405_v49 = vmax.f32 %v4373_v18, 0.0  ;;  %12392 = vmatprep.mubr.bf16.mxu0 %v4560_v53 }
 0x459   : > { %v4529_v44 = vmax.f32 %v4492_v37, %v4508_v48  ;;  %v4460_v2 = vld [vmem:[#allocation6 + $0x40] ss:$2 sm:$0xff]  ;;  %v4476_v51 = vld [vmem:[#allocation6 + $0x41] ss:$2 sm:$0xff]  ;;  %4439 = vst [vmem:[#allocation6 + $0x78] sm:$0xff] %v4407_v9  ;;  %v13348_v18 = vld [vmem:[#allocation8 + $0x50] sm:$0xff]  }
 0x45a   : > { %v4521_v34 = vmax.f32 %v4460_v2, %v4476_v51  ;;  %4437 = vst [vmem:[#allocation6 + $0x68] sm:$0xff] %v4405_v49  ;;  %v12362_v41 = vpop.f32.mrb[16].mxu1 }
 0x45b   : > { %v4378_v54 = vadd.f32 %v12362_v41, %v14927_v46  ;;  %v4162_v40 = vpop.f32.mrb[17].mxu1 }
 0x45c   : > { %v14958_v56 = vmax.f32 %v4521_v34, %v4529_v44  ;;  %v4376_v62 = vadd.f32 %v14927_v46, %v4162_v40  ;;  %v12363_v20 = vpop.f32.mrb[18].mxu1  ;;  %v13349_v40 = vld [vmem:[#allocation8 + $0x58] sm:$0xff]  }
 0x45d   : > { %v4410_v25 = vmax.f32 %v4378_v54, 0.0  ;;  %v4379_v57 = vadd.f32 %v12363_v20, %v14927_v46  ;;  %v4165_v58 = vpop.f32.mrb[19].mxu1  ;;  %v14962_v59 = vld [vmem:[#allocation4 + $0x20] sm:$0xff] }
 0x45e   : > { %v14964_v10 = vld [vmem:[#allocation4 + $0x22] sm:$0xff]  ;;  %4546 = vst [vmem:[#allocation4 + $0x31] sm:$0xff] %v14958_v56  ;;  %v4408_v16 = vmax.f32 %v4376_v62, 0.0  ;;  %v4377_v14 = vadd.f32 %v14927_v46, %v4165_v58  ;;  %v5041_v50 = vpack.c.bf16 %v14962_v59, %v14949_v6  ;;  %v13372_v6 = vld [vmem:[#allocation8 + $0x110] sm:$0xff]  }
 0x45f   : > { %4442 = vst [vmem:[#allocation6 + $0x90] sm:$0xff] %v4410_v25  ;;  %v4411_v38 = vmax.f32 %v4379_v57, 0.0  ;;  %v5373_v7 = vpack.c.bf16 %v14964_v10, %v14968_v17 }
 0x460   : > { %v4494_v12 = vld [vmem:[#allocation6 + $0x70] ss:$2 sm:$0xff]  ;;  %v4510_v35 = vld [vmem:[#allocation6 + $0x71] ss:$2 sm:$0xff]  ;;  %4440 = vst [vmem:[#allocation6 + $0x80] sm:$0xff] %v4408_v16  ;;  %v4409_v63 = vmax.f32 %v4377_v14, 0.0 }
 0x461   : > { %v4530_v5 = vmax.f32 %v4494_v12, %v4510_v35  ;;  %v4462_v33 = vld [vmem:[#allocation6 + $0x60] ss:$2 sm:$0xff]  ;;  %v4478_v39 = vld [vmem:[#allocation6 + $0x61] ss:$2 sm:$0xff]  ;;  %4443 = vst [vmem:[#allocation6 + $0x98] sm:$0xff] %v4411_v38 }
 0x462   : > { %v4522_v42 = vmax.f32 %v4462_v33, %v4478_v39  ;;  %4441 = vst [vmem:[#allocation6 + $0x88] sm:$0xff] %v4409_v63  ;;  %v12366_v11 = vpop.f32.mrb[20].mxu1  ;;  %v13350_v33 = vld [vmem:[#allocation8 + $0x60] sm:$0xff]  }
 0x463   : > { %v4382_v4 = vadd.f32 %v12366_v11, %v14927_v46  ;;  %v4178_v52 = vpop.f32.mrb[21].mxu1 }
 0x464   : > { %v14975_v3 = vmax.f32 %v4522_v42, %v4530_v5  ;;  %v4380_v21 = vadd.f32 %v14927_v46, %v4178_v52  ;;  %v12367_v31 = vpop.f32.mrb[22].mxu1 }
 0x465   : > { %v4414_v32 = vmax.f32 %v4382_v4, 0.0  ;;  %v4383_v47 = vadd.f32 %v12367_v31, %v14927_v46  ;;  %v4181_v55 = vpop.f32.mrb[23].mxu1  ;;  %v14979_v60 = vld [vmem:[#allocation4 + $0x30] sm:$0xff] }
 0x466   : > { %4547 = vst [vmem:[#allocation4 + $0x41] sm:$0xff] %v14975_v3  ;;  %v4412_v45 = vmax.f32 %v4380_v21, 0.0  ;;  %v4381_v43 = vadd.f32 %v14927_v46, %v4181_v55  ;;  %v14985_v27 = vpack.c.bf16 %v14979_v60, %v14962_v59  ;;  %v5208_v19 = vpack.c.bf16 %v14975_v3, %v14958_v56  ;;  %v15002_v62 = vld [vmem:[#allocation4 + $0x32] sm:$0xff] }
 0x467   : > { %4446 = vst [vmem:[#allocation6 + $0xb0] sm:$0xff] %v4414_v32  ;;  %v4415_v8 = vmax.f32 %v4383_v47, 0.0 }
 0x468   : > { %v4496_v13 = vld [vmem:[#allocation6 + $0x90] ss:$2 sm:$0xff]  ;;  %v4512_v23 = vld [vmem:[#allocation6 + $0x91] ss:$2 sm:$0xff]  ;;  %4444 = vst [vmem:[#allocation6 + $0xa0] sm:$0xff] %v4412_v45  ;;  %v4413_v26 = vmax.f32 %v4381_v43, 0.0  ;;  %12393 = vmatmul.mubr.bf16.vlgmr.msra.gmra.mrb[32].mxu0 %v14985_v27 }
 0x469   : > { %v4531_v29 = vmax.f32 %v4496_v13, %v4512_v23  ;;  %v4464_v30 = vld [vmem:[#allocation6 + $0x80] ss:$2 sm:$0xff]  ;;  %v4480_v36 = vld [vmem:[#allocation6 + $0x81] ss:$2 sm:$0xff]  ;;  %4447 = vst [vmem:[#allocation6 + $0xb8] sm:$0xff] %v4415_v8  ;;  %12401 = vmatpush3.bf16.msra.mxu0 %v14921_v28 }
 0x46a   : > { %v4523_v0 = vmax.f32 %v4464_v30, %v4480_v36  ;;  %4445 = vst [vmem:[#allocation6 + $0xa8] sm:$0xff] %v4413_v26  ;;  %v12370_v22 = vpop.f32.mrb[24].mxu1  ;;  %12402 = vmatprep.subr.bf16.mxu0 %v13347_v1 }
 0x46b   : > { %v4386_v53 = vadd.f32 %v12370_v22, %v14927_v46  ;;  %v4194_v9 = vpop.f32.mrb[25].mxu1  ;;  %v13352_v22 = vld [vmem:[#allocation8 + $0x70] sm:$0xff]  }
 0x46c   : > { %v14992_v37 = vmax.f32 %v4523_v0, %v4531_v29  ;;  %v4384_v48 = vadd.f32 %v14927_v46, %v4194_v9  ;;  %v12371_v49 = vpop.f32.mrb[26].mxu1 }
 0x46d   : > { %v4418_v44 = vmax.f32 %v4386_v53, 0.0  ;;  %v4387_v2 = vadd.f32 %v12371_v49, %v14927_v46  ;;  %v4197_v51 = vpop.f32.mrb[27].mxu1  ;;  %12403 = vmatpush3.bf16.msra.mxu0 %v13347_v1  ;;  %v14996_v34 = vld [vmem:[#allocation4 + $0x40] sm:$0xff]  ;;  %v13351_v1 = vld [vmem:[#allocation8 + $0x68] sm:$0xff]   ;;  %v13353_v49 = vld [vmem:[#allocation8 + $0x78] sm:$0xff]  }
 0x46e   : > { %v14998_v28 = vld [vmem:[#allocation4 + $0x42] sm:$0xff]  ;;  %4548 = vst [vmem:[#allocation4 + $0x51] sm:$0xff] %v14992_v37  ;;  %v4416_v41 = vmax.f32 %v4384_v48, 0.0  ;;  %v4385_v54 = vadd.f32 %v14927_v46, %v4197_v51  ;;  %12404 = vmatprep.subr.bf16.mxu0 %v13348_v18  ;;  %v5042_v20 = vpack.c.bf16 %v14996_v34, %v14979_v60 }
 0x46f   : > { %4450 = vst [vmem:[#allocation6 + $0xd0] sm:$0xff] %v4418_v44  ;;  %v4419_v25 = vmax.f32 %v4387_v2, 0.0  ;;  %v5374_v57 = vpack.c.bf16 %v14998_v28, %v15002_v62  ;;  %v13374_v60 = vld [vmem:[#allocation8 + $0x120] sm:$0xff]  }
 0x470   : > { %v4498_v58 = vld [vmem:[#allocation6 + $0xb0] ss:$2 sm:$0xff]  ;;  %v4514_v16 = vld [vmem:[#allocation6 + $0xb1] ss:$2 sm:$0xff]  ;;  %4448 = vst [vmem:[#allocation6 + $0xc0] sm:$0xff] %v4416_v41  ;;  %v4417_v14 = vmax.f32 %v4385_v54, 0.0 }
 0x471   : > { %v4532_v38 = vmax.f32 %v4498_v58, %v4514_v16  ;;  %v4466_v12 = vld [vmem:[#allocation6 + $0xa0] ss:$2 sm:$0xff]  ;;  %v4482_v35 = vld [vmem:[#allocation6 + $0xa1] ss:$2 sm:$0xff]  ;;  %4451 = vst [vmem:[#allocation6 + $0xd8] sm:$0xff] %v4419_v25  ;;  %12405 = vmatpush3.bf16.msra.mxu0 %v13348_v18 }
 0x472   : > { %v4524_v63 = vmax.f32 %v4466_v12, %v4482_v35  ;;  %4449 = vst [vmem:[#allocation6 + $0xc8] sm:$0xff] %v4417_v14  ;;  %v12374_v5 = vpop.f32.mrb[28].mxu1  ;;  %12406 = vmatprep.subr.bf16.mxu0 %v13349_v40  ;;  %v13354_v16 = vld [vmem:[#allocation8 + $0x80] sm:$0xff]  }
 0x473   : > { %v4390_v39 = vadd.f32 %v12374_v5, %v14927_v46  ;;  %v4210_v42 = vpop.f32.mrb[29].mxu1 }
 0x474   : > { %v15009_v11 = vmax.f32 %v4524_v63, %v4532_v38  ;;  %v4388_v4 = vadd.f32 %v14927_v46, %v4210_v42  ;;  %v12375_v52 = vpop.f32.mrb[30].mxu1  ;;  %v4701_v38 = vld [vmem:[#allocation4 + $0x1] sm:$0xff]  ;;  %v15054_v42 = vpack.c.bf16 %v14992_v37, %v14975_v3 }
 0x475   : > { %v4422_v21 = vmax.f32 %v4390_v39, 0.0  ;;  %v4391_v31 = vadd.f32 %v12375_v52, %v14927_v46  ;;  %v4213_v32 = vpop.f32.mrb[31].mxu1  ;;  %v15013_v47 = vld [vmem:[#allocation4 + $0x50] sm:$0xff]  ;;  %12407 = vmatpush3.bf16.msra.mxu0 %v13349_v40  ;;  %v4709_v5 = vpack.c.bf16 %v14938_v61, %v4701_v38  ;;  %v13355_v39 = vld [vmem:[#allocation8 + $0x88] sm:$0xff]  }
 0x476   : > { %4549 = vst [vmem:[#allocation4 + $0x61] sm:$0xff] %v15009_v11  ;;  %v4420_v55 = vmax.f32 %v4388_v4, 0.0  ;;  %v4389_v45 = vadd.f32 %v14927_v46, %v4213_v32  ;;  %v15019_v43 = vpack.c.bf16 %v15013_v47, %v14996_v34  ;;  %12408 = vmatprep.subr.bf16.mxu0 %v13350_v33  ;;  %v5209_v13 = vpack.c.bf16 %v15009_v11, %v14992_v37  ;;  %v15028_v9 = vld [vmem:[#allocation4 + $0x52] sm:$0xff]  ;;  %v4867_v52 = vld [vmem:[#allocation4 + $0x2] sm:$0xff] }
 0x477   : > { %4454 = vst [vmem:[#allocation6 + $0xf0] sm:$0xff] %v4422_v21  ;;  %v4423_v8 = vmax.f32 %v4391_v31, 0.0  ;;  %v13356_v4 = vld [vmem:[#allocation8 + $0x90] sm:$0xff]   ;;  %v13357_v31 = vld [vmem:[#allocation8 + $0x98] sm:$0xff]   ;;  %v4875_v32 = vpack.c.bf16 %v14968_v17, %v4867_v52  ;;  %v13375_v34 = vld [vmem:[#allocation8 + $0x128] sm:$0xff]  }
 0x478   : > { %v4500_v23 = vld [vmem:[#allocation6 + $0xd0] ss:$2 sm:$0xff]  ;;  %v4516_v26 = vld [vmem:[#allocation6 + $0xd1] ss:$2 sm:$0xff]  ;;  %4452 = vst [vmem:[#allocation6 + $0xe0] sm:$0xff] %v4420_v55  ;;  %v4421_v29 = vmax.f32 %v4389_v45, 0.0  ;;  %12396 = vmatprep.mubr.bf16.mxu0 %v15019_v43 }
 0x479   : > { %v4533_v30 = vmax.f32 %v4500_v23, %v4516_v26  ;;  %v4468_v36 = vld [vmem:[#allocation6 + $0xc0] ss:$2 sm:$0xff]  ;;  %v4484_v46 = vld [vmem:[#allocation6 + $0xc1] ss:$2 sm:$0xff]  ;;  %4455 = vst [vmem:[#allocation6 + $0xf8] sm:$0xff] %v4423_v8  ;;  %12409 = vmatpush3.bf16.msra.mxu0 %v13350_v33  ;;  %v4710_v33 = vpack.c.bf16 %v14958_v56, %v14945_v24  ;;  %v13361_v8 = vld [vmem:[#allocation8 + $0xb8] sm:$0xff]   ;;  %v15065_v26 = vpack.c.bf16 %v15002_v62, %v14964_v10 }
 0x47a   : > { %v4525_v0 = vmax.f32 %v4468_v36, %v4484_v46  ;;  %4453 = vst [vmem:[#allocation6 + $0xe8] sm:$0xff] %v4421_v29  ;;  %12410 = vmatprep.subr.bf16.mxu0 %v13351_v1  ;;  %v13358_v55 = vld [vmem:[#allocation8 + $0xa0] sm:$0xff]   ;;  %v13359_v45 = vld [vmem:[#allocation8 + $0xa8] sm:$0xff]   ;;  %v13364_v36 = vld [vmem:[#allocation8 + $0xd0] sm:$0xff]  }
 0x47b   : > { %v13362_v23 = vld [vmem:[#allocation8 + $0xc0] sm:$0xff]   ;;  %v13363_v29 = vld [vmem:[#allocation8 + $0xc8] sm:$0xff]   ;;  %v13380_v61 = vld [vmem:[#allocation8 + $0x150] sm:$0xff]  }
 0x47c   : > { %v15024_v18 = vmax.f32 %v4525_v0, %v4533_v30  ;;  %v15069_v30 = vpack.c.bf16 %v15028_v9, %v14998_v28  ;;  %v13381_v24 = vld [vmem:[#allocation8 + $0x158] sm:$0xff]   ;;  %v13383_v3 = vld [vmem:[#allocation8 + $0x168] sm:$0xff]   ;;  %v13388_v10 = vld [vmem:[#allocation8 + $0x190] sm:$0xff]  }
 0x47d   : > { %12411 = vmatpush3.bf16.msra.mxu0 %v13351_v1  ;;  %v15026_v53 = vld [vmem:[#allocation4 + $0x60] sm:$0xff]  ;;  %v13360_v1 = vld [vmem:[#allocation8 + $0xb0] sm:$0xff]   ;;  %v13385_v37 = vld [vmem:[#allocation8 + $0x178] sm:$0xff]  }
 0x47e   : > { %v15030_v48 = vld [vmem:[#allocation4 + $0x62] sm:$0xff]  ;;  %4550 = vst [vmem:[#allocation4 + $0x71] sm:$0xff] %v15024_v18  ;;  %12412 = vmatprep.subr.bf16.mxu0 %v13352_v22  ;;  %v5043_v44 = vpack.c.bf16 %v15026_v53, %v15013_v47  ;;  %v15059_v21 = vpack.c.bf16 %v15024_v18, %v15009_v11  ;;  %v13377_v47 = vld [vmem:[#allocation8 + $0x138] sm:$0xff]   ;;  %v15121_v38 = vld [vmem:[#allocation3] sm:$0xff] }
 0x47f   : > { %v5375_v2 = vpack.c.bf16 %v15030_v48, %v15028_v9  ;;  %v13386_v11 = vld [vmem:[#allocation8 + $0x180] sm:$0xff]   ;;  %v13391_v62 = vld [vmem:[#allocation8 + $0x1a8] sm:$0xff]   ;;  %v13393_v9 = vld [vmem:[#allocation8 + $0x1b8] sm:$0xff]  }
 0x480   : > { %v4502_v51 = vld [vmem:[#allocation6 + $0xf0] ss:$2 sm:$0xff]  ;;  %v4518_v41 = vld [vmem:[#allocation6 + $0xf1] ss:$2 sm:$0xff]  ;;  %v13390_v28 = vld [vmem:[#allocation8 + $0x1a0] sm:$0xff]  }
 0x481   : > { %v4534_v54 = vmax.f32 %v4502_v51, %v4518_v41  ;;  %v4470_v40 = vld [vmem:[#allocation6 + $0xe0] ss:$2 sm:$0xff]  ;;  %v4486_v25 = vld [vmem:[#allocation6 + $0xe1] ss:$2 sm:$0xff]  ;;  %12413 = vmatpush3.bf16.msra.mxu0 %v13352_v22  ;;  %v13365_v22 = vld [vmem:[#allocation8 + $0xd8] sm:$0xff]  }
 0x482   : > { %v4526_v58 = vmax.f32 %v4470_v40, %v4486_v25  ;;  %12414 = vmatprep.subr.bf16.mxu0 %v13353_v49  ;;  %v13367_v51 = vld [vmem:[#allocation8 + $0xe8] sm:$0xff]   ;;  %v13368_v41 = vld [vmem:[#allocation8 + $0xf0] sm:$0xff]   ;;  %v13370_v40 = vld [vmem:[#allocation8 + $0x100] sm:$0xff]  }
 0x483   : > { %v13371_v25 = vld [vmem:[#allocation8 + $0x108] sm:$0xff]   ;;  %v13404_v52 = vld [vmem:[#allocation8 + $0x210] sm:$0xff]  }
 0x484   : > { %v15037_v14 = vmax.f32 %v4526_v58, %v4534_v54  ;;  %v13369_v54 = vld [vmem:[#allocation8 + $0xf8] sm:$0xff]  }
 0x485   : > { %v15039_v12 = vld [vmem:[#allocation4 + $0x70] sm:$0xff]  ;;  %12415 = vmatpush3.bf16.msra.mxu0 %v13353_v49  ;;  %v13366_v49 = vld [vmem:[#allocation8 + $0xe0] sm:$0xff]   ;;  %v13373_v58 = vld [vmem:[#allocation8 + $0x118] sm:$0xff]  }
 0x486   : > { %4551 = vst [vmem:[#allocation4 + $0x81] sm:$0xff] %v15037_v14  ;;  %v15044_v35 = vpack.c.bf16 %v15039_v12, %v15026_v53  ;;  %12424 = vmatprep.subr.bf16.mxu0 %v13354_v16  ;;  %v5210_v63 = vpack.c.bf16 %v15037_v14, %v15024_v18  ;;  %v15073_v46 = vld [vmem:[#allocation4 + $0x72] sm:$0xff]  ;;  %v13378_v53 = vld [vmem:[#allocation8 + $0x140] sm:$0xff]  }
 0x487   : > { %v15077_v0 = vpack.c.bf16 %v15073_v46, %v15030_v48  ;;  %v13389_v18 = vld [vmem:[#allocation8 + $0x198] sm:$0xff]   ;;  %v13394_v48 = vld [vmem:[#allocation8 + $0x1c0] sm:$0xff]  }
 0x488   : > { %12397 = vmatmul.mubr.bf16.gmra.mrb[36].mxu0 %v15044_v35 }
 0x489   : > { %12416 = vmatprep.mubr.bf16.mxu0 %v4709_v5 }
 0x48d   : > { %v15089_v59 = vld [vmem:[#allocation4 + $0x80] sm:$0xff] }
 0x48e   : > { %v15114_v17 = vld [vmem:[#allocation4 + $0x82] sm:$0xff] }
 0x490   : > { %12417 = vmatmul.mubr.bf16.vlgmr.msra.gmra.mrb[32].mxu0 %v4710_v33  ;;  %v13400_v33 = vld [vmem:[#allocation8 + $0x1f0] sm:$0xff]  }
 0x491   : > { %12425 = vmatpush3.bf16.msra.mxu0 %v13354_v16  ;;  %12420 = vmatprep.mubr.bf16.mxu0 %v15054_v42  ;;  %v5698_v16 = vld [vmem:[#allocation4 + $0x21] sm:$0xff] }
 0x492   : > { %12426 = vmatprep.subr.bf16.mxu0 %v13355_v39  ;;  %v5706_v5 = vpack.c.bf16 %v14958_v56, %v5698_v16  ;;  %v13403_v56 = vld [vmem:[#allocation8 + $0x208] sm:$0xff]  }
 0x495   : > { %12427 = vmatpush3.bf16.msra.mxu0 %v13355_v39  ;;  %v13401_v39 = vld [vmem:[#allocation8 + $0x1f8] sm:$0xff]  }
 0x496   : > { %12428 = vmatprep.subr.bf16.mxu0 %v13356_v4 }
 0x498   : > { %12421 = vmatmul.mubr.bf16.gmra.mrb[36].mxu0 %v15059_v21 }
 0x499   : > { %12429 = vmatpush3.bf16.msra.mxu0 %v13356_v4  ;;  %12440 = vmatprep.mubr.bf16.mxu0 %v4875_v32  ;;  %v13402_v4 = vld [vmem:[#allocation8 + $0x200] sm:$0xff]  }
 0x49a   : > { %12430 = vmatprep.subr.bf16.mxu0 %v13357_v31 }
 0x49d   : > { %12431 = vmatpush3.bf16.msra.mxu0 %v13357_v31  ;;  %v5705_v31 = vld [vmem:[#allocation4 + $0x91] sm:$0xff] }
 0x49e   : > { %12432 = vmatprep.subr.bf16.mxu0 %v13358_v55  ;;  %v5709_v32 = vpack.c.bf16 %v5705_v31, %v15037_v14  ;;  %v13410_v14 = vld [vmem:[#allocation10] sm:$0xff]  }
 0x4a1   : > { %12433 = vmatpush3.bf16.msra.mxu0 %v13358_v55  ;;  %v13405_v55 = vld [vmem:[#allocation8 + $0x218] sm:$0xff]  }
 0x4a2   : > { %12434 = vmatprep.subr.bf16.mxu0 %v13359_v45 }
 0x4a5   : > { %12435 = vmatpush3.bf16.msra.mxu0 %v13359_v45  ;;  %v13406_v45 = vld [vmem:[#allocation8 + $0x220] sm:$0xff]  }
 0x4a6   : > { %12436 = vmatprep.subr.bf16.mxu0 %v13360_v1 }
 0x4a9   : > { %12437 = vmatpush3.bf16.msra.mxu0 %v13360_v1  ;;  %v13409_v1 = vld [vmem:[#allocation8 + $0x238] sm:$0xff]  }
 0x4aa   : > { %12438 = vmatprep.subr.bf16.mxu0 %v13361_v8 }
 0x4ad   : > { %12439 = vmatpush3.bf16.msra.mxu0 %v13361_v8  ;;  %v13411_v8 = vld [vmem:[#allocation10 + $0x8] sm:$0xff]  }
 0x4ae   : > { %12448 = vmatprep.subr.bf16.mxu0 %v13362_v23 }
 0x4b0   : > { %12441 = vmatmul.mubr.bf16.vlgmr.msra.gmra.mrb[32].mxu0 %v15065_v26 }
 0x4b1   : > { %12444 = vmatprep.mubr.bf16.mxu0 %v15069_v30  ;;  %12449 = vmatpush3.bf16.msra.mxu0 %v13362_v23  ;;  %v13412_v23 = vld [vmem:[#allocation10 + $0x10] sm:$0xff]  }
 0x4b2   : > { %12450 = vmatprep.subr.bf16.mxu0 %v13363_v29 }
 0x4b5   : > { %12451 = vmatpush3.bf16.msra.mxu0 %v13363_v29 }
 0x4b6   : > { %12452 = vmatprep.subr.bf16.mxu0 %v13364_v36 }
 0x4b8   : > { %12445 = vmatmul.mubr.bf16.gmra.mrb[36].mxu0 %v15077_v0 }
 0x4b9   : > { %12453 = vmatpush3.bf16.msra.mxu0 %v13364_v36  ;;  %12464 = vmatprep.mubr.bf16.mxu0 %v5041_v50  ;;  %v5044_v50 = vpack.c.bf16 %v15089_v59, %v15039_v12  ;;  %v5543_v12 = vpack.c.bf16 %v15121_v38, %v15089_v59  ;;  %v13413_v36 = vld [vmem:[#allocation10 + $0x18] sm:$0xff]  }
 0x4ba   : > { %12454 = vmatprep.subr.bf16.mxu0 %v13365_v22 }
 0x4bd   : > { %12455 = vmatpush3.bf16.msra.mxu0 %v13365_v22  ;;  %v13415_v22 = vld [vmem:[#allocation10 + $0x28] sm:$0xff]  }
 0x4be   : > { %12456 = vmatprep.subr.bf16.mxu0 %v13366_v49 }
 0x4c1   : > { %12457 = vmatpush3.bf16.msra.mxu0 %v13366_v49  ;;  %v13418_v49 = vld [vmem:[#allocation10 + $0x40] sm:$0xff]  }
 0x4c2   : > { %12458 = vmatprep.subr.bf16.mxu0 %v13367_v51 }
 0x4c5   : > { %12459 = vmatpush3.bf16.msra.mxu0 %v13367_v51  ;;  %v11058_v51 = vld [vmem:[%s15516_s6] ss:$0 sm:$0xff] }
 0x4c6   : > { %12460 = vmatprep.subr.bf16.mxu0 %v13368_v41 }
 0x4c9   : > { %12461 = vmatpush3.bf16.msra.mxu0 %v13368_v41 }
 0x4ca   : > { %12462 = vmatprep.subr.bf16.mxu0 %v13369_v54 }
 0x4cd   : > { %12463 = vmatpush3.bf16.msra.mxu0 %v13369_v54 }
 0x4ce   : > { %12472 = vmatprep.subr.bf16.mxu0 %v13370_v40 }
 0x4d0   : > { %12465 = vmatmul.mubr.bf16.vlgmr.msra.gmra.mrb[32].mxu0 %v5042_v20  ;;  %v13376_v20 = vld [vmem:[#allocation8 + $0x130] sm:$0xff]  }
 0x4d1   : > { %12468 = vmatprep.mubr.bf16.mxu0 %v5043_v44  ;;  %12473 = vmatpush3.bf16.msra.mxu0 %v13370_v40  ;;  %v13379_v44 = vld [vmem:[#allocation8 + $0x148] sm:$0xff]  }
 0x4d2   : > { %12474 = vmatprep.subr.bf16.mxu0 %v13371_v25 }
 0x4d5   : > { %12475 = vmatpush3.bf16.msra.mxu0 %v13371_v25 }
 0x4d6   : > { %12476 = vmatprep.subr.bf16.mxu0 %v13372_v6 }
 0x4d8   : > { %12469 = vmatmul.mubr.bf16.gmra.mrb[36].mxu0 %v5044_v50 }
 0x4d9   : > { %12477 = vmatpush3.bf16.msra.mxu0 %v13372_v6  ;;  %12488 = vmatprep.mubr.bf16.mxu0 %v5207_v15  ;;  %v13382_v15 = vld [vmem:[#allocation8 + $0x160] sm:$0xff]  }
 0x4da   : > { %12478 = vmatprep.subr.bf16.mxu0 %v13373_v58 }
 0x4dd   : > { %12479 = vmatpush3.bf16.msra.mxu0 %v13373_v58 }
 0x4de   : > { %12480 = vmatprep.subr.bf16.mxu0 %v13374_v60 }
 0x4e1   : > { %12481 = vmatpush3.bf16.msra.mxu0 %v13374_v60 }
 0x4e2   : > { %12482 = vmatprep.subr.bf16.mxu0 %v13375_v34 }
 0x4e5   : > { %12483 = vmatpush3.bf16.msra.mxu0 %v13375_v34 }
 0x4e6   : > { %12484 = vmatprep.subr.bf16.mxu0 %v13376_v20 }
 0x4e9   : > { %12485 = vmatpush3.bf16.msra.mxu0 %v13376_v20 }
 0x4ea   : > { %12486 = vmatprep.subr.bf16.mxu0 %v13377_v47 }
 0x4ed   : > { %12487 = vmatpush3.bf16.msra.mxu0 %v13377_v47 }
 0x4ee   : > { %12496 = vmatprep.subr.bf16.mxu0 %v13378_v53 }
 0x4f0   : > { %12489 = vmatmul.mubr.bf16.vlgmr.msra.gmra.mrb[32].mxu0 %v5208_v19  ;;  %v13384_v19 = vld [vmem:[#allocation8 + $0x170] sm:$0xff]  }
 0x4f1   : > { %12492 = vmatprep.mubr.bf16.mxu0 %v5209_v13  ;;  %12497 = vmatpush3.bf16.msra.mxu0 %v13378_v53  ;;  %v13387_v13 = vld [vmem:[#allocation8 + $0x188] sm:$0xff]  }
 0x4f2   : > { %12498 = vmatprep.subr.bf16.mxu0 %v13379_v44 }
 0x4f5   : > { %12499 = vmatpush3.bf16.msra.mxu0 %v13379_v44 }
 0x4f6   : > { %12500 = vmatprep.subr.bf16.mxu0 %v13380_v61 }
 0x4f8   : > { %12493 = vmatmul.mubr.bf16.gmra.mrb[36].mxu0 %v5210_v63  ;;  %v13397_v63 = vld [vmem:[#allocation8 + $0x1d8] sm:$0xff]  }
 0x4f9   : > { %12501 = vmatpush3.bf16.msra.mxu0 %v13380_v61  ;;  %12512 = vmatprep.mubr.bf16.mxu0 %v5373_v7  ;;  %v5376_v7 = vpack.c.bf16 %v15114_v17, %v15073_v46  ;;  %v13414_v46 = vld [vmem:[#allocation10 + $0x20] sm:$0xff]  }
 0x4fa   : > { %12502 = vmatprep.subr.bf16.mxu0 %v13381_v24 }
 0x4fd   : > { %12503 = vmatpush3.bf16.msra.mxu0 %v13381_v24 }
 0x4fe   : > { %12504 = vmatprep.subr.bf16.mxu0 %v13382_v15 }
 0x501   : > { %12505 = vmatpush3.bf16.msra.mxu0 %v13382_v15 }
 0x502   : > { %12506 = vmatprep.subr.bf16.mxu0 %v13383_v3 }
 0x505   : > { %12507 = vmatpush3.bf16.msra.mxu0 %v13383_v3 }
 0x506   : > { %12508 = vmatprep.subr.bf16.mxu0 %v13384_v19 }
 0x509   : > { %12509 = vmatpush3.bf16.msra.mxu0 %v13384_v19 }
 0x50a   : > { %12510 = vmatprep.subr.bf16.mxu0 %v13385_v37 }
 0x50d   : > { %12511 = vmatpush3.bf16.msra.mxu0 %v13385_v37 }
 0x50e   : > { %12520 = vmatprep.subr.bf16.mxu0 %v13386_v11 }
 0x510   : > { %12513 = vmatmul.mubr.bf16.vlgmr.msra.gmra.mrb[32].mxu0 %v5374_v57  ;;  %v13392_v57 = vld [vmem:[#allocation8 + $0x1b0] sm:$0xff]  }
 0x511   : > { %12516 = vmatprep.mubr.bf16.mxu0 %v5375_v2  ;;  %12521 = vmatpush3.bf16.msra.mxu0 %v13386_v11  ;;  %v13395_v2 = vld [vmem:[#allocation8 + $0x1c8] sm:$0xff]  }
 0x512   : > { %12522 = vmatprep.subr.bf16.mxu0 %v13387_v13 }
 0x515   : > { %12523 = vmatpush3.bf16.msra.mxu0 %v13387_v13 }
 0x516   : > { %12524 = vmatprep.subr.bf16.mxu0 %v13388_v10 }
 0x518   : > { %12517 = vmatmul.mubr.bf16.gmra.mrb[36].mxu0 %v5376_v7 }
 0x519   : > { %12525 = vmatpush3.bf16.msra.mxu0 %v13388_v10  ;;  %12536 = vmatprep.mubr.bf16.mxu0 %v14985_v27  ;;  %v13396_v27 = vld [vmem:[#allocation8 + $0x1d0] sm:$0xff]  }
 0x51a   : > { %12526 = vmatprep.subr.bf16.mxu0 %v13389_v18 }
 0x51d   : > { %12527 = vmatpush3.bf16.msra.mxu0 %v13389_v18 }
 0x51e   : > { %12528 = vmatprep.subr.bf16.mxu0 %v13390_v28 }
 0x521   : > { %12529 = vmatpush3.bf16.msra.mxu0 %v13390_v28 }
 0x522   : > { %12530 = vmatprep.subr.bf16.mxu0 %v13391_v62 }
 0x525   : > { %12531 = vmatpush3.bf16.msra.mxu0 %v13391_v62 }
 0x526   : > { %12532 = vmatprep.subr.bf16.mxu0 %v13392_v57 }
 0x529   : > { %12533 = vmatpush3.bf16.msra.mxu0 %v13392_v57 }
 0x52a   : > { %12534 = vmatprep.subr.bf16.mxu0 %v13393_v9 }
 0x52d   : > { %12535 = vmatpush3.bf16.msra.mxu0 %v13393_v9 }
 0x52e   : > { %12544 = vmatprep.subr.bf16.mxu0 %v13394_v48 }
 0x530   : > { %12537 = vmatmul.mubr.bf16.vlgmr.msra.gmra.mrb[32].mxu0 %v15019_v43  ;;  %v13398_v43 = vld [vmem:[#allocation8 + $0x1e0] sm:$0xff]  }
 0x531   : > { %12540 = vmatprep.mubr.bf16.mxu0 %v15044_v35  ;;  %12545 = vmatpush3.bf16.msra.mxu0 %v13394_v48  ;;  %v13399_v35 = vld [vmem:[#allocation8 + $0x1e8] sm:$0xff]  }
 0x532   : > { %12546 = vmatprep.subr.bf16.mxu0 %v13395_v2 }
 0x535   : > { %12547 = vmatpush3.bf16.msra.mxu0 %v13395_v2 }
 0x536   : > { %12548 = vmatprep.subr.bf16.mxu0 %v13396_v27 }
 0x538   : > { %12541 = vmatmul.mubr.bf16.gmra.mrb[36].mxu0 %v5543_v12 }
 0x539   : > { %12549 = vmatpush3.bf16.msra.mxu0 %v13396_v27  ;;  %12560 = vmatprep.mubr.bf16.mxu0 %v5706_v5 }
 0x53a   : > { %12550 = vmatprep.subr.bf16.mxu0 %v13397_v63 }
 0x53d   : > { %12551 = vmatpush3.bf16.msra.mxu0 %v13397_v63 }
 0x53e   : > { %12552 = vmatprep.subr.bf16.mxu0 %v13398_v43 }
 0x541   : > { %12553 = vmatpush3.bf16.msra.mxu0 %v13398_v43 }
 0x542   : > { %12554 = vmatprep.subr.bf16.mxu0 %v13399_v35 }
 0x545   : > { %12555 = vmatpush3.bf16.msra.mxu0 %v13399_v35 }
 0x546   : > { %12556 = vmatprep.subr.bf16.mxu0 %v13400_v33 }
 0x549   : > { %12557 = vmatpush3.bf16.msra.mxu0 %v13400_v33 }
 0x54a   : > { %12558 = vmatprep.subr.bf16.mxu0 %v13401_v39 }
 0x54d   : > { %12559 = vmatpush3.bf16.msra.mxu0 %v13401_v39  ;;  %v13419_v39 = vld [vmem:[#allocation10 + $0x48] sm:$0xff]  }
 0x54e   : > { %12568 = vmatprep.subr.bf16.mxu0 %v13402_v4 }
 0x550   : > { %12561 = vmatmul.mubr.bf16.vlgmr.msra.gmra.mrb[32].mxu0 %v15054_v42  ;;  %v13407_v42 = vld [vmem:[#allocation8 + $0x228] sm:$0xff]  }
 0x551   : > { %12564 = vmatprep.mubr.bf16.mxu0 %v15059_v21  ;;  %12569 = vmatpush3.bf16.msra.mxu0 %v13402_v4  ;;  %v13408_v21 = vld [vmem:[#allocation8 + $0x230] sm:$0xff]  }
 0x552   : > { %12570 = vmatprep.subr.bf16.mxu0 %v13403_v56 }
 0x555   : > { %12571 = vmatpush3.bf16.msra.mxu0 %v13403_v56 }
 0x556   : > { %12572 = vmatprep.subr.bf16.mxu0 %v13404_v52 }
 0x558   : > { %12565 = vmatmul.mubr.bf16.gmra.mrb[36].mxu0 %v5709_v32 }
 0x559   : > { %12573 = vmatpush3.bf16.msra.mxu0 %v13404_v52  ;;  %12584 = vmatprep.mubr.bf16.mxu0 %v15065_v26  ;;  %v5871_v26 = vld [vmem:[#allocation4 + $0x92] sm:$0xff] }
 0x55a   : > { %12574 = vmatprep.subr.bf16.mxu0 %v13405_v55  ;;  %v5875_v29 = vpack.c.bf16 %v5871_v26, %v15114_v17  ;;  %v13421_v26 = vld [vmem:[#allocation10 + $0x58] sm:$0xff]  }
 0x55d   : > { %12575 = vmatpush3.bf16.msra.mxu0 %v13405_v55  ;;  %v13420_v55 = vld [vmem:[#allocation10 + $0x50] sm:$0xff]  }
 0x55e   : > { %12576 = vmatprep.subr.bf16.mxu0 %v13406_v45 }
 0x561   : > { %12577 = vmatpush3.bf16.msra.mxu0 %v13406_v45 }
 0x562   : > { %12578 = vmatprep.subr.bf16.mxu0 %v13407_v42 }
 0x565   : > { %12579 = vmatpush3.bf16.msra.mxu0 %v13407_v42 }
 0x566   : > { %12580 = vmatprep.subr.bf16.mxu0 %v13408_v21 }
 0x569   : > { %12581 = vmatpush3.bf16.msra.mxu0 %v13408_v21  ;;  %v6219_v21 = vld [vmem:[#allocation5 + $0x1] sm:$0xff] }
 0x56a   : > { %12582 = vmatprep.subr.bf16.mxu0 %v13409_v1 }
 0x56d   : > { %12583 = vmatpush3.bf16.msra.mxu0 %v13409_v1 }
 0x56e   : > { %12592 = vmatprep.subr.bf16.mxu0 %v13410_v14 }
 0x570   : > { %12585 = vmatmul.mubr.bf16.vlgmr.msra.gmra.mrb[32].mxu0 %v15069_v30  ;;  %v13416_v30 = vld [vmem:[#allocation10 + $0x30] sm:$0xff]  }
 0x571   : > { %12588 = vmatprep.mubr.bf16.mxu0 %v15077_v0  ;;  %12593 = vmatpush3.bf16.msra.mxu0 %v13410_v14  ;;  %v13417_v0 = vld [vmem:[#allocation10 + $0x38] sm:$0xff]  }
 0x572   : > { %12594 = vmatprep.subr.bf16.mxu0 %v13411_v8 }
 0x575   : > { %12595 = vmatpush3.bf16.msra.mxu0 %v13411_v8 }
 0x576   : > { %12596 = vmatprep.subr.bf16.mxu0 %v13412_v23 }
 0x578   : > { %12589 = vmatmul.mubr.bf16.gmra.mrb[36].mxu0 %v5875_v29 }
 0x579   : > { %12597 = vmatpush3.bf16.msra.mxu0 %v13412_v23 }
 0x57a   : > { %12598 = vmatprep.subr.bf16.mxu0 %v13413_v36 }
 0x57d   : > { %12599 = vmatpush3.bf16.msra.mxu0 %v13413_v36 }
 0x57e   : > { %12600 = vmatprep.subr.bf16.mxu0 %v13414_v46 }
 0x581   : > { %12601 = vmatpush3.bf16.msra.mxu0 %v13414_v46 }
 0x582   : > { %12602 = vmatprep.subr.bf16.mxu0 %v13415_v22 }
 0x585   : > { %12603 = vmatpush3.bf16.msra.mxu0 %v13415_v22 }
 0x586   : > { %12604 = vmatprep.subr.bf16.mxu0 %v13416_v30 }
 0x589   : > { %12605 = vmatpush3.bf16.msra.mxu0 %v13416_v30  ;;  %v13422_v30 = vld [vmem:[#allocation10 + $0x60] sm:$0xff]  }
 0x58a   : > { %12606 = vmatprep.subr.bf16.mxu0 %v13417_v0 }
 0x58d   : > { %12607 = vmatpush3.bf16.msra.mxu0 %v13417_v0  ;;  %v13423_v0 = vld [vmem:[#allocation10 + $0x68] sm:$0xff]  }
 0x58e   : > { %12616 = vmatprep.subr.bf16.mxu0 %v13418_v49 }
 0x643   : > { %v12586_v41 = vpop.f32.mrb[32].mxu0 }
 0x644   : > { %v6047_v54 = vadd.f32 %v12586_v41, %v11058_v51  ;;  %v5975_v40 = vpop.f32.mrb[33].mxu0  ;;  %v13426_v41 = vld [vmem:[#allocation10 + $0x80] sm:$0xff]  }
 0x645   : > { %v6045_v25 = vadd.f32 %v11058_v51, %v5975_v40  ;;  %v12587_v6 = vpop.f32.mrb[34].mxu0  ;;  %v13428_v40 = vld [vmem:[#allocation10 + $0x90] sm:$0xff]  }
 0x646   : > { %v15136_v59 = vmax.f32 %v6047_v54, 0.0  ;;  %v6048_v50 = vadd.f32 %v12587_v6, %v11058_v51  ;;  %v5978_v58 = vpop.f32.mrb[35].mxu0  ;;  %v13427_v54 = vld [vmem:[#allocation10 + $0x88] sm:$0xff]   ;;  %v13429_v6 = vld [vmem:[#allocation10 + $0x98] sm:$0xff]  }
 0x647   : > { %v15138_v60 = vmax.f32 %v6045_v25, 0.0  ;;  %v6046_v34 = vadd.f32 %v11058_v51, %v5978_v58  ;;  %v6385_v25 = vld [vmem:[#allocation5 + $0x2] sm:$0xff] }
 0x648   : > { %6064 = vst [vmem:[#allocation5 + $0x31] sm:$0xff] %v15136_v59  ;;  %v15141_v20 = vmax.f32 %v6048_v50, 0.0  ;;  %v13430_v58 = vld [vmem:[#allocation10 + $0xa0] sm:$0xff]  }
 0x649   : > { %6062 = vst [vmem:[#allocation5 + $0x11] sm:$0xff] %v15138_v60  ;;  %v15144_v47 = vmax.f32 %v6046_v34, 0.0  ;;  %v6227_v46 = vpack.c.bf16 %v15138_v60, %v6219_v21  ;;  %v13431_v34 = vld [vmem:[#allocation10 + $0xa8] sm:$0xff]  }
 0x64a   : > { %6065 = vst [vmem:[#allocation5 + $0x41] sm:$0xff] %v15141_v20  ;;  %v6726_v53 = vpack.c.bf16 %v15141_v20, %v15136_v59  ;;  %v13439_v21 = vld [vmem:[#allocation10 + $0xe8] sm:$0xff]  }
 0x64b   : > { %6063 = vst [vmem:[#allocation5 + $0x21] sm:$0xff] %v15144_v47  ;;  %v12590_v44 = vpop.f32.mrb[36].mxu0  ;;  %v15152_v61 = vpack.c.bf16 %v15136_v59, %v15144_v47  ;;  %v6725_v24 = vpack.c.bf16 %v15144_v47, %v15138_v60  ;;  %v13452_v60 = vld [vmem:[#allocation10 + $0x150] sm:$0xff]   ;;  %v13453_v47 = vld [vmem:[#allocation10 + $0x158] sm:$0xff]  }
 0x64c   : > { %v6051_v15 = vadd.f32 %v12590_v44, %v11058_v51  ;;  %v5991_v3 = vpop.f32.mrb[37].mxu0  ;;  %v13432_v44 = vld [vmem:[#allocation10 + $0xb0] sm:$0xff]  }
 0x64d   : > { %v6049_v19 = vadd.f32 %v11058_v51, %v5991_v3  ;;  %v12591_v37 = vpop.f32.mrb[38].mxu0  ;;  %v13434_v3 = vld [vmem:[#allocation10 + $0xc0] sm:$0xff]   ;;  %v13487_v59 = vld [vmem:[#allocation12 + $0x14] ss:$8 sps:$4 sm:$0xff]  }
 0x64e   : > { %v15156_v11 = vmax.f32 %v6051_v15, 0.0  ;;  %v6052_v13 = vadd.f32 %v12591_v37, %v11058_v51  ;;  %v5994_v10 = vpop.f32.mrb[39].mxu0  ;;  %v13433_v15 = vld [vmem:[#allocation10 + $0xb8] sm:$0xff]   ;;  %v13435_v37 = vld [vmem:[#allocation10 + $0xc8] sm:$0xff]  }
 0x64f   : > { %v15158_v17 = vmax.f32 %v6049_v19, 0.0  ;;  %v6050_v7 = vadd.f32 %v11058_v51, %v5994_v10  ;;  %v15165_v62 = vld [vmem:[#allocation5 + $0x30] sm:$0xff]  ;;  %v13425_v51 = vld [vmem:[#allocation10 + $0x78] sm:$0xff]  }
 0x650   : > { %6068 = vst [vmem:[#allocation5 + $0x71] sm:$0xff] %v15156_v11  ;;  %v15161_v18 = vmax.f32 %v6052_v13, 0.0  ;;  %v15163_v28 = vld [vmem:[#allocation5 + $0x10] sm:$0xff] }
 0x651   : > { %6066 = vst [vmem:[#allocation5 + $0x51] sm:$0xff] %v15158_v17  ;;  %v15168_v57 = vmax.f32 %v6050_v7, 0.0  ;;  %v6078_v9 = vpack.c.bf16 %v15163_v28, %v15121_v38  ;;  %v15172_v48 = vld [vmem:[#allocation5 + $0x40] sm:$0xff]  ;;  %v15176_v2 = vpack.c.bf16 %v15158_v17, %v15141_v20  ;;  %v15178_v27 = vld [vmem:[#allocation5 + $0x32] sm:$0xff] }
 0x652   : > { %v15180_v16 = vld [vmem:[#allocation5 + $0x42] sm:$0xff]  ;;  %6069 = vst [vmem:[#allocation5 + $0x81] sm:$0xff] %v15161_v18  ;;  %v6560_v5 = vpack.c.bf16 %v15172_v48, %v15165_v62  ;;  %v6728_v43 = vpack.c.bf16 %v15161_v18, %v15156_v11  ;;  %v15202_v56 = vld [vmem:[#allocation5 + $0x12] sm:$0xff] }
 0x653   : > { %v15183_v12 = vld [vmem:[#allocation5 + $0x20] sm:$0xff]  ;;  %v6892_v35 = vpack.c.bf16 %v15180_v16, %v15178_v27  ;;  %6067 = vst [vmem:[#allocation5 + $0x61] sm:$0xff] %v15168_v57  ;;  %12608 = vmatprep.mubr.bf16.mxu0 %v6078_v9  ;;  %v15200_v4 = vpack.c.bf16 %v15156_v11, %v15168_v57  ;;  %v6727_v31 = vpack.c.bf16 %v15168_v57, %v15158_v17  ;;  %v13436_v10 = vld [vmem:[#allocation10 + $0xd0] sm:$0xff]   ;;  %v13455_v57 = vld [vmem:[#allocation10 + $0x168] sm:$0xff]  }
 0x654   : > { %v15185_v63 = vld [vmem:[#allocation5 + $0x22] sm:$0xff]  ;;  %v15196_v33 = vpack.c.bf16 %v15165_v62, %v15183_v12  ;;  %v6559_v52 = vpack.c.bf16 %v15183_v12, %v15163_v28  ;;  %v6393_v50 = vpack.c.bf16 %v15202_v56, %v6385_v25  ;;  %v13444_v28 = vld [vmem:[#allocation10 + $0x110] sm:$0xff]  }
 0x655   : > { %v6891_v32 = vpack.c.bf16 %v15185_v63, %v15202_v56  ;;  %v15242_v19 = vpack.c.bf16 %v15178_v27, %v15185_v63  ;;  %v13446_v62 = vld [vmem:[#allocation10 + $0x120] sm:$0xff]   ;;  %v13491_v63 = vld [vmem:[#allocation12 + $0x30] ss:$8 sps:$4 sm:$0xff]   ;;  %v13459_v25 = vld [vmem:[#allocation10 + $0x188] sm:$0xff]  }
 0x656   : > { %12609 = vmatmul.mubr.bf16.vlgmr.msra.gmra.mrb[40].mxu0 %v15196_v33  ;;  %v13454_v20 = vld [vmem:[#allocation10 + $0x160] sm:$0xff]  }
 0x657   : > { %12617 = vmatpush3.bf16.msra.mxu0 %v13418_v49  ;;  %v15219_v14 = vld [vmem:[#allocation5 + $0x70] sm:$0xff]  ;;  %v13490_v17 = vld [vmem:[#allocation12 + $0x24] ss:$8 sps:$4 sm:$0xff]   ;;  %v13488_v11 = vld [vmem:[#allocation12 + $0x20] ss:$8 sps:$4 sm:$0xff]  }
 0x658   : > { %12618 = vmatprep.subr.bf16.mxu0 %v13419_v39  ;;  %v15211_v45 = vld [vmem:[#allocation5 + $0x50] sm:$0xff]  ;;  %v13496_v56 = vld [vmem:[#allocation12 + $0x44] ss:$8 sps:$4 sm:$0xff]  }
 0x659   : > { %v15215_v42 = vpack.c.bf16 %v15211_v45, %v15172_v48  ;;  %v15228_v29 = vld [vmem:[#allocation5 + $0x52] sm:$0xff]  ;;  %v15266_v12 = vld [vmem:[#allocation5 + $0x80] sm:$0xff]  ;;  %v13447_v48 = vld [vmem:[#allocation10 + $0x128] sm:$0xff]  }
 0x65a   : > { %v15217_v1 = vld [vmem:[#allocation5 + $0x60] sm:$0xff]  ;;  %v13424_v49 = vld [vmem:[#allocation10 + $0x70] sm:$0xff]   ;;  %v15246_v13 = vpack.c.bf16 %v15228_v29, %v15180_v16  ;;  %v13463_v16 = vld [vmem:[#allocation10 + $0x1a8] sm:$0xff]  }
 0x65b   : > { %12619 = vmatpush3.bf16.msra.mxu0 %v13419_v39  ;;  %v15221_v8 = vld [vmem:[#allocation5 + $0x62] sm:$0xff]  ;;  %12612 = vmatprep.mubr.bf16.mxu0 %v15215_v42  ;;  %v15226_v23 = vpack.c.bf16 %v15219_v14, %v15217_v1  ;;  %v6561_v36 = vpack.c.bf16 %v15217_v1, %v15211_v45  ;;  %v15250_v7 = vld [vmem:[#allocation5 + $0x72] sm:$0xff] }
 0x65c   : > { %12620 = vmatprep.subr.bf16.mxu0 %v13420_v55  ;;  %v6893_v22 = vpack.c.bf16 %v15221_v8, %v15228_v29  ;;  %v15254_v9 = vpack.c.bf16 %v15250_v7, %v15221_v8  ;;  %v13437_v39 = vld [vmem:[#allocation10 + $0xd8] sm:$0xff]   ;;  %v13450_v1 = vld [vmem:[#allocation10 + $0x140] sm:$0xff]  }
 0x65d   : > { %v13449_v45 = vld [vmem:[#allocation10 + $0x138] sm:$0xff]   ;;  %v13462_v27 = vld [vmem:[#allocation10 + $0x1a0] sm:$0xff]  }
 0x65e   : > { %12613 = vmatmul.mubr.bf16.gmra.mrb[44].mxu0 %v15226_v23  ;;  %v13465_v8 = vld [vmem:[#allocation10 + $0x1b8] sm:$0xff]   ;;  %v13466_v29 = vld [vmem:[#allocation10 + $0x1c0] sm:$0xff]  }
 0x65f   : > { %12621 = vmatpush3.bf16.msra.mxu0 %v13420_v55  ;;  %12632 = vmatprep.mubr.bf16.mxu0 %v6227_v46  ;;  %v13438_v55 = vld [vmem:[#allocation10 + $0xe0] sm:$0xff]   ;;  %v13441_v46 = vld [vmem:[#allocation10 + $0xf8] sm:$0xff]  }
 0x660   : > { %12622 = vmatprep.subr.bf16.mxu0 %v13421_v26 }
 0x663   : > { %12623 = vmatpush3.bf16.msra.mxu0 %v13421_v26  ;;  %v13440_v26 = vld [vmem:[#allocation10 + $0xf0] sm:$0xff]  }
 0x664   : > { %12624 = vmatprep.subr.bf16.mxu0 %v13422_v30 }
 0x667   : > { %12625 = vmatpush3.bf16.msra.mxu0 %v13422_v30  ;;  %v13442_v30 = vld [vmem:[#allocation10 + $0x100] sm:$0xff]  }
 0x668   : > { %12626 = vmatprep.subr.bf16.mxu0 %v13423_v0 }
 0x66b   : > { %12627 = vmatpush3.bf16.msra.mxu0 %v13423_v0  ;;  %v13443_v0 = vld [vmem:[#allocation10 + $0x108] sm:$0xff]  }
 0x66c   : > { %12628 = vmatprep.subr.bf16.mxu0 %v13424_v49 }
 0x66f   : > { %12629 = vmatpush3.bf16.msra.mxu0 %v13424_v49  ;;  %v13445_v49 = vld [vmem:[#allocation10 + $0x118] sm:$0xff]  }
 0x670   : > { %12630 = vmatprep.subr.bf16.mxu0 %v13425_v51 }
 0x673   : > { %12631 = vmatpush3.bf16.msra.mxu0 %v13425_v51  ;;  %v13494_v51 = vld [vmem:[#allocation12 + $0x40] ss:$8 sps:$4 sm:$0xff]  }
 0x674   : > { %12640 = vmatprep.subr.bf16.mxu0 %v13426_v41 }
 0x676   : > { %12633 = vmatmul.mubr.bf16.vlgmr.msra.gmra.mrb[40].mxu0 %v15152_v61 }
 0x677   : > { %12636 = vmatprep.mubr.bf16.mxu0 %v15176_v2  ;;  %12641 = vmatpush3.bf16.msra.mxu0 %v13426_v41  ;;  %v13505_v41 = vld [vmem:[#allocation12 + $0x54] ss:$8 sps:$4 sm:$0xff]  }
 0x678   : > { %12642 = vmatprep.subr.bf16.mxu0 %v13427_v54 }
 0x67b   : > { %12643 = vmatpush3.bf16.msra.mxu0 %v13427_v54  ;;  %v13458_v54 = vld [vmem:[#allocation10 + $0x180] sm:$0xff]  }
 0x67c   : > { %12644 = vmatprep.subr.bf16.mxu0 %v13428_v40 }
 0x67e   : > { %12637 = vmatmul.mubr.bf16.gmra.mrb[44].mxu0 %v15200_v4 }
 0x67f   : > { %12645 = vmatpush3.bf16.msra.mxu0 %v13428_v40  ;;  %12656 = vmatprep.mubr.bf16.mxu0 %v6393_v50  ;;  %v13503_v40 = vld [vmem:[#allocation12 + $0x50] ss:$8 sps:$4 sm:$0xff]   ;;  %v15291_v50 = vld [vmem:[#allocation5 + $0x82] sm:$0xff] }
 0x680   : > { %12646 = vmatprep.subr.bf16.mxu0 %v13429_v6 }
 0x683   : > { %12647 = vmatpush3.bf16.msra.mxu0 %v13429_v6  ;;  %v13460_v6 = vld [vmem:[#allocation10 + $0x190] sm:$0xff]  }
 0x684   : > { %12648 = vmatprep.subr.bf16.mxu0 %v13430_v58 }
 0x687   : > { %12649 = vmatpush3.bf16.msra.mxu0 %v13430_v58  ;;  %v6894_v58 = vpack.c.bf16 %v15291_v50, %v15250_v7  ;;  %v7223_v7 = vld [vmem:[#allocation5 + $0x91] sm:$0xff] }
 0x688   : > { %12650 = vmatprep.subr.bf16.mxu0 %v13431_v34 }
 0x68b   : > { %12651 = vmatpush3.bf16.msra.mxu0 %v13431_v34  ;;  %v13461_v34 = vld [vmem:[#allocation10 + $0x198] sm:$0xff]  }
 0x68c   : > { %12652 = vmatprep.subr.bf16.mxu0 %v13432_v44 }
 0x68f   : > { %12653 = vmatpush3.bf16.msra.mxu0 %v13432_v44  ;;  %v7061_v44 = vpack.c.bf16 %v15121_v38, %v15266_v12  ;;  %v13474_v38 = vld [vmem:[#allocation10 + $0x200] sm:$0xff]  }
 0x690   : > { %12654 = vmatprep.subr.bf16.mxu0 %v13433_v15 }
 0x693   : > { %12655 = vmatpush3.bf16.msra.mxu0 %v13433_v15  ;;  %v13469_v15 = vld [vmem:[#allocation10 + $0x1d8] sm:$0xff]  }
 0x694   : > { %12664 = vmatprep.subr.bf16.mxu0 %v13434_v3 }
 0x696   : > { %12657 = vmatmul.mubr.bf16.vlgmr.msra.gmra.mrb[40].mxu0 %v15242_v19 }
 0x697   : > { %12660 = vmatprep.mubr.bf16.mxu0 %v15246_v13  ;;  %12665 = vmatpush3.bf16.msra.mxu0 %v13434_v3  ;;  %v13470_v3 = vld [vmem:[#allocation10 + $0x1e0] sm:$0xff]  }
 0x698   : > { %12666 = vmatprep.subr.bf16.mxu0 %v13435_v37 }
 0x69b   : > { %12667 = vmatpush3.bf16.msra.mxu0 %v13435_v37  ;;  %v13473_v37 = vld [vmem:[#allocation10 + $0x1f8] sm:$0xff]  }
 0x69c   : > { %12668 = vmatprep.subr.bf16.mxu0 %v13436_v10 }
 0x69e   : > { %12661 = vmatmul.mubr.bf16.gmra.mrb[44].mxu0 %v15254_v9 }
 0x69f   : > { %12669 = vmatpush3.bf16.msra.mxu0 %v13436_v10  ;;  %12680 = vmatprep.mubr.bf16.mxu0 %v6559_v52  ;;  %v6562_v52 = vpack.c.bf16 %v15266_v12, %v15219_v14  ;;  %v13451_v14 = vld [vmem:[#allocation10 + $0x148] sm:$0xff]  }
 0x6a0   : > { %12670 = vmatprep.subr.bf16.mxu0 %v13437_v39  ;;  %v13475_v10 = vld [vmem:[#allocation10 + $0x208] sm:$0xff]  }
 0x6a1   : > { %v13506_v12 = vld [vmem:[#allocation12 + $0x120] ss:$8 sps:$4 sm:$0xff]  }
 0x6a3   : > { %12671 = vmatpush3.bf16.msra.mxu0 %v13437_v39  ;;  %v7227_v39 = vpack.c.bf16 %v7223_v7, %v15161_v18  ;;  %v13499_v18 = vld [vmem:[#allocation12 + $0x104] ss:$8 sps:$4 sm:$0xff]   ;;  %v13530_v7 = vld [vmem:[#allocation12 + $0x80] ss:$8 sps:$4 sm:$0xff]  }
 0x6a4   : > { %12672 = vmatprep.subr.bf16.mxu0 %v13438_v55 }
 0x6a7   : > { %12673 = vmatpush3.bf16.msra.mxu0 %v13438_v55  ;;  %v13477_v55 = vld [vmem:[#allocation10 + $0x218] sm:$0xff]  }
 0x6a8   : > { %12674 = vmatprep.subr.bf16.mxu0 %v13439_v21 }
 0x6ab   : > { %12675 = vmatpush3.bf16.msra.mxu0 %v13439_v21  ;;  %v13478_v21 = vld [vmem:[#allocation10 + $0x220] sm:$0xff]  }
 0x6ac   : > { %12676 = vmatprep.subr.bf16.mxu0 %v13440_v26 }
 0x6af   : > { %12677 = vmatpush3.bf16.msra.mxu0 %v13440_v26  ;;  %v13481_v26 = vld [vmem:[#allocation10 + $0x238] sm:$0xff]  }
 0x6b0   : > { %12678 = vmatprep.subr.bf16.mxu0 %v13441_v46 }
 0x6b3   : > { %12679 = vmatpush3.bf16.msra.mxu0 %v13441_v46  ;;  %v13497_v46 = vld [vmem:[#allocation12 + $0x100] ss:$8 sps:$4 sm:$0xff]  }
 0x6b4   : > { %12688 = vmatprep.subr.bf16.mxu0 %v13442_v30 }
 0x6b6   : > { %12681 = vmatmul.mubr.bf16.vlgmr.msra.gmra.mrb[40].mxu0 %v6560_v5  ;;  %v13448_v5 = vld [vmem:[#allocation10 + $0x130] sm:$0xff]  }
 0x6b7   : > { %12684 = vmatprep.mubr.bf16.mxu0 %v6561_v36  ;;  %12689 = vmatpush3.bf16.msra.mxu0 %v13442_v30  ;;  %v13484_v36 = vld [vmem:[#allocation12 + $0x4] ss:$8 sps:$4 sm:$0xff]   ;;  %v13502_v30 = vld [vmem:[#allocation12 + $0x114] ss:$8 sps:$4 sm:$0xff]  }
 0x6b8   : > { %12690 = vmatprep.subr.bf16.mxu0 %v13443_v0  ;;  %7728 = vmatprep.subr.bf16.mxu1 %v13484_v36  ;;  %v13529_v36 = vld [vmem:[#allocation12 + $0x174] ss:$8 sps:$4 sm:$0xff]  }
 0x6bb   : > { %12691 = vmatpush3.bf16.msra.mxu0 %v13443_v0  ;;  %v13508_v0 = vld [vmem:[#allocation12 + $0x124] ss:$8 sps:$4 sm:$0xff]  }
 0x6bc   : > { %12692 = vmatprep.subr.bf16.mxu0 %v13444_v28 }
 0x6be   : > { %12685 = vmatmul.mubr.bf16.gmra.mrb[44].mxu0 %v6562_v52 }
 0x6bf   : > { %12693 = vmatpush3.bf16.msra.mxu0 %v13444_v28  ;;  %12704 = vmatprep.mubr.bf16.mxu0 %v6725_v24  ;;  %v13482_v24 = vld [vmem:[#allocation12] ss:$8 sps:$4 sm:$0xff]   ;;  %v7389_v28 = vld [vmem:[#allocation5 + $0x92] sm:$0xff] }
 0x6c0   : > { %12694 = vmatprep.subr.bf16.mxu0 %v13445_v49  ;;  %7729 = vmatpush1.bf16.msra.mxu1 %v13482_v24  ;;  %v7393_v52 = vpack.c.bf16 %v7389_v28, %v15291_v50  ;;  %v13524_v24 = vld [vmem:[#allocation12 + $0x160] ss:$8 sps:$4 sm:$0xff]  }
 0x6c1   : > { %7730 = vmatprep.subr.bf16.mxu1 %v13487_v59  ;;  %v13527_v59 = vld [vmem:[#allocation12 + $0x170] ss:$8 sps:$4 sm:$0xff]   ;;  %v13545_v28 = vld [vmem:[#allocation12 + $0x220] ss:$8 sps:$4 sm:$0xff]  }
 0x6c3   : > { %12695 = vmatpush3.bf16.msra.mxu0 %v13445_v49  ;;  %v13511_v49 = vld [vmem:[#allocation12 + $0x134] ss:$8 sps:$4 sm:$0xff]  }
 0x6c4   : > { %12696 = vmatprep.subr.bf16.mxu0 %v13446_v62 }
 0x6c7   : > { %12697 = vmatpush3.bf16.msra.mxu0 %v13446_v62  ;;  %v13509_v62 = vld [vmem:[#allocation12 + $0x130] ss:$8 sps:$4 sm:$0xff]  }
 0x6c8   : > { %12698 = vmatprep.subr.bf16.mxu0 %v13447_v48 }
 0x6cb   : > { %12699 = vmatpush3.bf16.msra.mxu0 %v13447_v48  ;;  %v13517_v48 = vld [vmem:[#allocation12 + $0x144] ss:$8 sps:$4 sm:$0xff]  }
 0x6cc   : > { %12700 = vmatprep.subr.bf16.mxu0 %v13448_v5 }
 0x6cf   : > { %12701 = vmatpush3.bf16.msra.mxu0 %v13448_v5  ;;  %v13514_v5 = vld [vmem:[#allocation12 + $0x64] ss:$8 sps:$4 sm:$0xff]  }
 0x6d0   : > { %12702 = vmatprep.subr.bf16.mxu0 %v13449_v45 }
 0x6d3   : > { %12703 = vmatpush3.bf16.msra.mxu0 %v13449_v45  ;;  %v13520_v45 = vld [vmem:[#allocation12 + $0x154] ss:$8 sps:$4 sm:$0xff]  }
 0x6d4   : > { %12712 = vmatprep.subr.bf16.mxu0 %v13450_v1 }
 0x6d6   : > { %12705 = vmatmul.mubr.bf16.vlgmr.msra.gmra.mrb[40].mxu0 %v6726_v53  ;;  %v13485_v53 = vld [vmem:[#allocation12 + $0x10] ss:$8 sps:$4 sm:$0xff]  }
 0x6d7   : > { %12708 = vmatprep.mubr.bf16.mxu0 %v6727_v31  ;;  %12713 = vmatpush3.bf16.msra.mxu0 %v13450_v1  ;;  %v13456_v31 = vld [vmem:[#allocation10 + $0x170] sm:$0xff]  }
 0x6d8   : > { %12714 = vmatprep.subr.bf16.mxu0 %v13451_v14  ;;  %7731 = vmatpush1.bf16.msra.mxu1 %v13485_v53  ;;  %v13518_v1 = vld [vmem:[#allocation12 + $0x150] ss:$8 sps:$4 sm:$0xff]   ;;  %v14075_v53 = vmov 0  }
 0x6d9   : > { %7732 = vmatprep.subr.bf16.mxu1 %v13490_v17  ;;  %7760 = vmatprep.mubr.bf16.mxu1 %v14075_v53  ;;  %v13535_v17 = vld [vmem:[#allocation12 + $0x204] ss:$8 sps:$4 sm:$0xff]  }
 0x6db   : > { %12715 = vmatpush3.bf16.msra.mxu0 %v13451_v14  ;;  %v13526_v14 = vld [vmem:[#allocation12 + $0x164] ss:$8 sps:$4 sm:$0xff]  }
 0x6dc   : > { %12716 = vmatprep.subr.bf16.mxu0 %v13452_v60  ;;  %7733 = vmatpush1.bf16.msra.mxu1 %v13488_v11 }
 0x6de   : > { %12709 = vmatmul.mubr.bf16.gmra.mrb[44].mxu0 %v6728_v43  ;;  %v13493_v43 = vld [vmem:[#allocation12 + $0x34] ss:$8 sps:$4 sm:$0xff]  }
 0x6df   : > { %12717 = vmatpush3.bf16.msra.mxu0 %v13452_v60  ;;  %12728 = vmatprep.mubr.bf16.mxu0 %v6891_v32  ;;  %v13457_v32 = vld [vmem:[#allocation10 + $0x178] sm:$0xff]  }
 0x6e0   : > { %12718 = vmatprep.subr.bf16.mxu0 %v13453_v47  ;;  %7734 = vmatprep.subr.bf16.mxu1 %v13493_v43  ;;  %v13521_v60 = vld [vmem:[#allocation12 + $0x70] ss:$8 sps:$4 sm:$0xff]  }
 0x6e1   : > { %7735 = vmatpush1.bf16.msra.mxu1 %v13491_v63 }
 0x6e2   : > { %7736 = vmatprep.subr.bf16.mxu1 %v13496_v56 }
 0x6e3   : > { %12719 = vmatpush3.bf16.msra.mxu0 %v13453_v47  ;;  %v13523_v47 = vld [vmem:[#allocation12 + $0x74] ss:$8 sps:$4 sm:$0xff]  }
 0x6e4   : > { %12720 = vmatprep.subr.bf16.mxu0 %v13454_v20 }
 0x6e5   : > { %7737 = vmatpush1.bf16.msra.mxu1 %v13494_v51 }
 0x6e6   : > { %7738 = vmatprep.subr.bf16.mxu1 %v13505_v41 }
 0x6e7   : > { %12721 = vmatpush3.bf16.msra.mxu0 %v13454_v20  ;;  %v13532_v20 = vld [vmem:[#allocation12 + $0x84] ss:$8 sps:$4 sm:$0xff]  }
 0x6e8   : > { %12722 = vmatprep.subr.bf16.mxu0 %v13455_v57 }
 0x6e9   : > { %7739 = vmatpush1.bf16.msra.mxu1 %v13503_v40 }
 0x6ea   : > { %7740 = vmatprep.subr.bf16.mxu1 %v13514_v5  ;;  %v13562_v5 = vld [vmem:[#allocation12 + $0xd4] ss:$8 sps:$4 sm:$0xff]  }
 0x6eb   : > { %12723 = vmatpush3.bf16.msra.mxu0 %v13455_v57  ;;  %v11131_v57 = vld [vmem:[%s15518_s8] ss:$0 sm:$0xff] }
 0x6ec   : > { %12724 = vmatprep.subr.bf16.mxu0 %v13456_v31 }
 0x6ef   : > { %12725 = vmatpush3.bf16.msra.mxu0 %v13456_v31 }
 0x6f0   : > { %12726 = vmatprep.subr.bf16.mxu0 %v13457_v32 }
 0x6f3   : > { %12727 = vmatpush3.bf16.msra.mxu0 %v13457_v32 }
 0x6f4   : > { %12736 = vmatprep.subr.bf16.mxu0 %v13458_v54 }
 0x6f6   : > { %12729 = vmatmul.mubr.bf16.vlgmr.msra.gmra.mrb[40].mxu0 %v6892_v35  ;;  %v13464_v35 = vld [vmem:[#allocation10 + $0x1b0] sm:$0xff]  }
 0x6f7   : > { %12732 = vmatprep.mubr.bf16.mxu0 %v6893_v22  ;;  %12737 = vmatpush3.bf16.msra.mxu0 %v13458_v54  ;;  %v13467_v22 = vld [vmem:[#allocation10 + $0x1c8] sm:$0xff]  }
 0x6f8   : > { %12738 = vmatprep.subr.bf16.mxu0 %v13459_v25 }
 0x6fb   : > { %12739 = vmatpush3.bf16.msra.mxu0 %v13459_v25 }
 0x6fc   : > { %12740 = vmatprep.subr.bf16.mxu0 %v13460_v6 }
 0x6fe   : > { %12733 = vmatmul.mubr.bf16.gmra.mrb[44].mxu0 %v6894_v58 }
 0x6ff   : > { %12741 = vmatpush3.bf16.msra.mxu0 %v13460_v6  ;;  %12752 = vmatprep.mubr.bf16.mxu0 %v15196_v33  ;;  %v13468_v33 = vld [vmem:[#allocation10 + $0x1d0] sm:$0xff]  }
 0x700   : > { %12742 = vmatprep.subr.bf16.mxu0 %v13461_v34 }
 0x703   : > { %12743 = vmatpush3.bf16.msra.mxu0 %v13461_v34 }
 0x704   : > { %12744 = vmatprep.subr.bf16.mxu0 %v13462_v27 }
 0x707   : > { %12745 = vmatpush3.bf16.msra.mxu0 %v13462_v27 }
 0x708   : > { %12746 = vmatprep.subr.bf16.mxu0 %v13463_v16 }
 0x70b   : > { %12747 = vmatpush3.bf16.msra.mxu0 %v13463_v16 }
 0x70c   : > { %12748 = vmatprep.subr.bf16.mxu0 %v13464_v35 }
 0x70f   : > { %12749 = vmatpush3.bf16.msra.mxu0 %v13464_v35 }
 0x710   : > { %12750 = vmatprep.subr.bf16.mxu0 %v13465_v8 }
 0x713   : > { %12751 = vmatpush3.bf16.msra.mxu0 %v13465_v8 }
 0x714   : > { %12760 = vmatprep.subr.bf16.mxu0 %v13466_v29 }
 0x716   : > { %12753 = vmatmul.mubr.bf16.vlgmr.msra.gmra.mrb[40].mxu0 %v15215_v42  ;;  %v13471_v42 = vld [vmem:[#allocation10 + $0x1e8] sm:$0xff]  }
 0x717   : > { %12756 = vmatprep.mubr.bf16.mxu0 %v15226_v23  ;;  %12761 = vmatpush3.bf16.msra.mxu0 %v13466_v29  ;;  %v13472_v23 = vld [vmem:[#allocation10 + $0x1f0] sm:$0xff]  }
 0x718   : > { %12762 = vmatprep.subr.bf16.mxu0 %v13467_v22 }
 0x71b   : > { %12763 = vmatpush3.bf16.msra.mxu0 %v13467_v22 }
 0x71c   : > { %12764 = vmatprep.subr.bf16.mxu0 %v13468_v33 }
 0x71e   : > { %12757 = vmatmul.mubr.bf16.gmra.mrb[44].mxu0 %v7061_v44 }
 0x71f   : > { %12765 = vmatpush3.bf16.msra.mxu0 %v13468_v33  ;;  %12776 = vmatprep.mubr.bf16.mxu0 %v15152_v61  ;;  %v13476_v61 = vld [vmem:[#allocation10 + $0x210] sm:$0xff]  }
 0x720   : > { %12766 = vmatprep.subr.bf16.mxu0 %v13469_v15 }
 0x723   : > { %12767 = vmatpush3.bf16.msra.mxu0 %v13469_v15 }
 0x724   : > { %12768 = vmatprep.subr.bf16.mxu0 %v13470_v3 }
 0x727   : > { %12769 = vmatpush3.bf16.msra.mxu0 %v13470_v3 }
 0x728   : > { %12770 = vmatprep.subr.bf16.mxu0 %v13471_v42 }
 0x72b   : > { %12771 = vmatpush3.bf16.msra.mxu0 %v13471_v42 }
 0x72c   : > { %12772 = vmatprep.subr.bf16.mxu0 %v13472_v23 }
 0x72f   : > { %12773 = vmatpush3.bf16.msra.mxu0 %v13472_v23 }
 0x730   : > { %12774 = vmatprep.subr.bf16.mxu0 %v13473_v37 }
 0x733   : > { %12775 = vmatpush3.bf16.msra.mxu0 %v13473_v37 }
 0x734   : > { %12784 = vmatprep.subr.bf16.mxu0 %v13474_v38 }
 0x736   : > { %12777 = vmatmul.mubr.bf16.vlgmr.msra.gmra.mrb[40].mxu0 %v15176_v2  ;;  %v13479_v2 = vld [vmem:[#allocation10 + $0x228] sm:$0xff]  }
 0x737   : > { %12780 = vmatprep.mubr.bf16.mxu0 %v15200_v4  ;;  %12785 = vmatpush3.bf16.msra.mxu0 %v13474_v38  ;;  %v13480_v4 = vld [vmem:[#allocation10 + $0x230] sm:$0xff]  }
 0x738   : > { %12786 = vmatprep.subr.bf16.mxu0 %v13475_v10 }
 0x73b   : > { %12787 = vmatpush3.bf16.msra.mxu0 %v13475_v10 }
 0x73c   : > { %12788 = vmatprep.subr.bf16.mxu0 %v13476_v61 }
 0x73e   : > { %12781 = vmatmul.mubr.bf16.gmra.mrb[44].mxu0 %v7227_v39 }
 0x73f   : > { %12789 = vmatpush3.bf16.msra.mxu0 %v13476_v61  ;;  %12800 = vmatprep.mubr.bf16.mxu0 %v15242_v19  ;;  %v13500_v19 = vld [vmem:[#allocation12 + $0x110] ss:$8 sps:$4 sm:$0xff]  }
 0x740   : > { %12790 = vmatprep.subr.bf16.mxu0 %v13477_v55 }
 0x743   : > { %12791 = vmatpush3.bf16.msra.mxu0 %v13477_v55  ;;  %v13538_v55 = vld [vmem:[#allocation12 + $0x94] ss:$8 sps:$4 sm:$0xff]  }
 0x744   : > { %12792 = vmatprep.subr.bf16.mxu0 %v13478_v21 }
 0x747   : > { %12793 = vmatpush3.bf16.msra.mxu0 %v13478_v21  ;;  %v13533_v21 = vld [vmem:[#allocation12 + $0x200] ss:$8 sps:$4 sm:$0xff]  }
 0x748   : > { %12794 = vmatprep.subr.bf16.mxu0 %v13479_v2 }
 0x74b   : > { %12795 = vmatpush3.bf16.msra.mxu0 %v13479_v2 }
 0x74c   : > { %12796 = vmatprep.subr.bf16.mxu0 %v13480_v4 }
 0x74f   : > { %12797 = vmatpush3.bf16.msra.mxu0 %v13480_v4  ;;  %v13541_v4 = vld [vmem:[#allocation12 + $0x214] ss:$8 sps:$4 sm:$0xff]  }
 0x750   : > { %12798 = vmatprep.subr.bf16.mxu0 %v13481_v26 }
 0x753   : > { %12799 = vmatpush3.bf16.msra.mxu0 %v13481_v26  ;;  %v13536_v26 = vld [vmem:[#allocation12 + $0x90] ss:$8 sps:$4 sm:$0xff]  }
 0x754   : > { %8049 = vmatprep.subr.bf16.mxu0 %v13499_v18  ;;  %v13544_v18 = vld [vmem:[#allocation12 + $0xa4] ss:$8 sps:$4 sm:$0xff]  }
 0x756   : > { %12801 = vmatmul.mubr.bf16.vlgmr.msra.gmra.mrb[40].mxu0 %v15246_v13  ;;  %v13512_v13 = vld [vmem:[#allocation12 + $0x60] ss:$8 sps:$4 sm:$0xff]  }
 0x757   : > { %12804 = vmatprep.mubr.bf16.mxu0 %v15254_v9  ;;  %8050 = vmatpush1.bf16.msra.mxu0 %v13497_v46  ;;  %v13515_v9 = vld [vmem:[#allocation12 + $0x140] ss:$8 sps:$4 sm:$0xff]   ;;  %v13539_v46 = vld [vmem:[#allocation12 + $0x210] ss:$8 sps:$4 sm:$0xff]  }
 0x758   : > { %8051 = vmatprep.subr.bf16.mxu0 %v13502_v30  ;;  %7741 = vmatpush1.bf16.msra.mxu1 %v13512_v13  ;;  %v13547_v30 = vld [vmem:[#allocation12 + $0x224] ss:$8 sps:$4 sm:$0xff]   ;;  %v13554_v13 = vld [vmem:[#allocation12 + $0xc0] ss:$8 sps:$4 sm:$0xff]  }
 0x759   : > { %7742 = vmatprep.subr.bf16.mxu1 %v13523_v47  ;;  %v13566_v47 = vld [vmem:[#allocation12 + $0xe0] ss:$8 sps:$4 sm:$0xff]  }
 0x75b   : > { %8052 = vmatpush1.bf16.msra.mxu0 %v13500_v19  ;;  %v13542_v19 = vld [vmem:[#allocation12 + $0xa0] ss:$8 sps:$4 sm:$0xff]  }
 0x75c   : > { %8053 = vmatprep.subr.bf16.mxu0 %v13508_v0  ;;  %7743 = vmatpush1.bf16.msra.mxu1 %v13521_v60  ;;  %v13550_v0 = vld [vmem:[#allocation12 + $0xb4] ss:$8 sps:$4 sm:$0xff]   ;;  %v13563_v60 = vld [vmem:[#allocation12 + $0x250] ss:$8 sps:$4 sm:$0xff]  }
 0x75d   : > { %7889 = vmatprep.subr.bf16.mxu1 %v13532_v20  ;;  %v13569_v20 = vld [vmem:[#allocation12 + $0x260] ss:$8 sps:$4 sm:$0xff]  }
 0x75e   : > { %12805 = vmatmul.mubr.bf16.gmra.mrb[44].mxu0 %v7393_v52  ;;  %v13548_v52 = vld [vmem:[#allocation12 + $0xb0] ss:$8 sps:$4 sm:$0xff]  }
 0x75f   : > { %8054 = vmatpush1.bf16.msra.mxu0 %v13506_v12  ;;  %8081 = vmatprep.mubr.bf16.mxu0 %v14075_v53  ;;  %v13553_v12 = vld [vmem:[#allocation12 + $0x234] ss:$8 sps:$4 sm:$0xff]  }
 0x760   : > { %8055 = vmatprep.subr.bf16.mxu0 %v13511_v49  ;;  %v13556_v49 = vld [vmem:[#allocation12 + $0xc4] ss:$8 sps:$4 sm:$0xff]  }
 0x763   : > { %8056 = vmatpush1.bf16.msra.mxu0 %v13509_v62  ;;  %v13551_v62 = vld [vmem:[#allocation12 + $0x230] ss:$8 sps:$4 sm:$0xff]  }
 0x764   : > { %8057 = vmatprep.subr.bf16.mxu0 %v13517_v48  ;;  %v13559_v48 = vld [vmem:[#allocation12 + $0x244] ss:$8 sps:$4 sm:$0xff]  }
 0x767   : > { %8058 = vmatpush1.bf16.msra.mxu0 %v13515_v9  ;;  %v13557_v9 = vld [vmem:[#allocation12 + $0x240] ss:$8 sps:$4 sm:$0xff]  }
 0x768   : > { %8059 = vmatprep.subr.bf16.mxu0 %v13520_v45  ;;  %v13565_v45 = vld [vmem:[#allocation12 + $0x254] ss:$8 sps:$4 sm:$0xff]  }
 0x76b   : > { %8060 = vmatpush1.bf16.msra.mxu0 %v13518_v1  ;;  %v13560_v1 = vld [vmem:[#allocation12 + $0xd0] ss:$8 sps:$4 sm:$0xff]  }
 0x76c   : > { %8061 = vmatprep.subr.bf16.mxu0 %v13526_v14  ;;  %v13568_v14 = vld [vmem:[#allocation12 + $0xe4] ss:$8 sps:$4 sm:$0xff]  }
 0x76f   : > { %8062 = vmatpush1.bf16.msra.mxu0 %v13524_v24  ;;  %v13571_v24 = vld [vmem:[#allocation12 + $0x264] ss:$8 sps:$4 sm:$0xff]  }
 0x770   : > { %8063 = vmatprep.subr.bf16.mxu0 %v13529_v36 }
 0x773   : > { %8064 = vmatpush1.bf16.msra.mxu0 %v13527_v59 }
 0x774   : > { %8366 = vmatprep.subr.bf16.mxu0 %v13535_v17  ;;  %v13574_v17 = vld [vmem:[#allocation12 + $0xf4] ss:$8 sps:$4 sm:$0xff]  }
 0x829   : > { %v12802_v11 = vpop.f32.mrb[40].mxu0 }
 0x82a   : > { %v7565_v43 = vadd.f32 %v12802_v11, %v11131_v57  ;;  %v7493_v31 = vpop.f32.mrb[41].mxu0 }
 0x82b   : > { %v7563_v63 = vadd.f32 %v11131_v57, %v7493_v31  ;;  %v12803_v56 = vpop.f32.mrb[42].mxu0 }
 0x82c   : > { %v7573_v32 = vmax.f32 %v7565_v43, 0.0  ;;  %v7566_v51 = vadd.f32 %v12803_v56, %v11131_v57  ;;  %v7496_v41 = vpop.f32.mrb[43].mxu0  ;;  %v13577_v43 = vld [vmem:[#allocation12 + $0x274] ss:$8 sps:$4 sm:$0xff]   ;;  %v13580_v56 = vld [vmem:[#allocation12 + $0x184] ss:$8 sps:$4 sm:$0xff]  }
 0x82d   : > { %v7571_v54 = vmax.f32 %v7563_v63, 0.0  ;;  %v7564_v40 = vadd.f32 %v11131_v57, %v7496_v41  ;;  %v13572_v63 = vld [vmem:[#allocation12 + $0xf0] ss:$8 sps:$4 sm:$0xff]  }
 0x82e   : > { %7581 = vst [vmem:[#allocation7 + $0x10] sm:$0xff] %v7573_v32  ;;  %v7574_v25 = vmax.f32 %v7566_v51, 0.0  ;;  %v13575_v51 = vld [vmem:[#allocation12 + $0x270] ss:$8 sps:$4 sm:$0xff]  }
 0x82f   : > { %7579 = vst [vmem:[#allocation7] sm:$0xff] %v7571_v54  ;;  %v7572_v6 = vmax.f32 %v7564_v40, 0.0  ;;  %v13583_v54 = vld [vmem:[#allocation12 + $0x304] ss:$8 sps:$4 sm:$0xff]   ;;  %v13578_v40 = vld [vmem:[#allocation12 + $0x180] ss:$8 sps:$4 sm:$0xff]  }
 0x830   : > { %7582 = vst [vmem:[#allocation7 + $0x18] sm:$0xff] %v7574_v25 }
 0x831   : > { %7580 = vst [vmem:[#allocation7 + $0x8] sm:$0xff] %v7572_v6  ;;  %v12806_v50 = vpop.f32.mrb[44].mxu0  ;;  %v13586_v6 = vld [vmem:[#allocation12 + $0x194] ss:$8 sps:$4 sm:$0xff]  }
 0x832   : > { %v7569_v58 = vadd.f32 %v12806_v50, %v11131_v57  ;;  %v7509_v34 = vpop.f32.mrb[45].mxu0  ;;  %v13581_v50 = vld [vmem:[#allocation12 + $0x300] ss:$8 sps:$4 sm:$0xff]  }
 0x833   : > { %v7567_v27 = vadd.f32 %v11131_v57, %v7509_v34  ;;  %v12807_v16 = vpop.f32.mrb[46].mxu0  ;;  %v13589_v34 = vld [vmem:[#allocation12 + $0x314] ss:$8 sps:$4 sm:$0xff]  }
 0x834   : > { %v7577_v35 = vmax.f32 %v7569_v58, 0.0  ;;  %v7570_v8 = vadd.f32 %v12807_v16, %v11131_v57  ;;  %v7512_v29 = vpop.f32.mrb[47].mxu0  ;;  %v13592_v16 = vld [vmem:[#allocation12 + $0x1a4] ss:$8 sps:$4 sm:$0xff]  }
 0x835   : > { %v7575_v22 = vmax.f32 %v7567_v27, 0.0  ;;  %v7568_v33 = vadd.f32 %v11131_v57, %v7512_v29  ;;  %v7589_v57 = vld [vmem:[#allocation7 + $0x10] ss:$2 sm:$0xf]  ;;  %v13590_v29 = vld [vmem:[#allocation12 + $0x1a0] ss:$8 sps:$4 sm:$0xff]  }
 0x836   : > { %7585 = vst [vmem:[#allocation7 + $0x30] sm:$0xff] %v7577_v35  ;;  %v7578_v44 = vmax.f32 %v7570_v8, 0.0  ;;  %v7587_v15 = vld [vmem:[#allocation7] ss:$2 sm:$0xf] }
 0x837   : > { %7583 = vst [vmem:[#allocation7 + $0x20] sm:$0xff] %v7575_v22  ;;  %v7576_v3 = vmax.f32 %v7568_v33, 0.0  ;;  %v7595_v42 = vld [vmem:[#allocation7 + $0x1] ss:$2 sm:$0xf] }
 0x838   : > { %7586 = vst [vmem:[#allocation7 + $0x38] sm:$0xff] %v7578_v44  ;;  %v7603_v23 = vld [vmem:[#allocation7 + $0x8] ss:$2 sm:$0xf]  ;;  %v7618_v38 = vmax.f32 %v7587_v15, %v7595_v42  ;;  %v13584_v27 = vld [vmem:[#allocation12 + $0x190] ss:$8 sps:$4 sm:$0xff]  }
 0x839   : > { %v7611_v37 = vld [vmem:[#allocation7 + $0x9] ss:$2 sm:$0xf]  ;;  %7584 = vst [vmem:[#allocation7 + $0x28] sm:$0xff] %v7576_v3  ;;  %v13587_v35 = vld [vmem:[#allocation12 + $0x310] ss:$8 sps:$4 sm:$0xff]  }
 0x83a   : > { %v7622_v10 = vmax.f32 %v7603_v23, %v7611_v37  ;;  %v7605_v36 = vld [vmem:[#allocation7 + $0x18] ss:$2 sm:$0xf]  ;;  %v7613_v59 = vld [vmem:[#allocation7 + $0x19] ss:$2 sm:$0xf] }
 0x83b   : > { %v7597_v11 = vld [vmem:[#allocation7 + $0x11] ss:$2 sm:$0xf]  ;;  %v7623_v31 = vmax.f32 %v7605_v36, %v7613_v59  ;;  %v13595_v8 = vld [vmem:[#allocation12 + $0x324] ss:$8 sps:$4 sm:$0xff]  }
 0x83c   : > { %v7626_v61 = vmax.f32 %v7618_v38, %v7622_v10  ;;  %v7619_v32 = vmax.f32 %v7589_v57, %v7597_v11  ;;  %v13598_v22 = vld [vmem:[#allocation12 + $0x1b4] ss:$8 sps:$4 sm:$0xff]   ;;  %v13593_v33 = vld [vmem:[#allocation12 + $0x320] ss:$8 sps:$4 sm:$0xff]   ;;  %v13596_v15 = vld [vmem:[#allocation12 + $0x1b0] ss:$8 sps:$4 sm:$0xff]  }
 0x83d   : > { %v13601_v44 = vld [vmem:[#allocation12 + $0x334] ss:$8 sps:$4 sm:$0xff]   ;;  %v13604_v3 = vld [vmem:[#allocation12 + $0x1c4] ss:$8 sps:$4 sm:$0xff]   ;;  %v13599_v42 = vld [vmem:[#allocation12 + $0x330] ss:$8 sps:$4 sm:$0xff]  }
 0x83e   : > { %v15313_v39 = vpack.c.bf16 %v7626_v61, %v7626_v61  ;;  %v7627_v41 = vmax.f32 %v7619_v32, %v7623_v31  ;;  %v13607_v23 = vld [vmem:[#allocation12 + $0x344] ss:$8 sps:$4 sm:$0xff]   ;;  %v13602_v37 = vld [vmem:[#allocation12 + $0x1c0] ss:$8 sps:$4 sm:$0xff]   ;;  %v13610_v38 = vld [vmem:[#allocation12 + $0x1d4] ss:$8 sps:$4 sm:$0xff]  }
 0x83f   : > { %v13605_v10 = vld [vmem:[#allocation12 + $0x340] ss:$8 sps:$4 sm:$0xff]   ;;  %v13613_v61 = vld [vmem:[#allocation12 + $0x354] ss:$8 sps:$4 sm:$0xff]   ;;  %v13652_v36 = vld [vmem:[#allocation12 + $0x2c4] ss:$8 sps:$4 sm:$0xff]  }
 0x840   : > { %7761 = vmatmul.mubr.bf16.vlgmr.msra.gmra.mrb[32].mxu1 %v15313_v39  ;;  %v7967_v2 = vrot.slane %v15313_v39, 1  ;;  %v7806_v25 = vshrl.u32 %v15313_v39, 16  ;;  %v15322_v58 = vpack.c.bf16 %v7627_v41, %v7627_v41  ;;  %v13643_v39 = vld [vmem:[#allocation12 + $0x424] ss:$8 sps:$4 sm:$0xff]   ;;  %v13647_v59 = vld [vmem:[#allocation12 + $0x430] ss:$8 sps:$4 sm:$0xff]  }
 0x841   : > { %7890 = vmatpush1.bf16.msra.mxu1 %v13530_v7  ;;  %7921 = vmatprep.mubr.bf16.mxu1 %v14075_v53  ;;  %v13608_v7 = vld [vmem:[#allocation12 + $0x1d0] ss:$8 sps:$4 sm:$0xff]   ;;  %v13658_v57 = vld [vmem:[#allocation12 + $0x2d4] ss:$8 sps:$4 sm:$0xff]   ;;  %v13653_v11 = vld [vmem:[#allocation12 + $0x440] ss:$8 sps:$4 sm:$0xff]  }
 0x842   : > { %8082 = vmatmul.mubr.bf16.vlgmr.msra.gmra.mrb[48].mxu0 %v7967_v2  ;;  %7891 = vmatprep.subr.bf16.mxu1 %v13538_v55  ;;  %v13616_v55 = vld [vmem:[#allocation12 + $0x1e4] ss:$8 sps:$4 sm:$0xff]   ;;  %v13656_v31 = vld [vmem:[#allocation12 + $0x2d0] ss:$8 sps:$4 sm:$0xff]   ;;  %v13662_v32 = vld [vmem:[#allocation12 + $0x2e0] ss:$8 sps:$4 sm:$0xff]  }
 0x843   : > { %8367 = vmatpush1.bf16.msra.mxu0 %v13533_v21  ;;  %8398 = vmatprep.mubr.bf16.mxu0 %v14075_v53  ;;  %v13611_v21 = vld [vmem:[#allocation12 + $0x350] ss:$8 sps:$4 sm:$0xff]   ;;  %v13619_v2 = vld [vmem:[#allocation12 + $0x364] ss:$8 sps:$4 sm:$0xff]  }
 0x844   : > { %8368 = vmatprep.subr.bf16.mxu0 %v13541_v4  ;;  %v13614_v4 = vld [vmem:[#allocation12 + $0x1e0] ss:$8 sps:$4 sm:$0xff]  }
 0x845   : > { %7892 = vmatpush1.bf16.msra.mxu1 %v13536_v26  ;;  %v13622_v26 = vld [vmem:[#allocation12 + $0x1f4] ss:$8 sps:$4 sm:$0xff]   ;;  %v7607_v41 = vld [vmem:[#allocation7 + $0x28] ss:$2 sm:$0xf] }
 0x846   : > { %7893 = vmatprep.subr.bf16.mxu1 %v13544_v18  ;;  %v13617_v18 = vld [vmem:[#allocation12 + $0x360] ss:$8 sps:$4 sm:$0xff]  }
 0x847   : > { %8369 = vmatpush1.bf16.msra.mxu0 %v13539_v46  ;;  %v13625_v46 = vld [vmem:[#allocation12 + $0x374] ss:$8 sps:$4 sm:$0xff]  }
 0x848   : > { %8370 = vmatprep.subr.bf16.mxu0 %v13547_v30  ;;  %v13620_v30 = vld [vmem:[#allocation12 + $0x1f0] ss:$8 sps:$4 sm:$0xff]  }
 0x849   : > { %7894 = vmatpush1.bf16.msra.mxu1 %v13542_v19  ;;  %v13628_v19 = vld [vmem:[#allocation12 + $0x284] ss:$8 sps:$4 sm:$0xff]  }
 0x84a   : > { %7895 = vmatprep.subr.bf16.mxu1 %v13550_v0  ;;  %v13623_v0 = vld [vmem:[#allocation12 + $0x370] ss:$8 sps:$4 sm:$0xff]  }
 0x84b   : > { %8371 = vmatpush1.bf16.msra.mxu0 %v13545_v28  ;;  %v13631_v28 = vld [vmem:[#allocation12 + $0x404] ss:$8 sps:$4 sm:$0xff]  }
 0x84c   : > { %8372 = vmatprep.subr.bf16.mxu0 %v13553_v12  ;;  %v13626_v12 = vld [vmem:[#allocation12 + $0x280] ss:$8 sps:$4 sm:$0xff]  }
 0x84d   : > { %7896 = vmatpush1.bf16.msra.mxu1 %v13548_v52  ;;  %v8126_v52 = vrot.slane %v7806_v25, 1 }
 0x84e   : > { %7897 = vmatprep.subr.bf16.mxu1 %v13556_v49  ;;  %v13634_v49 = vld [vmem:[#allocation12 + $0x294] ss:$8 sps:$4 sm:$0xff]  }
 0x84f   : > { %8373 = vmatpush1.bf16.msra.mxu0 %v13551_v62  ;;  %v13629_v62 = vld [vmem:[#allocation12 + $0x400] ss:$8 sps:$4 sm:$0xff]  }
 0x850   : > { %8374 = vmatprep.subr.bf16.mxu0 %v13559_v48  ;;  %v8605_v48 = vrot.slane %v15322_v58, 1 }
 0x851   : > { %7898 = vmatpush1.bf16.msra.mxu1 %v13554_v13  ;;  %v13637_v13 = vld [vmem:[#allocation12 + $0x414] ss:$8 sps:$4 sm:$0xff]  }
 0x852   : > { %7899 = vmatprep.subr.bf16.mxu1 %v13562_v5  ;;  %v13632_v5 = vld [vmem:[#allocation12 + $0x290] ss:$8 sps:$4 sm:$0xff]  }
 0x853   : > { %8375 = vmatpush1.bf16.msra.mxu0 %v13557_v9  ;;  %v13640_v9 = vld [vmem:[#allocation12 + $0x2a4] ss:$8 sps:$4 sm:$0xff]  }
 0x854   : > { %8376 = vmatprep.subr.bf16.mxu0 %v13565_v45  ;;  %v13635_v45 = vld [vmem:[#allocation12 + $0x410] ss:$8 sps:$4 sm:$0xff]  }
 0x855   : > { %7900 = vmatpush1.bf16.msra.mxu1 %v13560_v1  ;;  %v13638_v1 = vld [vmem:[#allocation12 + $0x2a0] ss:$8 sps:$4 sm:$0xff]  }
 0x856   : > { %7901 = vmatprep.subr.bf16.mxu1 %v13568_v14  ;;  %v13646_v14 = vld [vmem:[#allocation12 + $0x2b4] ss:$8 sps:$4 sm:$0xff]  }
 0x857   : > { %8377 = vmatpush1.bf16.msra.mxu0 %v13563_v60  ;;  %v13641_v60 = vld [vmem:[#allocation12 + $0x420] ss:$8 sps:$4 sm:$0xff]  }
 0x858   : > { %8378 = vmatprep.subr.bf16.mxu0 %v13571_v24  ;;  %v13644_v24 = vld [vmem:[#allocation12 + $0x2b0] ss:$8 sps:$4 sm:$0xff]  }
 0x859   : > { %7902 = vmatpush1.bf16.msra.mxu1 %v13566_v47  ;;  %v13649_v47 = vld [vmem:[#allocation12 + $0x434] ss:$8 sps:$4 sm:$0xff]  }
 0x85a   : > { %7903 = vmatprep.subr.bf16.mxu1 %v13574_v17  ;;  %v13650_v17 = vld [vmem:[#allocation12 + $0x2c0] ss:$8 sps:$4 sm:$0xff]  }
 0x85b   : > { %8379 = vmatpush1.bf16.msra.mxu0 %v13569_v20  ;;  %v13655_v20 = vld [vmem:[#allocation12 + $0x444] ss:$8 sps:$4 sm:$0xff]  }
 0x85c   : > { %8380 = vmatprep.subr.bf16.mxu0 %v13577_v43  ;;  %v13661_v43 = vld [vmem:[#allocation12 + $0x454] ss:$8 sps:$4 sm:$0xff]  }
 0x85d   : > { %7904 = vmatpush1.bf16.msra.mxu1 %v13572_v63  ;;  %v13664_v63 = vld [vmem:[#allocation12 + $0x2e4] ss:$8 sps:$4 sm:$0xff]  }
 0x85e   : > { %8208 = vmatprep.subr.bf16.mxu1 %v13580_v56  ;;  %v13659_v56 = vld [vmem:[#allocation12 + $0x450] ss:$8 sps:$4 sm:$0xff]  }
 0x85f   : > { %8381 = vmatpush1.bf16.msra.mxu0 %v13575_v51  ;;  %v13667_v51 = vld [vmem:[#allocation12 + $0x464] ss:$8 sps:$4 sm:$0xff]  }
 0x860   : > { %7922 = vmatmul.mubr.bf16.vlgmr.msra.gmra.mrb[36].mxu1 %v7806_v25  ;;  %8687 = vmatprep.subr.bf16.mxu0 %v13583_v54  ;;  %v7615_v54 = vld [vmem:[#allocation7 + $0x29] ss:$2 sm:$0xf]  ;;  %v13670_v25 = vld [vmem:[#allocation12 + $0x2f4] ss:$8 sps:$4 sm:$0xff]  }
 0x861   : > { %8209 = vmatpush1.bf16.msra.mxu1 %v13578_v40  ;;  %8240 = vmatprep.mubr.bf16.mxu1 %v14075_v53  ;;  %v13665_v40 = vld [vmem:[#allocation12 + $0x460] ss:$8 sps:$4 sm:$0xff]  }
 0x862   : > { %8399 = vmatmul.mubr.bf16.vlgmr.msra.gmra.mrb[52].mxu0 %v15322_v58  ;;  %8210 = vmatprep.subr.bf16.mxu1 %v13586_v6  ;;  %v7591_v6 = vld [vmem:[#allocation7 + $0x20] ss:$2 sm:$0xf] }
 0x863   : > { %8688 = vmatpush1.bf16.msra.mxu0 %v13581_v50  ;;  %8719 = vmatprep.mubr.bf16.mxu0 %v14075_v53  ;;  %v7599_v50 = vld [vmem:[#allocation7 + $0x21] ss:$2 sm:$0xf] }
 0x864   : > { %8689 = vmatprep.subr.bf16.mxu0 %v13589_v34  ;;  %v13673_v34 = vld [vmem:[#allocation12 + $0x474] ss:$8 sps:$4 sm:$0xff]  }
 0x865   : > { %8211 = vmatpush1.bf16.msra.mxu1 %v13584_v27  ;;  %v7624_v27 = vmax.f32 %v7607_v41, %v7615_v54  ;;  %v13748_v41 = vld [vmem:[#allocation12 + $0x4c4] ss:$8 sps:$4 sm:$0xff]   ;;  %v13743_v54 = vld [vmem:[#allocation12 + $0x630] ss:$8 sps:$4 sm:$0xff]  }
 0x866   : > { %8212 = vmatprep.subr.bf16.mxu1 %v13592_v16  ;;  %v13668_v16 = vld [vmem:[#allocation12 + $0x2f0] ss:$8 sps:$4 sm:$0xff]  }
 0x867   : > { %8690 = vmatpush1.bf16.msra.mxu0 %v13587_v35  ;;  %v13676_v35 = vld [vmem:[#allocation12 + $0x384] ss:$8 sps:$4 sm:$0xff]  }
 0x868   : > { %8691 = vmatprep.subr.bf16.mxu0 %v13595_v8  ;;  %v7620_v8 = vmax.f32 %v7591_v6, %v7599_v50  ;;  %v13754_v6 = vld [vmem:[#allocation12 + $0x4d4] ss:$8 sps:$4 sm:$0xff]   ;;  %v13749_v50 = vld [vmem:[#allocation12 + $0x640] ss:$8 sps:$4 sm:$0xff]  }
 0x869   : > { %8213 = vmatpush1.bf16.msra.mxu1 %v13590_v29  ;;  %v13671_v29 = vld [vmem:[#allocation12 + $0x470] ss:$8 sps:$4 sm:$0xff]  }
 0x86a   : > { %8214 = vmatprep.subr.bf16.mxu1 %v13598_v22  ;;  %v7628_v22 = vmax.f32 %v7620_v8, %v7624_v27  ;;  %v13752_v27 = vld [vmem:[#allocation12 + $0x4d0] ss:$8 sps:$4 sm:$0xff]   ;;  %v13763_v8 = vld [vmem:[#allocation12 + $0x664] ss:$8 sps:$4 sm:$0xff]  }
 0x86b   : > { %8692 = vmatpush1.bf16.msra.mxu0 %v13593_v33  ;;  %v13679_v33 = vld [vmem:[#allocation12 + $0x504] ss:$8 sps:$4 sm:$0xff]  }
 0x86c   : > { %8693 = vmatprep.subr.bf16.mxu0 %v13601_v44  ;;  %v13674_v44 = vld [vmem:[#allocation12 + $0x380] ss:$8 sps:$4 sm:$0xff]  }
 0x86d   : > { %8215 = vmatpush1.bf16.msra.mxu1 %v13596_v15  ;;  %v8444_v15 = vshrl.u32 %v15322_v58, 16  ;;  %v13739_v58 = vld [vmem:[#allocation12 + $0x624] ss:$8 sps:$4 sm:$0xff]  }
 0x86e   : > { %8216 = vmatprep.subr.bf16.mxu1 %v13604_v3  ;;  %v13682_v3 = vld [vmem:[#allocation12 + $0x394] ss:$8 sps:$4 sm:$0xff]  }
 0x86f   : > { %8694 = vmatpush1.bf16.msra.mxu0 %v13599_v42  ;;  %v13677_v42 = vld [vmem:[#allocation12 + $0x500] ss:$8 sps:$4 sm:$0xff]  }
 0x870   : > { %8695 = vmatprep.subr.bf16.mxu0 %v13607_v23  ;;  %v15335_v23 = vpack.c.bf16 %v7628_v22, %v7628_v22  ;;  %v13758_v22 = vld [vmem:[#allocation12 + $0x4e0] ss:$8 sps:$4 sm:$0xff]  }
 0x871   : > { %8217 = vmatpush1.bf16.msra.mxu1 %v13602_v37  ;;  %v13685_v37 = vld [vmem:[#allocation12 + $0x514] ss:$8 sps:$4 sm:$0xff]  }
 0x872   : > { %8218 = vmatprep.subr.bf16.mxu1 %v13610_v38  ;;  %v13680_v38 = vld [vmem:[#allocation12 + $0x390] ss:$8 sps:$4 sm:$0xff]  }
 0x873   : > { %8696 = vmatpush1.bf16.msra.mxu0 %v13605_v10  ;;  %v13688_v10 = vld [vmem:[#allocation12 + $0x3a4] ss:$8 sps:$4 sm:$0xff]  }
 0x874   : > { %8697 = vmatprep.subr.bf16.mxu0 %v13613_v61  ;;  %v13683_v61 = vld [vmem:[#allocation12 + $0x510] ss:$8 sps:$4 sm:$0xff]  }
 0x875   : > { %8219 = vmatpush1.bf16.msra.mxu1 %v13608_v7  ;;  %v13691_v7 = vld [vmem:[#allocation12 + $0x524] ss:$8 sps:$4 sm:$0xff]  }
 0x876   : > { %8220 = vmatprep.subr.bf16.mxu1 %v13616_v55  ;;  %v13686_v55 = vld [vmem:[#allocation12 + $0x3a0] ss:$8 sps:$4 sm:$0xff]  }
 0x877   : > { %8698 = vmatpush1.bf16.msra.mxu0 %v13611_v21  ;;  %v13694_v21 = vld [vmem:[#allocation12 + $0x3b4] ss:$8 sps:$4 sm:$0xff]  }
 0x878   : > { %8699 = vmatprep.subr.bf16.mxu0 %v13619_v2  ;;  %v13689_v2 = vld [vmem:[#allocation12 + $0x520] ss:$8 sps:$4 sm:$0xff]  }
 0x879   : > { %8221 = vmatpush1.bf16.msra.mxu1 %v13614_v4  ;;  %v13697_v4 = vld [vmem:[#allocation12 + $0x534] ss:$8 sps:$4 sm:$0xff]  }
 0x87a   : > { %8222 = vmatprep.subr.bf16.mxu1 %v13622_v26  ;;  %v13692_v26 = vld [vmem:[#allocation12 + $0x3b0] ss:$8 sps:$4 sm:$0xff]  }
 0x87b   : > { %8700 = vmatpush1.bf16.msra.mxu0 %v13617_v18  ;;  %v13700_v18 = vld [vmem:[#allocation12 + $0x3c4] ss:$8 sps:$4 sm:$0xff]  }
 0x87c   : > { %8701 = vmatprep.subr.bf16.mxu0 %v13625_v46  ;;  %v13695_v46 = vld [vmem:[#allocation12 + $0x530] ss:$8 sps:$4 sm:$0xff]  }
 0x87d   : > { %8223 = vmatpush1.bf16.msra.mxu1 %v13620_v30  ;;  %v13703_v30 = vld [vmem:[#allocation12 + $0x544] ss:$8 sps:$4 sm:$0xff]  }
 0x87e   : > { %8527 = vmatprep.subr.bf16.mxu1 %v13628_v19  ;;  %v13698_v19 = vld [vmem:[#allocation12 + $0x3c0] ss:$8 sps:$4 sm:$0xff]  }
 0x87f   : > { %8702 = vmatpush1.bf16.msra.mxu0 %v13623_v0  ;;  %v13706_v0 = vld [vmem:[#allocation12 + $0x3d4] ss:$8 sps:$4 sm:$0xff]  }
 0x880   : > { %8241 = vmatmul.mubr.bf16.vlgmr.msra.gmra.mrb[40].mxu1 %v8126_v52  ;;  %9004 = vmatprep.subr.bf16.mxu0 %v13631_v28  ;;  %v13701_v28 = vld [vmem:[#allocation12 + $0x540] ss:$8 sps:$4 sm:$0xff]   ;;  %v13704_v52 = vld [vmem:[#allocation12 + $0x3d0] ss:$8 sps:$4 sm:$0xff]  }
 0x881   : > { %8528 = vmatpush1.bf16.msra.mxu1 %v13626_v12  ;;  %8559 = vmatprep.mubr.bf16.mxu1 %v14075_v53  ;;  %v13709_v12 = vld [vmem:[#allocation12 + $0x554] ss:$8 sps:$4 sm:$0xff]  }
 0x882   : > { %8720 = vmatmul.mubr.bf16.vlgmr.msra.gmra.mrb[56].mxu0 %v8605_v48  ;;  %8529 = vmatprep.subr.bf16.mxu1 %v13634_v49  ;;  %v13712_v49 = vld [vmem:[#allocation12 + $0x3e4] ss:$8 sps:$4 sm:$0xff]  }
 0x883   : > { %9005 = vmatpush1.bf16.msra.mxu0 %v13629_v62  ;;  %9036 = vmatprep.mubr.bf16.mxu0 %v14075_v53  ;;  %v13707_v62 = vld [vmem:[#allocation12 + $0x550] ss:$8 sps:$4 sm:$0xff]   ;;  %v13715_v48 = vld [vmem:[#allocation12 + $0x564] ss:$8 sps:$4 sm:$0xff]  }
 0x884   : > { %9006 = vmatprep.subr.bf16.mxu0 %v13637_v13  ;;  %v13710_v13 = vld [vmem:[#allocation12 + $0x3e0] ss:$8 sps:$4 sm:$0xff]  }
 0x885   : > { %8530 = vmatpush1.bf16.msra.mxu1 %v13632_v5  ;;  %v13718_v5 = vld [vmem:[#allocation12 + $0x3f4] ss:$8 sps:$4 sm:$0xff]  }
 0x886   : > { %8531 = vmatprep.subr.bf16.mxu1 %v13640_v9  ;;  %v13713_v9 = vld [vmem:[#allocation12 + $0x560] ss:$8 sps:$4 sm:$0xff]  }
 0x887   : > { %9007 = vmatpush1.bf16.msra.mxu0 %v13635_v45  ;;  %v13721_v45 = vld [vmem:[#allocation12 + $0x574] ss:$8 sps:$4 sm:$0xff]  }
 0x888   : > { %9008 = vmatprep.subr.bf16.mxu0 %v13643_v39  ;;  %v13716_v39 = vld [vmem:[#allocation12 + $0x3f0] ss:$8 sps:$4 sm:$0xff]  }
 0x889   : > { %8532 = vmatpush1.bf16.msra.mxu1 %v13638_v1  ;;  %v13724_v1 = vld [vmem:[#allocation12 + $0x484] ss:$8 sps:$4 sm:$0xff]  }
 0x88a   : > { %8533 = vmatprep.subr.bf16.mxu1 %v13646_v14  ;;  %v13719_v14 = vld [vmem:[#allocation12 + $0x570] ss:$8 sps:$4 sm:$0xff]  }
 0x88b   : > { %9009 = vmatpush1.bf16.msra.mxu0 %v13641_v60  ;;  %v13727_v60 = vld [vmem:[#allocation12 + $0x604] ss:$8 sps:$4 sm:$0xff]  }
 0x88c   : > { %9010 = vmatprep.subr.bf16.mxu0 %v13649_v47  ;;  %v13722_v47 = vld [vmem:[#allocation12 + $0x480] ss:$8 sps:$4 sm:$0xff]  }
 0x88d   : > { %8534 = vmatpush1.bf16.msra.mxu1 %v13644_v24  ;;  %v8764_v24 = vrot.slane %v8444_v15, 1 }
 0x88e   : > { %8535 = vmatprep.subr.bf16.mxu1 %v13652_v36  ;;  %v13730_v36 = vld [vmem:[#allocation12 + $0x494] ss:$8 sps:$4 sm:$0xff]  }
 0x88f   : > { %9011 = vmatpush1.bf16.msra.mxu0 %v13647_v59  ;;  %v13725_v59 = vld [vmem:[#allocation12 + $0x600] ss:$8 sps:$4 sm:$0xff]  }
 0x890   : > { %9012 = vmatprep.subr.bf16.mxu0 %v13655_v20  ;;  %v9243_v20 = vrot.slane %v15335_v23, 1 }
 0x891   : > { %8536 = vmatpush1.bf16.msra.mxu1 %v13650_v17  ;;  %v13733_v17 = vld [vmem:[#allocation12 + $0x614] ss:$8 sps:$4 sm:$0xff]  }
 0x892   : > { %8537 = vmatprep.subr.bf16.mxu1 %v13658_v57  ;;  %v13728_v57 = vld [vmem:[#allocation12 + $0x490] ss:$8 sps:$4 sm:$0xff]  }
 0x893   : > { %9013 = vmatpush1.bf16.msra.mxu0 %v13653_v11  ;;  %v13736_v11 = vld [vmem:[#allocation12 + $0x4a4] ss:$8 sps:$4 sm:$0xff]  }
 0x894   : > { %9014 = vmatprep.subr.bf16.mxu0 %v13661_v43  ;;  %v13731_v43 = vld [vmem:[#allocation12 + $0x610] ss:$8 sps:$4 sm:$0xff]  }
 0x895   : > { %8538 = vmatpush1.bf16.msra.mxu1 %v13656_v31  ;;  %v13734_v31 = vld [vmem:[#allocation12 + $0x4a0] ss:$8 sps:$4 sm:$0xff]  }
 0x896   : > { %8539 = vmatprep.subr.bf16.mxu1 %v13664_v63  ;;  %v13742_v63 = vld [vmem:[#allocation12 + $0x4b4] ss:$8 sps:$4 sm:$0xff]  }
 0x897   : > { %9015 = vmatpush1.bf16.msra.mxu0 %v13659_v56  ;;  %v13737_v56 = vld [vmem:[#allocation12 + $0x620] ss:$8 sps:$4 sm:$0xff]  }
 0x898   : > { %9016 = vmatprep.subr.bf16.mxu0 %v13667_v51  ;;  %v13740_v51 = vld [vmem:[#allocation12 + $0x4b0] ss:$8 sps:$4 sm:$0xff]  }
 0x899   : > { %8540 = vmatpush1.bf16.msra.mxu1 %v13662_v32  ;;  %v13745_v32 = vld [vmem:[#allocation12 + $0x634] ss:$8 sps:$4 sm:$0xff]  }
 0x89a   : > { %8541 = vmatprep.subr.bf16.mxu1 %v13670_v25  ;;  %v13746_v25 = vld [vmem:[#allocation12 + $0x4c0] ss:$8 sps:$4 sm:$0xff]  }
 0x89b   : > { %9017 = vmatpush1.bf16.msra.mxu0 %v13665_v40  ;;  %v13751_v40 = vld [vmem:[#allocation12 + $0x644] ss:$8 sps:$4 sm:$0xff]  }
 0x89c   : > { %9018 = vmatprep.subr.bf16.mxu0 %v13673_v34  ;;  %v13757_v34 = vld [vmem:[#allocation12 + $0x654] ss:$8 sps:$4 sm:$0xff]  }
 0x89d   : > { %8542 = vmatpush1.bf16.msra.mxu1 %v13668_v16  ;;  %v13760_v16 = vld [vmem:[#allocation12 + $0x4e4] ss:$8 sps:$4 sm:$0xff]  }
 0x89e   : > { %8846 = vmatprep.subr.bf16.mxu1 %v13676_v35  ;;  %v13755_v35 = vld [vmem:[#allocation12 + $0x650] ss:$8 sps:$4 sm:$0xff]  }
 0x89f   : > { %9019 = vmatpush1.bf16.msra.mxu0 %v13671_v29  ;;  %v7609_v29 = vld [vmem:[#allocation7 + $0x38] ss:$2 sm:$0xf] }
 0x8a0   : > { %8560 = vmatmul.mubr.bf16.vlgmr.msra.gmra.mrb[44].mxu1 %v8444_v15  ;;  %9325 = vmatprep.subr.bf16.mxu0 %v13679_v33  ;;  %v7617_v33 = vld [vmem:[#allocation7 + $0x39] ss:$2 sm:$0xf]  ;;  %v7593_v15 = vld [vmem:[#allocation7 + $0x30] ss:$2 sm:$0xf] }
 0x8a1   : > { %8847 = vmatpush1.bf16.msra.mxu1 %v13674_v44  ;;  %8878 = vmatprep.mubr.bf16.mxu1 %v14075_v53  ;;  %v13766_v44 = vld [vmem:[#allocation12 + $0x4f4] ss:$8 sps:$4 sm:$0xff]  }
 0x8a2   : > { %9037 = vmatmul.mubr.bf16.vlgmr.msra.gmra.mrb[60].mxu0 %v15335_v23  ;;  %8848 = vmatprep.subr.bf16.mxu1 %v13682_v3  ;;  %v13761_v3 = vld [vmem:[#allocation12 + $0x660] ss:$8 sps:$4 sm:$0xff]  }
 0x8a3   : > { %9326 = vmatpush1.bf16.msra.mxu0 %v13677_v42  ;;  %9357 = vmatprep.mubr.bf16.mxu0 %v14075_v53  ;;  %v7601_v42 = vld [vmem:[#allocation7 + $0x31] ss:$2 sm:$0xf] }
 0x8a4   : > { %9327 = vmatprep.subr.bf16.mxu0 %v13685_v37  ;;  %v13769_v37 = vld [vmem:[#allocation12 + $0x674] ss:$8 sps:$4 sm:$0xff]  }
 0x8a5   : > { %8849 = vmatpush1.bf16.msra.mxu1 %v13680_v38  ;;  %v7625_v38 = vmax.f32 %v7609_v29, %v7617_v33 }
 0x8a6   : > { %8850 = vmatprep.subr.bf16.mxu1 %v13688_v10  ;;  %v13764_v10 = vld [vmem:[#allocation12 + $0x4f0] ss:$8 sps:$4 sm:$0xff]  }
 0x8a7   : > { %9328 = vmatpush1.bf16.msra.mxu0 %v13683_v61  ;;  %v13772_v61 = vld [vmem:[#allocation12 + $0x584] ss:$8 sps:$4 sm:$0xff]  }
 0x8a8   : > { %9329 = vmatprep.subr.bf16.mxu0 %v13691_v7  ;;  %v7621_v7 = vmax.f32 %v7593_v15, %v7601_v42  ;;  %v13836_v15 = vld [vmem:[#allocation12 + $0x6e0] ss:$8 sps:$4 sm:$0xff]  }
 0x8a9   : > { %8851 = vmatpush1.bf16.msra.mxu1 %v13686_v55  ;;  %v13767_v55 = vld [vmem:[#allocation12 + $0x670] ss:$8 sps:$4 sm:$0xff]  }
 0x8aa   : > { %8852 = vmatprep.subr.bf16.mxu1 %v13694_v21  ;;  %v7629_v21 = vmax.f32 %v7621_v7, %v7625_v38  ;;  %v13839_v7 = vld [vmem:[#allocation12 + $0x6f0] ss:$8 sps:$4 sm:$0xff]  }
 0x8ab   : > { %9330 = vmatpush1.bf16.msra.mxu0 %v13689_v2  ;;  %v13775_v2 = vld [vmem:[#allocation12 + $0x704] ss:$8 sps:$4 sm:$0xff]  }
 0x8ac   : > { %9331 = vmatprep.subr.bf16.mxu0 %v13697_v4  ;;  %v13770_v4 = vld [vmem:[#allocation12 + $0x580] ss:$8 sps:$4 sm:$0xff]  }
 0x8ad   : > { %8853 = vmatpush1.bf16.msra.mxu1 %v13692_v26  ;;  %v9082_v26 = vshrl.u32 %v15335_v23, 16  ;;  %v13827_v23 = vld [vmem:[#allocation12 + $0x6b0] ss:$8 sps:$4 sm:$0xff]  }
 0x8ae   : > { %8854 = vmatprep.subr.bf16.mxu1 %v13700_v18  ;;  %v13778_v18 = vld [vmem:[#allocation12 + $0x594] ss:$8 sps:$4 sm:$0xff]  }
 0x8af   : > { %9332 = vmatpush1.bf16.msra.mxu0 %v13695_v46  ;;  %v13773_v46 = vld [vmem:[#allocation12 + $0x700] ss:$8 sps:$4 sm:$0xff]  }
 0x8b0   : > { %9333 = vmatprep.subr.bf16.mxu0 %v13703_v30  ;;  %v15348_v30 = vpack.c.bf16 %v7629_v21, %v7629_v21  ;;  %v13842_v21 = vld [vmem:[#allocation12 + $0x780] ss:$8 sps:$4 sm:$0xff]  }
 0x8b1   : > { %8855 = vmatpush1.bf16.msra.mxu1 %v13698_v19  ;;  %v13781_v19 = vld [vmem:[#allocation12 + $0x714] ss:$8 sps:$4 sm:$0xff]  }
 0x8b2   : > { %8856 = vmatprep.subr.bf16.mxu1 %v13706_v0  ;;  %v13776_v0 = vld [vmem:[#allocation12 + $0x590] ss:$8 sps:$4 sm:$0xff]  }
 0x8b3   : > { %9334 = vmatpush1.bf16.msra.mxu0 %v13701_v28  ;;  %v13784_v28 = vld [vmem:[#allocation12 + $0x5a4] ss:$8 sps:$4 sm:$0xff]  }
 0x8b4   : > { %9335 = vmatprep.subr.bf16.mxu0 %v13709_v12  ;;  %v13779_v12 = vld [vmem:[#allocation12 + $0x710] ss:$8 sps:$4 sm:$0xff]  }
 0x8b5   : > { %8857 = vmatpush1.bf16.msra.mxu1 %v13704_v52  ;;  %v13787_v52 = vld [vmem:[#allocation12 + $0x724] ss:$8 sps:$4 sm:$0xff]  }
 0x8b6   : > { %8858 = vmatprep.subr.bf16.mxu1 %v13712_v49  ;;  %v13782_v49 = vld [vmem:[#allocation12 + $0x5a0] ss:$8 sps:$4 sm:$0xff]  }
 0x8b7   : > { %9336 = vmatpush1.bf16.msra.mxu0 %v13707_v62  ;;  %v13790_v62 = vld [vmem:[#allocation12 + $0x5b4] ss:$8 sps:$4 sm:$0xff]  }
 0x8b8   : > { %9337 = vmatprep.subr.bf16.mxu0 %v13715_v48  ;;  %v13785_v48 = vld [vmem:[#allocation12 + $0x720] ss:$8 sps:$4 sm:$0xff]  }
 0x8b9   : > { %8859 = vmatpush1.bf16.msra.mxu1 %v13710_v13  ;;  %v13793_v13 = vld [vmem:[#allocation12 + $0x734] ss:$8 sps:$4 sm:$0xff]  }
 0x8ba   : > { %8860 = vmatprep.subr.bf16.mxu1 %v13718_v5  ;;  %v13788_v5 = vld [vmem:[#allocation12 + $0x5b0] ss:$8 sps:$4 sm:$0xff]  }
 0x8bb   : > { %9338 = vmatpush1.bf16.msra.mxu0 %v13713_v9  ;;  %v13796_v9 = vld [vmem:[#allocation12 + $0x5c4] ss:$8 sps:$4 sm:$0xff]  }
 0x8bc   : > { %9339 = vmatprep.subr.bf16.mxu0 %v13721_v45  ;;  %v13791_v45 = vld [vmem:[#allocation12 + $0x730] ss:$8 sps:$4 sm:$0xff]  }
 0x8bd   : > { %8861 = vmatpush1.bf16.msra.mxu1 %v13716_v39  ;;  %v13799_v39 = vld [vmem:[#allocation12 + $0x744] ss:$8 sps:$4 sm:$0xff]  }
 0x8be   : > { %9165 = vmatprep.subr.bf16.mxu1 %v13724_v1  ;;  %v13794_v1 = vld [vmem:[#allocation12 + $0x5c0] ss:$8 sps:$4 sm:$0xff]  }
 0x8bf   : > { %9340 = vmatpush1.bf16.msra.mxu0 %v13719_v14  ;;  %v13802_v14 = vld [vmem:[#allocation12 + $0x5d4] ss:$8 sps:$4 sm:$0xff]  }
 0x8c0   : > { %8879 = vmatmul.mubr.bf16.vlgmr.msra.gmra.mrb[48].mxu1 %v8764_v24  ;;  %9642 = vmatprep.subr.bf16.mxu0 %v13727_v60  ;;  %v13797_v60 = vld [vmem:[#allocation12 + $0x740] ss:$8 sps:$4 sm:$0xff]   ;;  %v13800_v24 = vld [vmem:[#allocation12 + $0x5d0] ss:$8 sps:$4 sm:$0xff]  }
 0x8c1   : > { %9166 = vmatpush1.bf16.msra.mxu1 %v13722_v47  ;;  %9197 = vmatprep.mubr.bf16.mxu1 %v14075_v53  ;;  %v13805_v47 = vld [vmem:[#allocation12 + $0x754] ss:$8 sps:$4 sm:$0xff]  }
 0x8c2   : > { %9358 = vmatmul.mubr.bf16.vlgmr.msra.gmra.mrb[64].mxu0 %v9243_v20  ;;  %9167 = vmatprep.subr.bf16.mxu1 %v13730_v36  ;;  %v13808_v36 = vld [vmem:[#allocation12 + $0x5e4] ss:$8 sps:$4 sm:$0xff]  }
 0x8c3   : > { %9643 = vmatpush1.bf16.msra.mxu0 %v13725_v59  ;;  %9674 = vmatprep.mubr.bf16.mxu0 %v14075_v53  ;;  %v13803_v59 = vld [vmem:[#allocation12 + $0x750] ss:$8 sps:$4 sm:$0xff]   ;;  %v13811_v20 = vld [vmem:[#allocation12 + $0x764] ss:$8 sps:$4 sm:$0xff]  }
 0x8c4   : > { %9644 = vmatprep.subr.bf16.mxu0 %v13733_v17  ;;  %v13806_v17 = vld [vmem:[#allocation12 + $0x5e0] ss:$8 sps:$4 sm:$0xff]  }
 0x8c5   : > { %9168 = vmatpush1.bf16.msra.mxu1 %v13728_v57  ;;  %v13814_v57 = vld [vmem:[#allocation12 + $0x5f4] ss:$8 sps:$4 sm:$0xff]  }
 0x8c6   : > { %9169 = vmatprep.subr.bf16.mxu1 %v13736_v11  ;;  %v13809_v11 = vld [vmem:[#allocation12 + $0x760] ss:$8 sps:$4 sm:$0xff]  }
 0x8c7   : > { %9645 = vmatpush1.bf16.msra.mxu0 %v13731_v43  ;;  %v13817_v43 = vld [vmem:[#allocation12 + $0x774] ss:$8 sps:$4 sm:$0xff]  }
 0x8c8   : > { %9646 = vmatprep.subr.bf16.mxu0 %v13739_v58  ;;  %v13812_v58 = vld [vmem:[#allocation12 + $0x5f0] ss:$8 sps:$4 sm:$0xff]  }
 0x8c9   : > { %9170 = vmatpush1.bf16.msra.mxu1 %v13734_v31  ;;  %v13820_v31 = vld [vmem:[#allocation12 + $0x684] ss:$8 sps:$4 sm:$0xff]  }
 0x8ca   : > { %9171 = vmatprep.subr.bf16.mxu1 %v13742_v63  ;;  %v13815_v63 = vld [vmem:[#allocation12 + $0x770] ss:$8 sps:$4 sm:$0xff]  }
 0x8cb   : > { %9647 = vmatpush1.bf16.msra.mxu0 %v13737_v56  ;;  %v13818_v56 = vld [vmem:[#allocation12 + $0x680] ss:$8 sps:$4 sm:$0xff]  }
 0x8cc   : > { %9648 = vmatprep.subr.bf16.mxu0 %v13745_v32  ;;  %v9402_v32 = vrot.slane %v9082_v26, 1 }
 0x8cd   : > { %9172 = vmatpush1.bf16.msra.mxu1 %v13740_v51  ;;  %v13823_v51 = vld [vmem:[#allocation12 + $0x694] ss:$8 sps:$4 sm:$0xff]  }
 0x8ce   : > { %9173 = vmatprep.subr.bf16.mxu1 %v13748_v41  ;;  %v9881_v41 = vrot.slane %v15348_v30, 1 }
 0x8cf   : > { %9649 = vmatpush1.bf16.msra.mxu0 %v13743_v54  ;;  %v13821_v54 = vld [vmem:[#allocation12 + $0x690] ss:$8 sps:$4 sm:$0xff]  }
 0x8d0   : > { %9650 = vmatprep.subr.bf16.mxu0 %v13751_v40  ;;  %v13826_v40 = vld [vmem:[#allocation12 + $0x6a4] ss:$8 sps:$4 sm:$0xff]  }
 0x8d1   : > { %9174 = vmatpush1.bf16.msra.mxu1 %v13746_v25  ;;  %v13824_v25 = vld [vmem:[#allocation12 + $0x6a0] ss:$8 sps:$4 sm:$0xff]  }
 0x8d2   : > { %9175 = vmatprep.subr.bf16.mxu1 %v13754_v6  ;;  %v13829_v6 = vld [vmem:[#allocation12 + $0x6b4] ss:$8 sps:$4 sm:$0xff]  }
 0x8d3   : > { %9651 = vmatpush1.bf16.msra.mxu0 %v13749_v50  ;;  %v13832_v50 = vld [vmem:[#allocation12 + $0x6c4] ss:$8 sps:$4 sm:$0xff]  }
 0x8d4   : > { %9652 = vmatprep.subr.bf16.mxu0 %v13757_v34  ;;  %v13830_v34 = vld [vmem:[#allocation12 + $0x6c0] ss:$8 sps:$4 sm:$0xff]  }
 0x8d5   : > { %9176 = vmatpush1.bf16.msra.mxu1 %v13752_v27  ;;  %v13835_v27 = vld [vmem:[#allocation12 + $0x6d4] ss:$8 sps:$4 sm:$0xff]  }
 0x8d6   : > { %9177 = vmatprep.subr.bf16.mxu1 %v13760_v16  ;;  %v13833_v16 = vld [vmem:[#allocation12 + $0x6d0] ss:$8 sps:$4 sm:$0xff]  }
 0x8d7   : > { %9653 = vmatpush1.bf16.msra.mxu0 %v13755_v35  ;;  %v13838_v35 = vld [vmem:[#allocation12 + $0x6e4] ss:$8 sps:$4 sm:$0xff]  }
 0x8d8   : > { %9654 = vmatprep.subr.bf16.mxu0 %v13763_v8 }
 0x8d9   : > { %9178 = vmatpush1.bf16.msra.mxu1 %v13758_v22 }
 0x8da   : > { %9179 = vmatprep.subr.bf16.mxu1 %v13766_v44 }
 0x8db   : > { %9655 = vmatpush1.bf16.msra.mxu0 %v13761_v3 }
 0x8dc   : > { %9656 = vmatprep.subr.bf16.mxu0 %v13769_v37  ;;  %v13841_v37 = vld [vmem:[#allocation12 + $0x6f4] ss:$8 sps:$4 sm:$0xff]  }
 0x8dd   : > { %9180 = vmatpush1.bf16.msra.mxu1 %v13764_v10 }
 0x8de   : > { %9484 = vmatprep.subr.bf16.mxu1 %v13772_v61 }
 0x8df   : > { %9657 = vmatpush1.bf16.msra.mxu0 %v13767_v55  ;;  %v13844_v55 = vld [vmem:[#allocation12 + $0x784] ss:$8 sps:$4 sm:$0xff]  }
 0x8e0   : > { %9198 = vmatmul.mubr.bf16.vlgmr.msra.gmra.mrb[52].mxu1 %v9082_v26  ;;  %9963 = vmatprep.subr.bf16.mxu0 %v13775_v2  ;;  %v9720_v2 = vshrl.u32 %v15348_v30, 16  ;;  %v13845_v26 = vld [vmem:[#allocation12 + $0x790] ss:$8 sps:$4 sm:$0xff]  }
 0x8e1   : > { %9485 = vmatpush1.bf16.msra.mxu1 %v13770_v4  ;;  %9516 = vmatprep.mubr.bf16.mxu1 %v14075_v53  ;;  %v13847_v4 = vld [vmem:[#allocation12 + $0x794] ss:$8 sps:$4 sm:$0xff]  }
 0x8e2   : > { %9675 = vmatmul.mubr.bf16.vlgmr.msra.gmra.mrb[68].mxu0 %v15348_v30  ;;  %9486 = vmatprep.subr.bf16.mxu1 %v13778_v18  ;;  %v13850_v18 = vld [vmem:[#allocation12 + $0x7a4] ss:$8 sps:$4 sm:$0xff]   ;;  %v13851_v30 = vld [vmem:[#allocation12 + $0x7b0] ss:$8 sps:$4 sm:$0xff]  }
 0x8e3   : > { %9964 = vmatpush1.bf16.msra.mxu0 %v13773_v46  ;;  %9995 = vmatprep.mubr.bf16.mxu0 %v14075_v53  ;;  %v14076_v46 = vmov 1966171168  }
 0x8e4   : > { %9965 = vmatprep.subr.bf16.mxu0 %v13781_v19  ;;  %v7773_v19 = vunpack.c.l.s4 %v14076_v46 }
 0x8e5   : > { %9487 = vmatpush1.bf16.msra.mxu1 %v13776_v0  ;;  %v7775_v0 = vlaneseq }
 0x8e6   : > { %9488 = vmatprep.subr.bf16.mxu1 %v13784_v28  ;;  %v13848_v28 = vld [vmem:[#allocation12 + $0x7a0] ss:$8 sps:$4 sm:$0xff]  }
 0x8e7   : > { %9966 = vmatpush1.bf16.msra.mxu0 %v13779_v12  ;;  %v13853_v12 = vld [vmem:[#allocation12 + $0x7b4] ss:$8 sps:$4 sm:$0xff]  }
 0x8e8   : > { %9967 = vmatprep.subr.bf16.mxu0 %v13787_v52  ;;  %v7774_v52 = vunpack.c.0.s8 %v7773_v19 }
 0x8e9   : > { %9489 = vmatpush1.bf16.msra.mxu1 %v13782_v49  ;;  %v15359_v49 = vshrl.u32 %v7775_v0, 7 }
 0x8ea   : > { %9490 = vmatprep.subr.bf16.mxu1 %v13790_v62  ;;  %v13856_v62 = vld [vmem:[#allocation12 + $0x7c4] ss:$8 sps:$4 sm:$0xff]  }
 0x8eb   : > { %9968 = vmatpush1.bf16.msra.mxu0 %v13785_v48  ;;  %v15362_v48 = vsub.s32 %v7774_v52, %v15359_v49 }
 0x8ec   : > { %9969 = vmatprep.subr.bf16.mxu0 %v13793_v13  ;;  %v13859_v13 = vld [vmem:[#allocation12 + $0x7d4] ss:$8 sps:$4 sm:$0xff]  }
 0x8ed   : > { %9491 = vmatpush1.bf16.msra.mxu1 %v13788_v5 }
 0x8ee   : > { %9492 = vmatprep.subr.bf16.mxu1 %v13796_v9  ;;  %v13857_v9 = vld [vmem:[#allocation12 + $0x7d0] ss:$8 sps:$4 sm:$0xff]  }
 0x8ef   : > { %9970 = vmatpush1.bf16.msra.mxu0 %v13791_v45  ;;  %v13862_v45 = vld [vmem:[#allocation12 + $0x7e4] ss:$8 sps:$4 sm:$0xff]  }
 0x8f0   : > { %9971 = vmatprep.subr.bf16.mxu0 %v13799_v39 }
 0x8f1   : > { %9493 = vmatpush1.bf16.msra.mxu1 %v13794_v1 }
 0x8f2   : > { %9494 = vmatprep.subr.bf16.mxu1 %v13802_v14 }
 0x8f3   : > { %9972 = vmatpush1.bf16.msra.mxu0 %v13797_v60 }
 0x8f4   : > { %9973 = vmatprep.subr.bf16.mxu0 %v13805_v47 }
 0x8f5   : > { %9495 = vmatpush1.bf16.msra.mxu1 %v13800_v24 }
 0x8f6   : > { %9496 = vmatprep.subr.bf16.mxu1 %v13808_v36  ;;  %v13860_v36 = vld [vmem:[#allocation12 + $0x7e0] ss:$8 sps:$4 sm:$0xff]  }
 0x8f7   : > { %9974 = vmatpush1.bf16.msra.mxu0 %v13803_v59  ;;  %v7630_v59 = vld [vmem:[%s15520_s10] sm:$0x3] }
 0x8f8   : > { %9975 = vmatprep.subr.bf16.mxu0 %v13811_v20 }
 0x8f9   : > { %9497 = vmatpush1.bf16.msra.mxu1 %v13806_v17 }
 0x8fa   : > { %9498 = vmatprep.subr.bf16.mxu1 %v13814_v57  ;;  %v13865_v57 = vld [vmem:[#allocation12 + $0x7f4] ss:$8 sps:$4 sm:$0xff]  }
 0x8fb   : > { %9976 = vmatpush1.bf16.msra.mxu0 %v13809_v11 }
 0x8fc   : > { %9977 = vmatprep.subr.bf16.mxu0 %v13817_v43 }
 0x8fd   : > { %9499 = vmatpush1.bf16.msra.mxu1 %v13812_v58 }
 0x8fe   : > { %9803 = vmatprep.subr.bf16.mxu1 %v13820_v31 }
 0x8ff   : > { %9978 = vmatpush1.bf16.msra.mxu0 %v13815_v63 }
 0x900   : > { %9517 = vmatmul.mubr.bf16.vlgmr.msra.gmra.mrb[56].mxu1 %v9402_v32 }
 0x901   : > { %9804 = vmatpush1.bf16.msra.mxu1 %v13818_v56  ;;  %9835 = vmatprep.mubr.bf16.mxu1 %v14075_v53 }
 0x902   : > { %9996 = vmatmul.mubr.bf16.vlgmr.msra.gmra.mrb[72].mxu0 %v9881_v41  ;;  %9805 = vmatprep.subr.bf16.mxu1 %v13823_v51  ;;  %v13863_v51 = vld [vmem:[#allocation12 + $0x7f0] ss:$8 sps:$4 sm:$0xff]  }
 0x905   : > { %9806 = vmatpush1.bf16.msra.mxu1 %v13821_v54 }
 0x906   : > { %9807 = vmatprep.subr.bf16.mxu1 %v13826_v40 }
 0x909   : > { %9808 = vmatpush1.bf16.msra.mxu1 %v13824_v25  ;;  %v10040_v25 = vrot.slane %v9720_v2, 1 }
 0x90a   : > { %9809 = vmatprep.subr.bf16.mxu1 %v13829_v6 }
 0x90d   : > { %9810 = vmatpush1.bf16.msra.mxu1 %v13827_v23 }
 0x90e   : > { %9811 = vmatprep.subr.bf16.mxu1 %v13832_v50 }
 0x911   : > { %9812 = vmatpush1.bf16.msra.mxu1 %v13830_v34 }
 0x912   : > { %9813 = vmatprep.subr.bf16.mxu1 %v13835_v27 }
 0x913   : > { %v7762_v8 = vpop.f32.mrb[32].mxu1 }
 0x914   : > { %v7764_v29 = vpop.f32.mrb[33].mxu1 }
 0x915   : > { %v7771_v22 = vcombine.low %v7762_v8, %v7764_v29  ;;  %9814 = vmatpush1.bf16.msra.mxu1 %v13833_v16  ;;  %v7766_v33 = vpop.f32.mrb[34].mxu1  ;;  %v8083_v44 = vpop.f32.mrb[48].mxu0 }
 0x916   : > { %v7767_v3 = vpop.f32.mrb[35].mxu1  ;;  %v8085_v42 = vpop.f32.mrb[49].mxu0  ;;  %9815 = vmatprep.subr.bf16.mxu1 %v13838_v35 }
 0x917   : > { %v8092_v38 = vcombine.low %v8083_v44, %v8085_v42  ;;  %v8087_v10 = vpop.f32.mrb[50].mxu0  ;;  %v7778_v5 = vrot.slane %v7771_v22, %v15362_v48 }
 0x918   : > { %v8088_v61 = vpop.f32.mrb[51].mxu0  ;;  %v13871_v10 = vld [vmem:[%s15521_s11 + $0x14] ss:$8 sps:$4 sm:$0xff]  }
 0x919   : > { %9816 = vmatpush1.bf16.msra.mxu1 %v13836_v15  ;;  %v7785_v14 = vrot.slane %v7778_v5, %v15362_v48  ;;  %v8099_v11 = vrot.slane %v8092_v38, %v15362_v48  ;;  %v13868_v38 = vld [vmem:[%s15521_s11 + $0x4] ss:$8 sps:$4 sm:$0xff]  }
 0x91a   : > { %9817 = vmatprep.subr.bf16.mxu1 %v13841_v37  ;;  %v13866_v37 = vld [vmem:[%s15521_s11] ss:$8 sps:$4 sm:$0xff]   ;;  %10400 = vmatprep.subr.bf16.mxu0 %v13868_v38  ;;  %v13913_v38 = vld [vmem:[%s15521_s11 + $0xf4] ss:$8 sps:$4 sm:$0xff]  }
 0x91b   : > { %v7787_v56 = vadd.f32 %v7785_v14, %v7630_v59  ;;  %v8106_v41 = vrot.slane %v8099_v11, %v15362_v48  ;;  %10401 = vmatpush1.bf16.msra.mxu0 %v13866_v37  ;;  %v13881_v14 = vld [vmem:[%s15521_s11 + $0x50] ss:$8 sps:$4 sm:$0xff]   ;;  %v13889_v59 = vld [vmem:[%s15521_s11 + $0x74] ss:$8 sps:$4 sm:$0xff]   ;;  %v13908_v37 = vld [vmem:[%s15521_s11 + $0xe0] ss:$8 sps:$4 sm:$0xff]  }
 0x91c   : > { %10402 = vmatprep.subr.bf16.mxu0 %v13871_v10  ;;  %v13895_v11 = vld [vmem:[%s15521_s11 + $0x94] ss:$8 sps:$4 sm:$0xff]   ;;  %v13911_v10 = vld [vmem:[%s15521_s11 + $0xf0] ss:$8 sps:$4 sm:$0xff]  }
 0x91d   : > { %9818 = vmatpush1.bf16.msra.mxu1 %v13839_v7  ;;  %v13869_v7 = vld [vmem:[%s15521_s11 + $0x10] ss:$8 sps:$4 sm:$0xff]  }
 0x91e   : > { %10122 = vmatprep.subr.bf16.mxu1 %v13844_v55  ;;  %v13874_v55 = vld [vmem:[%s15521_s11 + $0x24] ss:$8 sps:$4 sm:$0xff]  }
 0x91f   : > { %10403 = vmatpush1.bf16.msra.mxu0 %v13869_v7  ;;  %v13915_v7 = vld [vmem:[#allocation13] sm:$0xff]  }
 0x920   : > { %9836 = vmatmul.mubr.bf16.vlgmr.msra.gmra.mrb[60].mxu1 %v9720_v2  ;;  %10404 = vmatprep.subr.bf16.mxu0 %v13874_v55  ;;  %v13877_v2 = vld [vmem:[%s15521_s11 + $0x34] ss:$8 sps:$4 sm:$0xff]  }
 0x921   : > { %10123 = vmatpush1.bf16.msra.mxu1 %v13842_v21  ;;  %10154 = vmatprep.mubr.bf16.mxu1 %v14075_v53  ;;  %v13854_v53 = vld [vmem:[#allocation12 + $0x7c0] ss:$8 sps:$4 sm:$0xff]   ;;  %v13872_v21 = vld [vmem:[%s15521_s11 + $0x20] ss:$8 sps:$4 sm:$0xff]  }
 0x922   : > { %10124 = vmatprep.subr.bf16.mxu1 %v13847_v4  ;;  %v13875_v4 = vld [vmem:[%s15521_s11 + $0x30] ss:$8 sps:$4 sm:$0xff]  }
 0x923   : > { %10405 = vmatpush1.bf16.msra.mxu0 %v13872_v21  ;;  %v13916_v55 = vld [vmem:[#allocation13 + $0x48] sm:$0xff]  }
 0x924   : > { %10406 = vmatprep.subr.bf16.mxu0 %v13877_v2  ;;  %v13917_v21 = vld [vmem:[#allocation13 + $0x8] sm:$0xff]   ;;  %v13918_v2 = vld [vmem:[#allocation13 + $0x50] sm:$0xff]  }
 0x925   : > { %10125 = vmatpush1.bf16.msra.mxu1 %v13845_v26 }
 0x926   : > { %10126 = vmatprep.subr.bf16.mxu1 %v13850_v18 }
 0x927   : > { %10407 = vmatpush1.bf16.msra.mxu0 %v13875_v4  ;;  %v13919_v4 = vld [vmem:[#allocation13 + $0x10] sm:$0xff]  }
 0x929   : > { %10127 = vmatpush1.bf16.msra.mxu1 %v13848_v28 }
 0x92a   : > { %10128 = vmatprep.subr.bf16.mxu1 %v13853_v12 }
 0x92d   : > { %10129 = vmatpush1.bf16.msra.mxu1 %v13851_v30 }
 0x92e   : > { %10130 = vmatprep.subr.bf16.mxu1 %v13856_v62 }
 0x931   : > { %10131 = vmatpush1.bf16.msra.mxu1 %v13854_v53 }
 0x932   : > { %10132 = vmatprep.subr.bf16.mxu1 %v13859_v13  ;;  %v13880_v13 = vld [vmem:[%s15521_s11 + $0x44] ss:$8 sps:$4 sm:$0xff]  }
 0x933   : > { %v7923_v39 = vpop.f32.mrb[36].mxu1  ;;  %10408 = vmatprep.subr.bf16.mxu0 %v13880_v13 }
 0x934   : > { %v7925_v1 = vpop.f32.mrb[37].mxu1 }
 0x935   : > { %v7932_v60 = vcombine.low %v7923_v39, %v7925_v1  ;;  %v7927_v47 = vpop.f32.mrb[38].mxu1  ;;  %v8400_v24 = vpop.f32.mrb[52].mxu0  ;;  %10133 = vmatpush1.bf16.msra.mxu1 %v13857_v9  ;;  %v13878_v9 = vld [vmem:[%s15521_s11 + $0x40] ss:$8 sps:$4 sm:$0xff]  }
 0x936   : > { %v7928_v20 = vpop.f32.mrb[39].mxu1  ;;  %v8402_v17 = vpop.f32.mrb[53].mxu0  ;;  %10134 = vmatprep.subr.bf16.mxu1 %v13862_v45  ;;  %10409 = vmatpush1.bf16.msra.mxu0 %v13878_v9  ;;  %v13886_v47 = vld [vmem:[%s15521_s11 + $0x64] ss:$8 sps:$4 sm:$0xff]  }
 0x937   : > { %v7939_v43 = vrot.slane %v7932_v60, %v15362_v48  ;;  %v8409_v58 = vcombine.low %v8400_v24, %v8402_v17  ;;  %v8404_v31 = vpop.f32.mrb[54].mxu0  ;;  %v13883_v60 = vld [vmem:[%s15521_s11 + $0x54] ss:$8 sps:$4 sm:$0xff]   ;;  %v13887_v20 = vld [vmem:[%s15521_s11 + $0x70] ss:$8 sps:$4 sm:$0xff]  }
 0x938   : > { %v8405_v63 = vpop.f32.mrb[55].mxu0  ;;  %10410 = vmatprep.subr.bf16.mxu0 %v13883_v60  ;;  %v13892_v17 = vld [vmem:[%s15521_s11 + $0x84] ss:$8 sps:$4 sm:$0xff]   ;;  %v13896_v31 = vld [vmem:[%s15521_s11 + $0xa0] ss:$8 sps:$4 sm:$0xff]  }
 0x939   : > { %v7946_v32 = vrot.slane %v7939_v43, %v15362_v48  ;;  %10135 = vmatpush1.bf16.msra.mxu1 %v13860_v36  ;;  %v8416_v8 = vrot.slane %v8409_v58, %v15362_v48  ;;  %v13884_v36 = vld [vmem:[%s15521_s11 + $0x60] ss:$8 sps:$4 sm:$0xff]   ;;  %v13893_v43 = vld [vmem:[%s15521_s11 + $0x90] ss:$8 sps:$4 sm:$0xff]   ;;  %v13898_v58 = vld [vmem:[%s15521_s11 + $0xa4] ss:$8 sps:$4 sm:$0xff]  }
 0x93a   : > { %10136 = vmatprep.subr.bf16.mxu1 %v13865_v57  ;;  %10411 = vmatpush1.bf16.msra.mxu0 %v13881_v14  ;;  %v13890_v57 = vld [vmem:[%s15521_s11 + $0x80] ss:$8 sps:$4 sm:$0xff]   ;;  %v13901_v63 = vld [vmem:[%s15521_s11 + $0xb4] ss:$8 sps:$4 sm:$0xff]  }
 0x93b   : > { %v7948_v54 = vadd.f32 %v7946_v32, %v7787_v56  ;;  %v8423_v3 = vrot.slane %v8416_v8, %v15362_v48  ;;  %10412 = vmatprep.subr.bf16.mxu0 %v13886_v47  ;;  %v13899_v56 = vld [vmem:[%s15521_s11 + $0xb0] ss:$8 sps:$4 sm:$0xff]   ;;  %v13902_v8 = vld [vmem:[%s15521_s11 + $0xc0] ss:$8 sps:$4 sm:$0xff]  }
 0x93d   : > { %10137 = vmatpush1.bf16.msra.mxu1 %v13863_v51  ;;  %v8108_v40 = vadd.f32 %v8106_v41, %v7948_v54 }
 0x93e   : > { %10413 = vmatpush1.bf16.msra.mxu0 %v13884_v36 }
 0x93f   : > { %10414 = vmatprep.subr.bf16.mxu0 %v13889_v59 }
 0x940   : > { %10155 = vmatmul.mubr.bf16.vlgmr.msra.gmra.mrb[64].mxu1 %v10040_v25 }
 0x942   : > { %10415 = vmatpush1.bf16.msra.mxu0 %v13887_v20 }
 0x943   : > { %10416 = vmatprep.subr.bf16.mxu0 %v13892_v17 }
 0x946   : > { %10417 = vmatpush1.bf16.msra.mxu0 %v13890_v57 }
 0x947   : > { %10418 = vmatprep.subr.bf16.mxu0 %v13895_v11 }
 0x94a   : > { %10419 = vmatpush1.bf16.msra.mxu0 %v13893_v43 }
 0x94b   : > { %10420 = vmatprep.subr.bf16.mxu0 %v13898_v58 }
 0x94e   : > { %10421 = vmatpush1.bf16.msra.mxu0 %v13896_v31 }
 0x94f   : > { %10422 = vmatprep.subr.bf16.mxu0 %v13901_v63 }
 0x952   : > { %10423 = vmatpush1.bf16.msra.mxu0 %v13899_v56 }
 0x953   : > { %v8242_v6 = vpop.f32.mrb[40].mxu1 }
 0x954   : > { %v8244_v23 = vpop.f32.mrb[41].mxu1 }
 0x955   : > { %v8251_v50 = vcombine.low %v8242_v6, %v8244_v23  ;;  %v8246_v34 = vpop.f32.mrb[42].mxu1  ;;  %v8721_v27 = vpop.f32.mrb[56].mxu0 }
 0x956   : > { %v8247_v16 = vpop.f32.mrb[43].mxu1  ;;  %v8723_v35 = vpop.f32.mrb[57].mxu0 }
 0x957   : > { %v8258_v29 = vrot.slane %v8251_v50, %v15362_v48  ;;  %v8730_v22 = vcombine.low %v8721_v27, %v8723_v35  ;;  %v8725_v33 = vpop.f32.mrb[58].mxu0  ;;  %v13904_v16 = vld [vmem:[%s15521_s11 + $0xc4] ss:$8 sps:$4 sm:$0xff]  }
 0x958   : > { %v8726_v44 = vpop.f32.mrb[59].mxu0  ;;  %10424 = vmatprep.subr.bf16.mxu0 %v13904_v16 }
 0x959   : > { %v8265_v15 = vrot.slane %v8258_v29, %v15362_v48  ;;  %v8737_v52 = vrot.slane %v8730_v22, %v15362_v48  ;;  %10425 = vmatpush1.bf16.msra.mxu0 %v13902_v8  ;;  %v13905_v44 = vld [vmem:[%s15521_s11 + $0xd0] ss:$8 sps:$4 sm:$0xff]  }
 0x95b   : > { %v8267_v42 = vadd.f32 %v8265_v15, %v8108_v40  ;;  %v8744_v39 = vrot.slane %v8737_v52, %v15362_v48  ;;  %v13907_v15 = vld [vmem:[%s15521_s11 + $0xd4] ss:$8 sps:$4 sm:$0xff]  }
 0x95c   : > { %10426 = vmatprep.subr.bf16.mxu0 %v13907_v15 }
 0x95d   : > { %v8425_v61 = vadd.f32 %v8423_v3, %v8267_v42  ;;  %v13910_v3 = vld [vmem:[%s15521_s11 + $0xe4] ss:$8 sps:$4 sm:$0xff]   ;;  %10427 = vmatpush1.bf16.msra.mxu0 %v13905_v44 }
 0x95e   : > { %10428 = vmatprep.subr.bf16.mxu0 %v13910_v3 }
 0x961   : > { %10429 = vmatpush1.bf16.msra.mxu0 %v13908_v37 }
 0x962   : > { %10430 = vmatprep.subr.bf16.mxu0 %v13913_v38 }
 0x965   : > { %10431 = vmatpush1.bf16.msra.mxu0 %v13911_v10 }
 0x973   : > { %v8561_v26 = vpop.f32.mrb[44].mxu1 }
 0x974   : > { %v8563_v18 = vpop.f32.mrb[45].mxu1 }
 0x975   : > { %v8570_v46 = vcombine.low %v8561_v26, %v8563_v18  ;;  %v8565_v19 = vpop.f32.mrb[46].mxu1  ;;  %v9038_v0 = vpop.f32.mrb[60].mxu0  ;;  %v13920_v26 = vld [vmem:[#allocation13 + $0x58] sm:$0xff]  }
 0x976   : > { %v8566_v28 = vpop.f32.mrb[47].mxu1  ;;  %v9040_v12 = vpop.f32.mrb[61].mxu0  ;;  %v13921_v18 = vld [vmem:[#allocation13 + $0x18] sm:$0xff]  }
 0x977   : > { %v8577_v30 = vrot.slane %v8570_v46, %v15362_v48  ;;  %v9047_v62 = vcombine.low %v9038_v0, %v9040_v12  ;;  %v9042_v53 = vpop.f32.mrb[62].mxu0  ;;  %v13922_v46 = vld [vmem:[#allocation13 + $0x60] sm:$0xff]   ;;  %v13924_v12 = vld [vmem:[#allocation13 + $0x68] sm:$0xff]  }
 0x978   : > { %v9043_v5 = vpop.f32.mrb[63].mxu0  ;;  %v13923_v0 = vld [vmem:[#allocation13 + $0x20] sm:$0xff]  }
 0x979   : > { %v8584_v45 = vrot.slane %v8577_v30, %v15362_v48  ;;  %v9054_v23 = vrot.slane %v9047_v62, %v15362_v48 }
 0x97b   : > { %v8586_v1 = vadd.f32 %v8584_v45, %v8425_v61  ;;  %v9061_v22 = vrot.slane %v9054_v23, %v15362_v48  ;;  %v13914_v61 = vld [vmem:[#allocation13 + $0x40] sm:$0xff]  }
 0x97c   : > { %11888 = vmatprep.subr.bf16.mxu1 %v13914_v61 }
 0x97d   : > { %v8746_v24 = vadd.f32 %v8744_v39, %v8586_v1  ;;  %11889 = vmatpush3.bf16.msra.mxu1 %v13915_v7  ;;  %v13925_v1 = vld [vmem:[#allocation13 + $0x28] sm:$0xff]   ;;  %v10190_v7 = vsub.s32 1, %v15359_v49 }
 0x97e   : > { %11890 = vmatprep.subr.bf16.mxu1 %v13916_v55  ;;  %v10186_v55 = vsub.s32 0, %v15359_v49 }
 0x981   : > { %11891 = vmatpush3.bf16.msra.mxu1 %v13917_v21 }
 0x982   : > { %11892 = vmatprep.subr.bf16.mxu1 %v13918_v2 }
 0x985   : > { %11893 = vmatpush3.bf16.msra.mxu1 %v13919_v4 }
 0x986   : > { %11894 = vmatprep.subr.bf16.mxu1 %v13920_v26 }
 0x989   : > { %11895 = vmatpush3.bf16.msra.mxu1 %v13921_v18 }
 0x98a   : > { %11896 = vmatprep.subr.bf16.mxu1 %v13922_v46  ;;  %v13926_v46 = vld [vmem:[#allocation13 + $0x70] sm:$0xff]  }
 0x98d   : > { %11897 = vmatpush3.bf16.msra.mxu1 %v13923_v0  ;;  %v13928_v0 = vld [vmem:[#allocation13 + $0x78] sm:$0xff]  }
 0x98e   : > { %11898 = vmatprep.subr.bf16.mxu1 %v13924_v12 }
 0x991   : > { %11899 = vmatpush3.bf16.msra.mxu1 %v13925_v1 }
 0x992   : > { %11900 = vmatprep.subr.bf16.mxu1 %v13926_v46 }
 0x993   : > { %v8880_v32 = vpop.f32.mrb[48].mxu1 }
 0x994   : > { %v8882_v51 = vpop.f32.mrb[49].mxu1 }
 0x995   : > { %v8889_v41 = vcombine.low %v8880_v32, %v8882_v51  ;;  %v8884_v54 = vpop.f32.mrb[50].mxu1  ;;  %v9359_v40 = vpop.f32.mrb[64].mxu0 }
 0x996   : > { %v8885_v25 = vpop.f32.mrb[51].mxu1  ;;  %v9361_v6 = vpop.f32.mrb[65].mxu0 }
 0x997   : > { %v8896_v50 = vrot.slane %v8889_v41, %v15362_v48  ;;  %v9368_v34 = vcombine.low %v9359_v40, %v9361_v6  ;;  %v9363_v27 = vpop.f32.mrb[66].mxu0 }
 0x998   : > { %v9364_v35 = vpop.f32.mrb[67].mxu0 }
 0x999   : > { %v8903_v29 = vrot.slane %v8896_v50, %v15362_v48  ;;  %v9375_v5 = vrot.slane %v9368_v34, %v15362_v48 }
 0x99b   : > { %v8905_v33 = vadd.f32 %v8903_v29, %v8746_v24  ;;  %v9382_v47 = vrot.slane %v9375_v5, %v15362_v48 }
 0x99d   : > { %v9063_v42 = vadd.f32 %v9061_v22, %v8905_v33 }
 0x9b3   : > { %v9199_v19 = vpop.f32.mrb[52].mxu1 }
 0x9b4   : > { %v9201_v28 = vpop.f32.mrb[53].mxu1 }
 0x9b5   : > { %v9208_v52 = vcombine.low %v9199_v19, %v9201_v28  ;;  %v9203_v30 = vpop.f32.mrb[54].mxu1  ;;  %v9676_v62 = vpop.f32.mrb[68].mxu0  ;;  %v13927_v19 = vld [vmem:[#allocation13 + $0x30] sm:$0xff]   ;;  %v13929_v28 = vld [vmem:[#allocation13 + $0x38] sm:$0xff]  }
 0x9b6   : > { %v9204_v53 = vpop.f32.mrb[55].mxu1  ;;  %v9678_v13 = vpop.f32.mrb[69].mxu0  ;;  %11901 = vmatpush3.bf16.msra.mxu1 %v13927_v19 }
 0x9b7   : > { %v9215_v9 = vrot.slane %v9208_v52, %v15362_v48  ;;  %v9685_v45 = vcombine.low %v9676_v62, %v9678_v13  ;;  %v9680_v39 = vpop.f32.mrb[70].mxu0  ;;  %11902 = vmatprep.subr.bf16.mxu1 %v13928_v0 }
 0x9b8   : > { %v9681_v14 = vpop.f32.mrb[71].mxu0 }
 0x9b9   : > { %v9222_v60 = vrot.slane %v9215_v9, %v15362_v48  ;;  %v9692_v31 = vrot.slane %v9685_v45, %v15362_v48 }
 0x9ba   : > { %11903 = vmatpush3.bf16.msra.mxu1 %v13929_v28 }
 0x9bb   : > { %v9224_v24 = vadd.f32 %v9222_v60, %v9063_v42  ;;  %v9699_v54 = vrot.slane %v9692_v31, %v15362_v48  ;;  %v10477_v60 = vld [vmem:[%s15548_s23] sm:$0x1] }
 0x9bd   : > { %v9384_v36 = vadd.f32 %v9382_v47, %v9224_v24 }
 0x9d3   : > { %v9518_v59 = vpop.f32.mrb[56].mxu1 }
 0x9d4   : > { %v9520_v20 = vpop.f32.mrb[57].mxu1 }
 0x9d5   : > { %v9527_v17 = vcombine.low %v9518_v59, %v9520_v20  ;;  %v9522_v57 = vpop.f32.mrb[58].mxu1  ;;  %v9997_v11 = vpop.f32.mrb[72].mxu0 }
 0x9d6   : > { %v9523_v43 = vpop.f32.mrb[59].mxu1  ;;  %v9999_v58 = vpop.f32.mrb[73].mxu0 }
 0x9d7   : > { %v9534_v63 = vrot.slane %v9527_v17, %v15362_v48  ;;  %v10006_v56 = vcombine.low %v9997_v11, %v9999_v58  ;;  %v10001_v32 = vpop.f32.mrb[74].mxu0 }
 0x9d8   : > { %v10002_v51 = vpop.f32.mrb[75].mxu0 }
 0x9d9   : > { %v9541_v41 = vrot.slane %v9534_v63, %v15362_v48  ;;  %v10013_v16 = vrot.slane %v10006_v56, %v15362_v48 }
 0x9db   : > { %v9543_v40 = vadd.f32 %v9541_v41, %v9384_v36  ;;  %v10020_v29 = vrot.slane %v10013_v16, %v15362_v48 }
 0x9dd   : > { %v9701_v25 = vadd.f32 %v9699_v54, %v9543_v40 }
 0x9f3   : > { %v9837_v6 = vpop.f32.mrb[60].mxu1 }
 0x9f4   : > { %v9839_v23 = vpop.f32.mrb[61].mxu1 }
 0x9f5   : > { %v9846_v50 = vcombine.low %v9837_v6, %v9839_v23  ;;  %v9841_v34 = vpop.f32.mrb[62].mxu1 }
 0x9f6   : > { %v9842_v27 = vpop.f32.mrb[63].mxu1 }
 0x9f7   : > { %v9853_v35 = vrot.slane %v9846_v50, %v15362_v48 }
 0x9f9   : > { %v9860_v8 = vrot.slane %v9853_v35, %v15362_v48 }
 0x9fb   : > { %v9862_v22 = vadd.f32 %v9860_v8, %v9701_v25 }
 0x9fd   : > { %v10022_v33 = vadd.f32 %v10020_v29, %v9862_v22 }
 0xa13   : > { %v10156_v44 = vpop.f32.mrb[64].mxu1 }
 0xa14   : > { %v10158_v15 = vpop.f32.mrb[65].mxu1 }
 0xa15   : > { %v10165_v3 = vcombine.low %v10156_v44, %v10158_v15  ;;  %v10160_v42 = vpop.f32.mrb[66].mxu1 }
 0xa16   : > { %v10161_v37 = vpop.f32.mrb[67].mxu1 }
 0xa17   : > { %v10172_v38 = vrot.slane %v10165_v3, %v15362_v48 }
 0xa19   : > { %v10179_v10 = vrot.slane %v10172_v38, %v15362_v48  ;;  %v10228_v48 = vld [vmem:[%s15547_s18] sm:$0x3] }
 0xa1a   : > { %v10393_v49 = vrot.slane %v10228_v48, %v10186_v55  ;;  %v10397_v12 = vrot.slane %v10228_v48, %v10190_v7 }
 0xa1b   : > { %v10181_v61 = vadd.f32 %v10179_v10, %v10022_v33 }
 0xa1d   : > { %v10182_v21 = vmax.f32 %v10181_v61, 0.0 }
 0xa1f   : > { %v10191_v2 = vrot.slane %v10182_v21, %v10190_v7  ;;  %v10187_v4 = vrot.slane %v10182_v21, %v10186_v55 }
 0xa21   : > { %v10195_v26 = vpack.c.bf16 %v10191_v2, %v10191_v2  ;;  %v10194_v18 = vpack.c.bf16 %v10187_v4, %v10187_v4 }
 0xa23   : > { %10432 = vmatprep.mubr.bf16.mxu0 %v10195_v26 }
 0xa24   : > { %10433 = vmatmul.mubr.bf16.vlgmr.msra.gmra.mrb[76].mxu0 %v10194_v18 }
 0xaf7   : > { %v10434_v52 = vpop.f32.mrb[76].mxu0 }
 0xaf8   : > { %v10435_v30 = vadd.f32 %v10434_v52, %v10393_v49  ;;  %v10436_v62 = vpop.f32.mrb[77].mxu0 }
 0xaf9   : > { %v10437_v53 = vadd.f32 %v10436_v62, %v10397_v12  ;;  %v10438_v13 = vpop.f32.mrb[78].mxu0 }
 0xafa   : > { %v10441_v5 = vmax.f32 %v10435_v30, 0.0  ;;  %v10439_v9 = vpop.f32.mrb[79].mxu0 }
 0xafb   : > { %v10442_v45 = vmax.f32 %v10437_v53, 0.0 }
 0xafc   : > { %v10443_v1 = vpack.c.bf16 %v10441_v5, %v10441_v5 }
 0xafd   : > { %v10444_v39 = vpack.c.bf16 %v10442_v45, %v10442_v45 }
 0xaff   : > { %10606 = vmatprep.mubr.bf16.mxu1 %v10444_v39 }
 0xb00   : > { %10607 = vmatmul.mubr.bf16.vlgmr.msra.gmra.mrb[68].mxu1 %v10443_v1 }
 0xbd3   : > { %v11904_v14 = vpop.f32.mrb[68].mxu1 }
 0xbd4   : > { %v11905_v47 = vpop.f32.mrb[69].mxu1 }
 0xbd5   : > { %v11906_v24 = vadd.f32 %v11905_v47, %v11904_v14  ;;  %v11907_v36 = vpop.f32.mrb[70].mxu1 }
 0xbd6   : > { %v11908_v59 = vpop.f32.mrb[71].mxu1 }
 0xbd7   : > { %v10609_v20 = vadd.f32 %v11906_v24, %v10477_v60 }
 0xbd9   : > { %v10617_v17 = vrot.slane %v10609_v20, %v10186_v55 }
 0xbdb   : > { %10618 = vst [vmem:[%s551_s22] sm:$0xff] %v10617_v17 }
 0xbdc PF: > { %s15550_s12 = sld [smem:[#allocation18_spill]] }
 0xbe2   : > { %s28_s18 = sadd.s32 1, %s15550_s12  }
 0xbe3   : > { %p25_p6 = scmp.ge.s32.totalorder %s28_s18, 4  }
 0xbe5   :  { %27 = sbr.rel (!%p25_p6) target bundleno = 7 (0x7), region = 218 }
 0xbec   :  { %10638 = vsyncpa [#allocation9], 1 }
 0xbed   :  { %10640 = vsyncpa [#allocation9 + $0x1], 1 }
 0xbee   :  { %10641 = vsyncpa [#allocation11], 1 }
 0xbef   :  { %10642 = vsyncpa [#allocation14], 1 }

</bundles_post_ra>
